<compile_context>
chip_gen: v5e
topology: v5e:2x2
jax: 0.10.0
libtpu: 0.0.40
codegen_flags: <defaults>
</compile_context>

<pallas_src>
import functools

import jax
import jax.numpy as jnp
import numpy as np
from jax import lax
from jax.experimental import pallas as pl
from jax.experimental.pallas import tpu as pltpu

_KW = 4                       # kernel_size
_PAD = 2                      # int(ceil((4-1)/2))
_LRELU_SLOPE = 0.2
_BN_EPS = 1e-5
_LANE = 128
_VMEM_LIMIT = 32 * 1024 * 1024   # explicit scoped VMEM (fits v5e/v6e/v7x)


def _round_up(v, m):
    return ((v + m - 1) // m) * m


# ----------------------------- Pallas kernels ------------------------------

def _conv_row_kernel(*refs, kh, kw, ow, fuse_lrelu):
    """One output row of a stride-1 (kh x kw) conv as per-tap MXU matmuls.

    refs = (w, bias, row_0..row_{kh-1}, out, stats)
      w     : (kh*kw, Cin, CoutP) bf16   constant index_map -> fetched once
      bias  : (1, CoutP)          f32
      row_a : (1, 1, Wp, Cin)     bf16   padded input row (oh + a)
      out   : (1, 1, OW, CoutP)          lane-dense (CoutP % 128 == 0)
      stats : (1, 1, 2, CoutP)    f32    [sum, sumsq] of the pre-act output
    """
    w_ref, b_ref = refs[0], refs[1]
    row_refs = refs[2:2 + kh]
    o_ref, s_ref = refs[2 + kh], refs[3 + kh]
    coutp = w_ref.shape[2]

    acc = jnp.zeros((ow, coutp), jnp.float32) + b_ref[...]      # bias init
    for a in range(kh):
        row = row_refs[a][...][0, 0]                            # (Wp, Cin)
        for b in range(kw):
            xs = row[b:b + ow, :]                               # (OW, Cin)
            acc = acc + jnp.dot(xs, w_ref[a * kw + b],
                                preferred_element_type=jnp.float32)

    # BN batch-statistics partials of the pre-activation conv output, fused
    # into the conv epilogue.  Each grid step writes its own partial so the
    # grid stays fully "parallel" (no cross-step scratch under megacore);
    # the tiny (N*OH, 2, CoutP) partials are reduced in the wrapper.
    s1 = jnp.sum(acc, axis=0, keepdims=True)
    s2 = jnp.sum(acc * acc, axis=0, keepdims=True)
    s_ref[...] = jnp.concatenate([s1, s2], axis=0).reshape(1, 1, 2, coutp)

    if fuse_lrelu:
        acc = jnp.where(acc >= 0.0, acc, _LRELU_SLOPE * acc)
    o_ref[...] = acc.reshape(1, 1, ow, coutp).astype(o_ref.dtype)


def _bn_act_kernel(x_ref, sc_ref, sh_ref, o_ref):
    """Tiled BN normalize (precomputed scale/shift) + LeakyReLU(0.2)."""
    y = x_ref[...].astype(jnp.float32) * sc_ref[...] + sh_ref[...]
    o_ref[...] = jnp.where(y >= 0.0, y, _LRELU_SLOPE * y).astype(o_ref.dtype)


# ------------------------------ layer wrappers ------------------------------

def conv_layer_pallas(x, w, bias, stride, *, fuse_lrelu, out_dtype):
    """Conv2d(k=4, pad=2, stride in {1,2}) on an NHWC bf16 activation.

    Stride-2 convs become stride-1 2x2 convs on a 2x2 space-to-depth input.
    Returns (y, stats): y is (N, OH, OW, CoutP); stats are per-output-row
    [sum, sumsq] partials of the pre-activation output (for fused BN stats).
    """
    N, H, W, c_act = x.shape
    cin_real, cout = w.shape[2], w.shape[3]
    coutp = _round_up(cout, _LANE)
    OH = (H + 2 * _PAD - _KW) // stride + 1
    OW = (W + 2 * _PAD - _KW) // stride + 1

    # Zero-pad weight Cin up to the lane-padded channel count actually carried
    # by the activation (padded activation channels are zero anyway).
    if c_act > cin_real:
        w = jnp.pad(w, ((0, 0), (0, 0), (0, c_act - cin_real), (0, 0)))

    if stride == 2:
        hp = _round_up(H + 2 * _PAD, 2)
        wp = _round_up(W + 2 * _PAD, 2)
        xp = jnp.pad(x, ((0, 0), (_PAD, hp - H - _PAD),
                         (_PAD, wp - W - _PAD), (0, 0)))
        # 2x2 space-to-depth: stride-2 4x4 conv -> stride-1 2x2 conv, 4*C chans
        xp = xp.reshape(N, hp // 2, 2, wp // 2, 2, c_act)
        xp = xp.transpose(0, 1, 3, 2, 4, 5).reshape(N, hp // 2, wp // 2,
                                                    4 * c_act)
        kh = kw_ = 2
        w_eff = w.reshape(2, 2, 2, 2, c_act, cout)
        w_eff = w_eff.transpose(0, 2, 1, 3, 4, 5).reshape(2, 2, 4 * c_act, cout)
    else:
        xp = jnp.pad(x, ((0, 0), (_PAD, _PAD), (_PAD, _PAD), (0, 0)))
        kh = kw_ = _KW
        w_eff = w

    cin_eff = w_eff.shape[2]
    wp_eff = xp.shape[2]

    # bf16 operands (f32 accumulation happens inside the kernel).
    w_mat = jnp.pad(w_eff.reshape(kh * kw_, cin_eff, cout),
                    ((0, 0), (0, 0), (0, coutp - cout))).astype(jnp.bfloat16)
    b_row = jnp.pad(bias, (0, coutp - cout)).reshape(1, coutp).astype(
        jnp.float32)
    xp = xp.astype(jnp.bfloat16)

    kern = functools.partial(_conv_row_kernel, kh=kh, kw=kw_, ow=OW,
                             fuse_lrelu=fuse_lrelu)
    in_specs = [
        pl.BlockSpec((kh * kw_, cin_eff, coutp), lambda n, i: (0, 0, 0)),
        pl.BlockSpec((1, coutp), lambda n, i: (0, 0)),
    ] + [
        pl.BlockSpec((1, 1, wp_eff, cin_eff),
                     lambda n, i, a=a: (n, i + a, 0, 0))
        for a in range(kh)
    ]
    out_shape = (
        jax.ShapeDtypeStruct((N, OH, OW, coutp), out_dtype),
        jax.ShapeDtypeStruct((N, OH, 2, coutp), jnp.float32),
    )
    out_specs = (
        pl.BlockSpec((1, 1, OW, coutp), lambda n, i: (n, i, 0, 0)),
        pl.BlockSpec((1, 1, 2, coutp), lambda n, i: (n, i, 0, 0)),
    )
    y, stats = pl.pallas_call(
        kern,
        grid=(N, OH),
        in_specs=in_specs,
        out_specs=out_specs,
        out_shape=out_shape,
        compiler_params=pltpu.CompilerParams(
            dimension_semantics=("parallel", "parallel"),
            vmem_limit_bytes=_VMEM_LIMIT),
    )(w_mat, b_row, *([xp] * kh))
    return y, stats


def _bn_scale_shift(stats, count, gamma, beta, coutp):
    """Reduce per-row partials -> per-channel scale/shift (biased variance)."""
    s1 = jnp.sum(stats[:, :, 0, :], axis=(0, 1))
    s2 = jnp.sum(stats[:, :, 1, :], axis=(0, 1))
    mean = s1 / count
    var = jnp.maximum(s2 / count - mean * mean, 0.0)
    g = jnp.pad(gamma, (0, coutp - gamma.shape[0]))
    b = jnp.pad(beta, (0, coutp - beta.shape[0]))
    scale = g * lax.rsqrt(var + _BN_EPS)
    shift = b - mean * scale
    return scale.reshape(1, coutp), shift.reshape(1, coutp)


def bn_lrelu_pallas(x, scale, shift):
    """Tiled, pipelined BatchNorm normalize + LeakyReLU(0.2) (NHWC, bf16)."""
    N, OH, OW, cp = x.shape
    return pl.pallas_call(
        _bn_act_kernel,
        grid=(N, OH),
        in_specs=[
            pl.BlockSpec((1, 1, OW, cp), lambda n, i: (n, i, 0, 0)),
            pl.BlockSpec((1, cp), lambda n, i: (0, 0)),
            pl.BlockSpec((1, cp), lambda n, i: (0, 0)),
        ],
        out_specs=pl.BlockSpec((1, 1, OW, cp), lambda n, i: (n, i, 0, 0)),
        out_shape=jax.ShapeDtypeStruct((N, OH, OW, cp), jnp.bfloat16),
        compiler_params=pltpu.CompilerParams(
            dimension_semantics=("parallel", "parallel"),
            vmem_limit_bytes=_VMEM_LIMIT),
    )(x, scale, shift)


# --------------------------- model construction -----------------------------

def make_layer_cfg(input_nc, ndf, n_layers):
    """Mirrors NLayerDiscriminator.__init__ (branch=1, bias=True)."""
    layers = [dict(cin=input_nc, cout=ndf, stride=2, bn=False, act=True)]
    nf = ndf
    for _ in range(1, n_layers):
        nf_prev, nf = nf, min(nf * 2, 512)
        layers.append(dict(cin=nf_prev, cout=nf, stride=2, bn=True, act=True))
    nf_prev, nf = nf, min(nf * 2, 512)
    layers.append(dict(cin=nf_prev, cout=nf, stride=1, bn=True, act=True))
    layers.append(dict(cin=nf, cout=1, stride=1, bn=False, act=False))
    return layers


def init_params(key, layers):
    params = []
    for L in layers:
        key, kw_, kb_ = jax.random.split(key, 3)
        p = dict(
            w=0.02 * jax.random.normal(
                kw_, (_KW, _KW, L["cin"], L["cout"]), jnp.float32),
            b=0.02 * jax.random.normal(kb_, (L["cout"],), jnp.float32),
        )
        if L["bn"]:
            p["gamma"] = jnp.ones((L["cout"],), jnp.float32)
            p["beta"] = jnp.zeros((L["cout"],), jnp.float32)
        params.append(p)
    return params


def nlayer_discriminator_forward(x_nchw, layers, params):
    """getIntermFeat=False path: sequential stream, returns NCHW logits map."""
    x = jnp.transpose(x_nchw, (0, 2, 3, 1)).astype(jnp.bfloat16)   # -> NHWC
    last = len(layers) - 1
    for idx, (L, p) in enumerate(zip(layers, params)):
        fuse = L["act"] and not L["bn"]           # layer 0: conv+lrelu fused
        out_dtype = jnp.float32 if idx == last else jnp.bfloat16
        y, stats = conv_layer_pallas(x, p["w"], p["b"], L["stride"],
                                     fuse_lrelu=fuse, out_dtype=out_dtype)
        if L["bn"]:
            n_, oh_, ow_, cp = y.shape
            scale, shift = _bn_scale_shift(stats, n_ * oh_ * ow_,
                                           p["gamma"], p["beta"], cp)
            y = bn_lrelu_pallas(y, scale, shift)
        x = y
    out = x[..., :layers[-1]["cout"]]             # drop lane padding
    return jnp.transpose(out, (0, 3, 1, 2)).astype(jnp.float32)   # -> NCHW


# ------------------------------ reference (JAX) -----------------------------

def reference_forward(x_nchw, layers, params):
    """Pure-JAX reference with the same bf16-storage / f32-accum policy."""
    x = jnp.transpose(x_nchw, (0, 2, 3, 1)).astype(jnp.bfloat16)
    last = len(layers) - 1
    for idx, (L, p) in enumerate(zip(layers, params)):
        y = lax.conv_general_dilated(
            x, p["w"].astype(jnp.bfloat16),
            (L["stride"], L["stride"]), ((_PAD, _PAD), (_PAD, _PAD)),
            dimension_numbers=("NHWC", "HWIO", "NHWC"),
            preferred_element_type=jnp.float32) + p["b"]
        if L["bn"]:
            mean = jnp.mean(y, axis=(0, 1, 2))
            var = jnp.maximum(jnp.mean(y * y, axis=(0, 1, 2)) - mean * mean,
                              0.0)
            scale = p["gamma"] * lax.rsqrt(var + _BN_EPS)
            shift = p["beta"] - mean * scale
            y = y.astype(jnp.bfloat16).astype(jnp.float32) * scale + shift
        if L["act"]:
            y = jnp.where(y >= 0.0, y, _LRELU_SLOPE * y)
        x = y.astype(jnp.float32 if idx == last else jnp.bfloat16)
    return jnp.transpose(x, (0, 3, 1, 2)).astype(jnp.float32)


# ----------------------------------- main ------------------------------------

if __name__ == "__main__":
    key = jax.random.PRNGKey(0)
    k_in, k_par = jax.random.split(key)

    # Small shapes consistent with the module: NCHW input, input_nc=4.
    N, C, H, W = 2, 4, 16, 16
    input_nc, ndf, n_layers = C, 8, 3

    x = jax.random.normal(k_in, (N, C, H, W), jnp.float32)
    layers = make_layer_cfg(input_nc, ndf, n_layers)
    params = init_params(k_par, layers)

    fwd = jax.jit(lambda inp: nlayer_discriminator_forward(inp, layers, params))
    out = jax.block_until_ready(fwd(x))

    ref = reference_forward(x, layers, params)
    # bf16 operands with f32 accumulation on both sides -> modest tolerance.
    np.testing.assert_allclose(np.asarray(out), np.asarray(ref),
                               rtol=2e-2, atol=2e-2)
    print("KERNEL_OK")
</pallas_src>

<mosaic_0001>
module attributes {stable_mosaic.version = 11 : i64} {
  func.func @_conv_row_kernel(%arg0: i32, %arg1: i32, %arg2: memref<4x16x128xbf16, #tpu.memory_space<vmem>>, %arg3: memref<1x128xf32, #tpu.memory_space<vmem>>, %arg4: memref<1x1x10x16xbf16, #tpu.memory_space<vmem>>, %arg5: memref<1x1x10x16xbf16, #tpu.memory_space<vmem>>, %arg6: memref<1x1x9x128xbf16, #tpu.memory_space<vmem>>, %arg7: memref<1x1x2x128xf32, #tpu.memory_space<vmem>>) attributes {dimension_semantics = [#tpu.dimension_semantics<parallel>, #tpu.dimension_semantics<parallel>], iteration_bounds = array<i64: 2, 9>, scalar_prefetch = 0 : i64, scratch_operands = 0 : i64, tpu.core_type = #tpu.core_type<tc>, window_params = [{pipeline_mode = #tpu.pipeline_mode<synchronous>, transform_indices = @transform_0, window_bounds = array<i64: 4, 16, 128>}, {pipeline_mode = #tpu.pipeline_mode<synchronous>, transform_indices = @transform_1, window_bounds = array<i64: 1, 128>}, {transform_indices = @transform_2, window_bounds = array<i64: 1, 1, 10, 16>}, {transform_indices = @transform_3, window_bounds = array<i64: 1, 1, 10, 16>}, {transform_indices = @transform_4, window_bounds = array<i64: 1, 1, 9, 128>}, {transform_indices = @transform_5, window_bounds = array<i64: 1, 1, 2, 128>}]} {
    %cst = arith.constant 0.000000e+00 : f32
    %0 = vector.broadcast %cst : f32 to vector<9x128xf32>
    %c0 = arith.constant 0 : index
    %c0_0 = arith.constant 0 : index
    %1 = vector.load %arg3[%c0, %c0_0] : memref<1x128xf32, #tpu.memory_space<vmem>>, vector<1x128xf32>
    %2 = vector.broadcast %1 : vector<1x128xf32> to vector<9x128xf32>
    %3 = arith.addf %0, %2 : vector<9x128xf32>
    %c0_1 = arith.constant 0 : index
    %c0_2 = arith.constant 0 : index
    %c0_3 = arith.constant 0 : index
    %c0_4 = arith.constant 0 : index
    %4 = vector.load %arg4[%c0_1, %c0_2, %c0_3, %c0_4] : memref<1x1x10x16xbf16, #tpu.memory_space<vmem>>, vector<1x1x10x16xbf16>
    %5 = vector.shape_cast %4 : vector<1x1x10x16xbf16> to vector<10x16xbf16>
    %6 = vector.extract_strided_slice %5 {offsets = [0, 0], sizes = [9, 16], strides = [1, 1]} : vector<10x16xbf16> to vector<9x16xbf16>
    %c0_5 = arith.constant 0 : index
    %c0_6 = arith.constant 0 : index
    %c0_7 = arith.constant 0 : index
    %7 = vector.load %arg2[%c0_5, %c0_6, %c0_7] : memref<4x16x128xbf16, #tpu.memory_space<vmem>>, vector<1x16x128xbf16>
    %8 = vector.shape_cast %7 : vector<1x16x128xbf16> to vector<16x128xbf16>
    %cst_8 = arith.constant dense<0.000000e+00> : vector<9x128xf32>
    %9 = tpu.matmul %6, %8, %cst_8 {dimension_numbers = #tpu.dot_dimension_numbers<[1], [0], [0], [1], [0, 0, 1, 1], [], []>} : vector<9x16xbf16>, vector<16x128xbf16>, vector<9x128xf32> -> vector<9x128xf32>
    %10 = arith.addf %3, %9 : vector<9x128xf32>
    %11 = vector.extract_strided_slice %5 {offsets = [1, 0], sizes = [9, 16], strides = [1, 1]} : vector<10x16xbf16> to vector<9x16xbf16>
    %c1 = arith.constant 1 : index
    %c0_9 = arith.constant 0 : index
    %c0_10 = arith.constant 0 : index
    %12 = vector.load %arg2[%c1, %c0_9, %c0_10] : memref<4x16x128xbf16, #tpu.memory_space<vmem>>, vector<1x16x128xbf16>
    %13 = vector.shape_cast %12 : vector<1x16x128xbf16> to vector<16x128xbf16>
    %cst_11 = arith.constant dense<0.000000e+00> : vector<9x128xf32>
    %14 = tpu.matmul %11, %13, %cst_11 {dimension_numbers = #tpu.dot_dimension_numbers<[1], [0], [0], [1], [0, 0, 1, 1], [], []>} : vector<9x16xbf16>, vector<16x128xbf16>, vector<9x128xf32> -> vector<9x128xf32>
    %15 = arith.addf %10, %14 : vector<9x128xf32>
    %c0_12 = arith.constant 0 : index
    %c0_13 = arith.constant 0 : index
    %c0_14 = arith.constant 0 : index
    %c0_15 = arith.constant 0 : index
    %16 = vector.load %arg5[%c0_12, %c0_13, %c0_14, %c0_15] : memref<1x1x10x16xbf16, #tpu.memory_space<vmem>>, vector<1x1x10x16xbf16>
    %17 = vector.shape_cast %16 : vector<1x1x10x16xbf16> to vector<10x16xbf16>
    %18 = vector.extract_strided_slice %17 {offsets = [0, 0], sizes = [9, 16], strides = [1, 1]} : vector<10x16xbf16> to vector<9x16xbf16>
    %c2 = arith.constant 2 : index
    %c0_16 = arith.constant 0 : index
    %c0_17 = arith.constant 0 : index
    %19 = vector.load %arg2[%c2, %c0_16, %c0_17] : memref<4x16x128xbf16, #tpu.memory_space<vmem>>, vector<1x16x128xbf16>
    %20 = vector.shape_cast %19 : vector<1x16x128xbf16> to vector<16x128xbf16>
    %cst_18 = arith.constant dense<0.000000e+00> : vector<9x128xf32>
    %21 = tpu.matmul %18, %20, %cst_18 {dimension_numbers = #tpu.dot_dimension_numbers<[1], [0], [0], [1], [0, 0, 1, 1], [], []>} : vector<9x16xbf16>, vector<16x128xbf16>, vector<9x128xf32> -> vector<9x128xf32>
    %22 = arith.addf %15, %21 : vector<9x128xf32>
    %23 = vector.extract_strided_slice %17 {offsets = [1, 0], sizes = [9, 16], strides = [1, 1]} : vector<10x16xbf16> to vector<9x16xbf16>
    %c3 = arith.constant 3 : index
    %c0_19 = arith.constant 0 : index
    %c0_20 = arith.constant 0 : index
    %24 = vector.load %arg2[%c3, %c0_19, %c0_20] : memref<4x16x128xbf16, #tpu.memory_space<vmem>>, vector<1x16x128xbf16>
    %25 = vector.shape_cast %24 : vector<1x16x128xbf16> to vector<16x128xbf16>
    %cst_21 = arith.constant dense<0.000000e+00> : vector<9x128xf32>
    %26 = tpu.matmul %23, %25, %cst_21 {dimension_numbers = #tpu.dot_dimension_numbers<[1], [0], [0], [1], [0, 0, 1, 1], [], []>} : vector<9x16xbf16>, vector<16x128xbf16>, vector<9x128xf32> -> vector<9x128xf32>
    %27 = arith.addf %22, %26 : vector<9x128xf32>
    %cst_22 = arith.constant dense<0.000000e+00> : vector<128xf32>
    %28 = vector.multi_reduction <add>, %27, %cst_22 [0] : vector<9x128xf32> to vector<128xf32>
    %29 = vector.shape_cast %28 : vector<128xf32> to vector<1x128xf32>
    %30 = arith.mulf %27, %27 : vector<9x128xf32>
    %cst_23 = arith.constant dense<0.000000e+00> : vector<128xf32>
    %31 = vector.multi_reduction <add>, %30, %cst_23 [0] : vector<9x128xf32> to vector<128xf32>
    %32 = vector.shape_cast %31 : vector<128xf32> to vector<1x128xf32>
    %33 = tpu.concatenate %29, %32 in 0 : vector<1x128xf32>, vector<1x128xf32> -> vector<2x128xf32>
    %34 = vector.shape_cast %33 : vector<2x128xf32> to vector<1x1x2x128xf32>
    %c0_24 = arith.constant 0 : index
    %c0_25 = arith.constant 0 : index
    %c0_26 = arith.constant 0 : index
    %c0_27 = arith.constant 0 : index
    %35 = vector.load %arg7[%c0_24, %c0_25, %c0_26, %c0_27] : memref<1x1x2x128xf32, #tpu.memory_space<vmem>>, vector<1x1x2x128xf32>
    tpu.vector_store %arg7[%c0_24, %c0_25, %c0_26, %c0_27], %34 {strides = array<i32>} : memref<1x1x2x128xf32, #tpu.memory_space<vmem>>, vector<1x1x2x128xf32>,
    %cst_28 = arith.constant 0.000000e+00 : f32
    %36 = vector.broadcast %cst_28 : f32 to vector<9x128xf32>
    %37 = arith.cmpf oge, %27, %36 : vector<9x128xf32>
    %cst_29 = arith.constant 2.000000e-01 : f32
    %38 = vector.broadcast %cst_29 : f32 to vector<9x128xf32>
    %39 = arith.mulf %38, %27 : vector<9x128xf32>
    %40 = arith.select %37, %27, %39 : vector<9x128xi1>, vector<9x128xf32>
    %41 = vector.shape_cast %40 : vector<9x128xf32> to vector<1x1x9x128xf32>
    %42 = arith.truncf %41 : vector<1x1x9x128xf32> to vector<1x1x9x128xbf16>
    %c0_30 = arith.constant 0 : index
    %c0_31 = arith.constant 0 : index
    %c0_32 = arith.constant 0 : index
    %c0_33 = arith.constant 0 : index
    %43 = vector.load %arg6[%c0_30, %c0_31, %c0_32, %c0_33] : memref<1x1x9x128xbf16, #tpu.memory_space<vmem>>, vector<1x1x9x128xbf16>
    tpu.vector_store %arg6[%c0_30, %c0_31, %c0_32, %c0_33], %42 {strides = array<i32>} : memref<1x1x9x128xbf16, #tpu.memory_space<vmem>>, vector<1x1x9x128xbf16>,
    return
  }
  func.func @transform_0(%arg0: i32, %arg1: i32) -> (i32, i32, i32) {
    %c0_i32 = arith.constant 0 : i32
    %c0_i32_0 = arith.constant 0 : i32
    %c0_i32_1 = arith.constant 0 : i32
    %c0_i32_2 = arith.constant 0 : i32
    return %c0_i32, %c0_i32_0, %c0_i32_1 : i32, i32, i32
  }
  func.func @transform_1(%arg0: i32, %arg1: i32) -> (i32, i32) {
    %c0_i32 = arith.constant 0 : i32
    %c0_i32_0 = arith.constant 0 : i32
    %c0_i32_1 = arith.constant 0 : i32
    return %c0_i32, %c0_i32_0 : i32, i32
  }
  func.func @transform_2(%arg0: i32, %arg1: i32) -> (i32, i32, i32, i32) {
    %c0_i32 = arith.constant 0 : i32
    %0 = arith.addi %arg1, %c0_i32 : i32
    %c0_i32_0 = arith.constant 0 : i32
    %c0_i32_1 = arith.constant 0 : i32
    %c0_i32_2 = arith.constant 0 : i32
    return %arg0, %0, %c0_i32_0, %c0_i32_1 : i32, i32, i32, i32
  }
  func.func @transform_3(%arg0: i32, %arg1: i32) -> (i32, i32, i32, i32) {
    %c1_i32 = arith.constant 1 : i32
    %0 = arith.addi %arg1, %c1_i32 : i32
    %c0_i32 = arith.constant 0 : i32
    %c0_i32_0 = arith.constant 0 : i32
    %c0_i32_1 = arith.constant 0 : i32
    return %arg0, %0, %c0_i32, %c0_i32_0 : i32, i32, i32, i32
  }
  func.func @transform_4(%arg0: i32, %arg1: i32) -> (i32, i32, i32, i32) {
    %c0_i32 = arith.constant 0 : i32
    %c0_i32_0 = arith.constant 0 : i32
    %c0_i32_1 = arith.constant 0 : i32
    return %arg0, %arg1, %c0_i32, %c0_i32_0 : i32, i32, i32, i32
  }
  func.func @transform_5(%arg0: i32, %arg1: i32) -> (i32, i32, i32, i32) {
    %c0_i32 = arith.constant 0 : i32
    %c0_i32_0 = arith.constant 0 : i32
    %c0_i32_1 = arith.constant 0 : i32
    return %arg0, %arg1, %c0_i32, %c0_i32_0 : i32, i32, i32, i32
  }
}

module attributes {stable_mosaic.version = 11 : i64} {
  func.func @_conv_row_kernel(%arg0: i32, %arg1: i32, %arg2: memref<4x512x128xbf16, #tpu.memory_space<vmem>>, %arg3: memref<1x128xf32, #tpu.memory_space<vmem>>, %arg4: memref<1x1x7x512xbf16, #tpu.memory_space<vmem>>, %arg5: memref<1x1x7x512xbf16, #tpu.memory_space<vmem>>, %arg6: memref<1x1x5x128xbf16, #tpu.memory_space<vmem>>, %arg7: memref<1x1x2x128xf32, #tpu.memory_space<vmem>>) attributes {dimension_semantics = [#tpu.dimension_semantics<parallel>, #tpu.dimension_semantics<parallel>], iteration_bounds = array<i64: 2, 5>, scalar_prefetch = 0 : i64, scratch_operands = 0 : i64, tpu.core_type = #tpu.core_type<tc>, window_params = [{pipeline_mode = #tpu.pipeline_mode<synchronous>, transform_indices = @transform_0, window_bounds = array<i64: 4, 512, 128>}, {pipeline_mode = #tpu.pipeline_mode<synchronous>, transform_indices = @transform_1, window_bounds = array<i64: 1, 128>}, {transform_indices = @transform_2, window_bounds = array<i64: 1, 1, 7, 512>}, {transform_indices = @transform_3, window_bounds = array<i64: 1, 1, 7, 512>}, {transform_indices = @transform_4, window_bounds = array<i64: 1, 1, 5, 128>}, {transform_indices = @transform_5, window_bounds = array<i64: 1, 1, 2, 128>}]} {
    %cst = arith.constant 0.000000e+00 : f32
    %0 = vector.broadcast %cst : f32 to vector<5x128xf32>
    %c0 = arith.constant 0 : index
    %c0_0 = arith.constant 0 : index
    %1 = vector.load %arg3[%c0, %c0_0] : memref<1x128xf32, #tpu.memory_space<vmem>>, vector<1x128xf32>
    %2 = vector.broadcast %1 : vector<1x128xf32> to vector<5x128xf32>
    %3 = arith.addf %0, %2 : vector<5x128xf32>
    %c0_1 = arith.constant 0 : index
    %c0_2 = arith.constant 0 : index
    %c0_3 = arith.constant 0 : index
    %c0_4 = arith.constant 0 : index
    %4 = vector.load %arg4[%c0_1, %c0_2, %c0_3, %c0_4] : memref<1x1x7x512xbf16, #tpu.memory_space<vmem>>, vector<1x1x7x512xbf16>
    %5 = vector.shape_cast %4 : vector<1x1x7x512xbf16> to vector<7x512xbf16>
    %6 = vector.extract_strided_slice %5 {offsets = [0, 0], sizes = [5, 512], strides = [1, 1]} : vector<7x512xbf16> to vector<5x512xbf16>
    %c0_5 = arith.constant 0 : index
    %c0_6 = arith.constant 0 : index
    %c0_7 = arith.constant 0 : index
    %7 = vector.load %arg2[%c0_5, %c0_6, %c0_7] : memref<4x512x128xbf16, #tpu.memory_space<vmem>>, vector<1x512x128xbf16>
    %8 = vector.shape_cast %7 : vector<1x512x128xbf16> to vector<512x128xbf16>
    %cst_8 = arith.constant dense<0.000000e+00> : vector<5x128xf32>
    %9 = tpu.matmul %6, %8, %cst_8 {dimension_numbers = #tpu.dot_dimension_numbers<[1], [0], [0], [1], [0, 0, 1, 1], [], []>} : vector<5x512xbf16>, vector<512x128xbf16>, vector<5x128xf32> -> vector<5x128xf32>
    %10 = arith.addf %3, %9 : vector<5x128xf32>
    %11 = vector.extract_strided_slice %5 {offsets = [1, 0], sizes = [5, 512], strides = [1, 1]} : vector<7x512xbf16> to vector<5x512xbf16>
    %c1 = arith.constant 1 : index
    %c0_9 = arith.constant 0 : index
    %c0_10 = arith.constant 0 : index
    %12 = vector.load %arg2[%c1, %c0_9, %c0_10] : memref<4x512x128xbf16, #tpu.memory_space<vmem>>, vector<1x512x128xbf16>
    %13 = vector.shape_cast %12 : vector<1x512x128xbf16> to vector<512x128xbf16>
    %cst_11 = arith.constant dense<0.000000e+00> : vector<5x128xf32>
    %14 = tpu.matmul %11, %13, %cst_11 {dimension_numbers = #tpu.dot_dimension_numbers<[1], [0], [0], [1], [0, 0, 1, 1], [], []>} : vector<5x512xbf16>, vector<512x128xbf16>, vector<5x128xf32> -> vector<5x128xf32>
    %15 = arith.addf %10, %14 : vector<5x128xf32>
    %c0_12 = arith.constant 0 : index
    %c0_13 = arith.constant 0 : index
    %c0_14 = arith.constant 0 : index
    %c0_15 = arith.constant 0 : index
    %16 = vector.load %arg5[%c0_12, %c0_13, %c0_14, %c0_15] : memref<1x1x7x512xbf16, #tpu.memory_space<vmem>>, vector<1x1x7x512xbf16>
    %17 = vector.shape_cast %16 : vector<1x1x7x512xbf16> to vector<7x512xbf16>
    %18 = vector.extract_strided_slice %17 {offsets = [0, 0], sizes = [5, 512], strides = [1, 1]} : vector<7x512xbf16> to vector<5x512xbf16>
    %c2 = arith.constant 2 : index
    %c0_16 = arith.constant 0 : index
    %c0_17 = arith.constant 0 : index
    %19 = vector.load %arg2[%c2, %c0_16, %c0_17] : memref<4x512x128xbf16, #tpu.memory_space<vmem>>, vector<1x512x128xbf16>
    %20 = vector.shape_cast %19 : vector<1x512x128xbf16> to vector<512x128xbf16>
    %cst_18 = arith.constant dense<0.000000e+00> : vector<5x128xf32>
    %21 = tpu.matmul %18, %20, %cst_18 {dimension_numbers = #tpu.dot_dimension_numbers<[1], [0], [0], [1], [0, 0, 1, 1], [], []>} : vector<5x512xbf16>, vector<512x128xbf16>, vector<5x128xf32> -> vector<5x128xf32>
    %22 = arith.addf %15, %21 : vector<5x128xf32>
    %23 = vector.extract_strided_slice %17 {offsets = [1, 0], sizes = [5, 512], strides = [1, 1]} : vector<7x512xbf16> to vector<5x512xbf16>
    %c3 = arith.constant 3 : index
    %c0_19 = arith.constant 0 : index
    %c0_20 = arith.constant 0 : index
    %24 = vector.load %arg2[%c3, %c0_19, %c0_20] : memref<4x512x128xbf16, #tpu.memory_space<vmem>>, vector<1x512x128xbf16>
    %25 = vector.shape_cast %24 : vector<1x512x128xbf16> to vector<512x128xbf16>
    %cst_21 = arith.constant dense<0.000000e+00> : vector<5x128xf32>
    %26 = tpu.matmul %23, %25, %cst_21 {dimension_numbers = #tpu.dot_dimension_numbers<[1], [0], [0], [1], [0, 0, 1, 1], [], []>} : vector<5x512xbf16>, vector<512x128xbf16>, vector<5x128xf32> -> vector<5x128xf32>
    %27 = arith.addf %22, %26 : vector<5x128xf32>
    %cst_22 = arith.constant dense<0.000000e+00> : vector<128xf32>
    %28 = vector.multi_reduction <add>, %27, %cst_22 [0] : vector<5x128xf32> to vector<128xf32>
    %29 = vector.shape_cast %28 : vector<128xf32> to vector<1x128xf32>
    %30 = arith.mulf %27, %27 : vector<5x128xf32>
    %cst_23 = arith.constant dense<0.000000e+00> : vector<128xf32>
    %31 = vector.multi_reduction <add>, %30, %cst_23 [0] : vector<5x128xf32> to vector<128xf32>
    %32 = vector.shape_cast %31 : vector<128xf32> to vector<1x128xf32>
    %33 = tpu.concatenate %29, %32 in 0 : vector<1x128xf32>, vector<1x128xf32> -> vector<2x128xf32>
    %34 = vector.shape_cast %33 : vector<2x128xf32> to vector<1x1x2x128xf32>
    %c0_24 = arith.constant 0 : index
    %c0_25 = arith.constant 0 : index
    %c0_26 = arith.constant 0 : index
    %c0_27 = arith.constant 0 : index
    %35 = vector.load %arg7[%c0_24, %c0_25, %c0_26, %c0_27] : memref<1x1x2x128xf32, #tpu.memory_space<vmem>>, vector<1x1x2x128xf32>
    tpu.vector_store %arg7[%c0_24, %c0_25, %c0_26, %c0_27], %34 {strides = array<i32>} : memref<1x1x2x128xf32, #tpu.memory_space<vmem>>, vector<1x1x2x128xf32>,
    %36 = vector.shape_cast %27 : vector<5x128xf32> to vector<1x1x5x128xf32>
    %37 = arith.truncf %36 : vector<1x1x5x128xf32> to vector<1x1x5x128xbf16>
    %c0_28 = arith.constant 0 : index
    %c0_29 = arith.constant 0 : index
    %c0_30 = arith.constant 0 : index
    %c0_31 = arith.constant 0 : index
    %38 = vector.load %arg6[%c0_28, %c0_29, %c0_30, %c0_31] : memref<1x1x5x128xbf16, #tpu.memory_space<vmem>>, vector<1x1x5x128xbf16>
    tpu.vector_store %arg6[%c0_28, %c0_29, %c0_30, %c0_31], %37 {strides = array<i32>} : memref<1x1x5x128xbf16, #tpu.memory_space<vmem>>, vector<1x1x5x128xbf16>,
    return
  }
  func.func @transform_0(%arg0: i32, %arg1: i32) -> (i32, i32, i32) {
    %c0_i32 = arith.constant 0 : i32
    %c0_i32_0 = arith.constant 0 : i32
    %c0_i32_1 = arith.constant 0 : i32
    %c0_i32_2 = arith.constant 0 : i32
    return %c0_i32, %c0_i32_0, %c0_i32_1 : i32, i32, i32
  }
  func.func @transform_1(%arg0: i32, %arg1: i32) -> (i32, i32) {
    %c0_i32 = arith.constant 0 : i32
    %c0_i32_0 = arith.constant 0 : i32
    %c0_i32_1 = arith.constant 0 : i32
    return %c0_i32, %c0_i32_0 : i32, i32
  }
  func.func @transform_2(%arg0: i32, %arg1: i32) -> (i32, i32, i32, i32) {
    %c0_i32 = arith.constant 0 : i32
    %0 = arith.addi %arg1, %c0_i32 : i32
    %c0_i32_0 = arith.constant 0 : i32
    %c0_i32_1 = arith.constant 0 : i32
    %c0_i32_2 = arith.constant 0 : i32
    return %arg0, %0, %c0_i32_0, %c0_i32_1 : i32, i32, i32, i32
  }
  func.func @transform_3(%arg0: i32, %arg1: i32) -> (i32, i32, i32, i32) {
    %c1_i32 = arith.constant 1 : i32
    %0 = arith.addi %arg1, %c1_i32 : i32
    %c0_i32 = arith.constant 0 : i32
    %c0_i32_0 = arith.constant 0 : i32
    %c0_i32_1 = arith.constant 0 : i32
    return %arg0, %0, %c0_i32, %c0_i32_0 : i32, i32, i32, i32
  }
  func.func @transform_4(%arg0: i32, %arg1: i32) -> (i32, i32, i32, i32) {
    %c0_i32 = arith.constant 0 : i32
    %c0_i32_0 = arith.constant 0 : i32
    %c0_i32_1 = arith.constant 0 : i32
    return %arg0, %arg1, %c0_i32, %c0_i32_0 : i32, i32, i32, i32
  }
  func.func @transform_5(%arg0: i32, %arg1: i32) -> (i32, i32, i32, i32) {
    %c0_i32 = arith.constant 0 : i32
    %c0_i32_0 = arith.constant 0 : i32
    %c0_i32_1 = arith.constant 0 : i32
    return %arg0, %arg1, %c0_i32, %c0_i32_0 : i32, i32, i32, i32
  }
}

module attributes {stable_mosaic.version = 11 : i64} {
  func.func @_bn_act_kernel(%arg0: i32, %arg1: i32, %arg2: memref<1x1x5x128xbf16, #tpu.memory_space<vmem>>, %arg3: memref<1x128xf32, #tpu.memory_space<vmem>>, %arg4: memref<1x128xf32, #tpu.memory_space<vmem>>, %arg5: memref<1x1x5x128xbf16, #tpu.memory_space<vmem>>) attributes {dimension_semantics = [#tpu.dimension_semantics<parallel>, #tpu.dimension_semantics<parallel>], iteration_bounds = array<i64: 2, 5>, scalar_prefetch = 0 : i64, scratch_operands = 0 : i64, tpu.core_type = #tpu.core_type<tc>, window_params = [{transform_indices = @transform_0, window_bounds = array<i64: 1, 1, 5, 128>}, {pipeline_mode = #tpu.pipeline_mode<synchronous>, transform_indices = @transform_1, window_bounds = array<i64: 1, 128>}, {pipeline_mode = #tpu.pipeline_mode<synchronous>, transform_indices = @transform_2, window_bounds = array<i64: 1, 128>}, {transform_indices = @transform_3, window_bounds = array<i64: 1, 1, 5, 128>}]} {
    %c0 = arith.constant 0 : index
    %c0_0 = arith.constant 0 : index
    %c0_1 = arith.constant 0 : index
    %c0_2 = arith.constant 0 : index
    %0 = vector.load %arg2[%c0, %c0_0, %c0_1, %c0_2] : memref<1x1x5x128xbf16, #tpu.memory_space<vmem>>, vector<1x1x5x128xbf16>
    %1 = arith.extf %0 : vector<1x1x5x128xbf16> to vector<1x1x5x128xf32>
    %c0_3 = arith.constant 0 : index
    %c0_4 = arith.constant 0 : index
    %2 = vector.load %arg3[%c0_3, %c0_4] : memref<1x128xf32, #tpu.memory_space<vmem>>, vector<1x128xf32>
    %3 = vector.shape_cast %2 : vector<1x128xf32> to vector<1x1x1x128xf32>
    %4 = vector.broadcast %3 : vector<1x1x1x128xf32> to vector<1x1x5x128xf32>
    %5 = arith.mulf %1, %4 : vector<1x1x5x128xf32>
    %c0_5 = arith.constant 0 : index
    %c0_6 = arith.constant 0 : index
    %6 = vector.load %arg4[%c0_5, %c0_6] : memref<1x128xf32, #tpu.memory_space<vmem>>, vector<1x128xf32>
    %7 = vector.shape_cast %6 : vector<1x128xf32> to vector<1x1x1x128xf32>
    %8 = vector.broadcast %7 : vector<1x1x1x128xf32> to vector<1x1x5x128xf32>
    %9 = arith.addf %5, %8 : vector<1x1x5x128xf32>
    %cst = arith.constant 0.000000e+00 : f32
    %10 = vector.broadcast %cst : f32 to vector<1x1x5x128xf32>
    %11 = arith.cmpf oge, %9, %10 : vector<1x1x5x128xf32>
    %cst_7 = arith.constant 2.000000e-01 : f32
    %12 = vector.broadcast %cst_7 : f32 to vector<1x1x5x128xf32>
    %13 = arith.mulf %12, %9 : vector<1x1x5x128xf32>
    %14 = arith.select %11, %9, %13 : vector<1x1x5x128xi1>, vector<1x1x5x128xf32>
    %15 = arith.truncf %14 : vector<1x1x5x128xf32> to vector<1x1x5x128xbf16>
    %c0_8 = arith.constant 0 : index
    %c0_9 = arith.constant 0 : index
    %c0_10 = arith.constant 0 : index
    %c0_11 = arith.constant 0 : index
    %16 = vector.load %arg5[%c0_8, %c0_9, %c0_10, %c0_11] : memref<1x1x5x128xbf16, #tpu.memory_space<vmem>>, vector<1x1x5x128xbf16>
    tpu.vector_store %arg5[%c0_8, %c0_9, %c0_10, %c0_11], %15 {strides = array<i32>} : memref<1x1x5x128xbf16, #tpu.memory_space<vmem>>, vector<1x1x5x128xbf16>,
    return
  }
  func.func @transform_0(%arg0: i32, %arg1: i32) -> (i32, i32, i32, i32) {
    %c0_i32 = arith.constant 0 : i32
    %c0_i32_0 = arith.constant 0 : i32
    %c0_i32_1 = arith.constant 0 : i32
    return %arg0, %arg1, %c0_i32, %c0_i32_0 : i32, i32, i32, i32
  }
  func.func @transform_1(%arg0: i32, %arg1: i32) -> (i32, i32) {
    %c0_i32 = arith.constant 0 : i32
    %c0_i32_0 = arith.constant 0 : i32
    %c0_i32_1 = arith.constant 0 : i32
    return %c0_i32, %c0_i32_0 : i32, i32
  }
  func.func @transform_2(%arg0: i32, %arg1: i32) -> (i32, i32) {
    %c0_i32 = arith.constant 0 : i32
    %c0_i32_0 = arith.constant 0 : i32
    %c0_i32_1 = arith.constant 0 : i32
    return %c0_i32, %c0_i32_0 : i32, i32
  }
  func.func @transform_3(%arg0: i32, %arg1: i32) -> (i32, i32, i32, i32) {
    %c0_i32 = arith.constant 0 : i32
    %c0_i32_0 = arith.constant 0 : i32
    %c0_i32_1 = arith.constant 0 : i32
    return %arg0, %arg1, %c0_i32, %c0_i32_0 : i32, i32, i32, i32
  }
}

module attributes {stable_mosaic.version = 11 : i64} {
  func.func @_conv_row_kernel(%arg0: i32, %arg1: i32, %arg2: memref<4x512x128xbf16, #tpu.memory_space<vmem>>, %arg3: memref<1x128xf32, #tpu.memory_space<vmem>>, %arg4: memref<1x1x5x512xbf16, #tpu.memory_space<vmem>>, %arg5: memref<1x1x5x512xbf16, #tpu.memory_space<vmem>>, %arg6: memref<1x1x3x128xbf16, #tpu.memory_space<vmem>>, %arg7: memref<1x1x2x128xf32, #tpu.memory_space<vmem>>) attributes {dimension_semantics = [#tpu.dimension_semantics<parallel>, #tpu.dimension_semantics<parallel>], iteration_bounds = array<i64: 2, 3>, scalar_prefetch = 0 : i64, scratch_operands = 0 : i64, tpu.core_type = #tpu.core_type<tc>, window_params = [{pipeline_mode = #tpu.pipeline_mode<synchronous>, transform_indices = @transform_0, window_bounds = array<i64: 4, 512, 128>}, {pipeline_mode = #tpu.pipeline_mode<synchronous>, transform_indices = @transform_1, window_bounds = array<i64: 1, 128>}, {transform_indices = @transform_2, window_bounds = array<i64: 1, 1, 5, 512>}, {transform_indices = @transform_3, window_bounds = array<i64: 1, 1, 5, 512>}, {transform_indices = @transform_4, window_bounds = array<i64: 1, 1, 3, 128>}, {transform_indices = @transform_5, window_bounds = array<i64: 1, 1, 2, 128>}]} {
    %cst = arith.constant 0.000000e+00 : f32
    %0 = vector.broadcast %cst : f32 to vector<3x128xf32>
    %c0 = arith.constant 0 : index
    %c0_0 = arith.constant 0 : index
    %1 = vector.load %arg3[%c0, %c0_0] : memref<1x128xf32, #tpu.memory_space<vmem>>, vector<1x128xf32>
    %2 = vector.broadcast %1 : vector<1x128xf32> to vector<3x128xf32>
    %3 = arith.addf %0, %2 : vector<3x128xf32>
    %c0_1 = arith.constant 0 : index
    %c0_2 = arith.constant 0 : index
    %c0_3 = arith.constant 0 : index
    %c0_4 = arith.constant 0 : index
    %4 = vector.load %arg4[%c0_1, %c0_2, %c0_3, %c0_4] : memref<1x1x5x512xbf16, #tpu.memory_space<vmem>>, vector<1x1x5x512xbf16>
    %5 = vector.shape_cast %4 : vector<1x1x5x512xbf16> to vector<5x512xbf16>
    %6 = vector.extract_strided_slice %5 {offsets = [0, 0], sizes = [3, 512], strides = [1, 1]} : vector<5x512xbf16> to vector<3x512xbf16>
    %c0_5 = arith.constant 0 : index
    %c0_6 = arith.constant 0 : index
    %c0_7 = arith.constant 0 : index
    %7 = vector.load %arg2[%c0_5, %c0_6, %c0_7] : memref<4x512x128xbf16, #tpu.memory_space<vmem>>, vector<1x512x128xbf16>
    %8 = vector.shape_cast %7 : vector<1x512x128xbf16> to vector<512x128xbf16>
    %cst_8 = arith.constant dense<0.000000e+00> : vector<3x128xf32>
    %9 = tpu.matmul %6, %8, %cst_8 {dimension_numbers = #tpu.dot_dimension_numbers<[1], [0], [0], [1], [0, 0, 1, 1], [], []>} : vector<3x512xbf16>, vector<512x128xbf16>, vector<3x128xf32> -> vector<3x128xf32>
    %10 = arith.addf %3, %9 : vector<3x128xf32>
    %11 = vector.extract_strided_slice %5 {offsets = [1, 0], sizes = [3, 512], strides = [1, 1]} : vector<5x512xbf16> to vector<3x512xbf16>
    %c1 = arith.constant 1 : index
    %c0_9 = arith.constant 0 : index
    %c0_10 = arith.constant 0 : index
    %12 = vector.load %arg2[%c1, %c0_9, %c0_10] : memref<4x512x128xbf16, #tpu.memory_space<vmem>>, vector<1x512x128xbf16>
    %13 = vector.shape_cast %12 : vector<1x512x128xbf16> to vector<512x128xbf16>
    %cst_11 = arith.constant dense<0.000000e+00> : vector<3x128xf32>
    %14 = tpu.matmul %11, %13, %cst_11 {dimension_numbers = #tpu.dot_dimension_numbers<[1], [0], [0], [1], [0, 0, 1, 1], [], []>} : vector<3x512xbf16>, vector<512x128xbf16>, vector<3x128xf32> -> vector<3x128xf32>
    %15 = arith.addf %10, %14 : vector<3x128xf32>
    %c0_12 = arith.constant 0 : index
    %c0_13 = arith.constant 0 : index
    %c0_14 = arith.constant 0 : index
    %c0_15 = arith.constant 0 : index
    %16 = vector.load %arg5[%c0_12, %c0_13, %c0_14, %c0_15] : memref<1x1x5x512xbf16, #tpu.memory_space<vmem>>, vector<1x1x5x512xbf16>
    %17 = vector.shape_cast %16 : vector<1x1x5x512xbf16> to vector<5x512xbf16>
    %18 = vector.extract_strided_slice %17 {offsets = [0, 0], sizes = [3, 512], strides = [1, 1]} : vector<5x512xbf16> to vector<3x512xbf16>
    %c2 = arith.constant 2 : index
    %c0_16 = arith.constant 0 : index
    %c0_17 = arith.constant 0 : index
    %19 = vector.load %arg2[%c2, %c0_16, %c0_17] : memref<4x512x128xbf16, #tpu.memory_space<vmem>>, vector<1x512x128xbf16>
    %20 = vector.shape_cast %19 : vector<1x512x128xbf16> to vector<512x128xbf16>
    %cst_18 = arith.constant dense<0.000000e+00> : vector<3x128xf32>
    %21 = tpu.matmul %18, %20, %cst_18 {dimension_numbers = #tpu.dot_dimension_numbers<[1], [0], [0], [1], [0, 0, 1, 1], [], []>} : vector<3x512xbf16>, vector<512x128xbf16>, vector<3x128xf32> -> vector<3x128xf32>
    %22 = arith.addf %15, %21 : vector<3x128xf32>
    %23 = vector.extract_strided_slice %17 {offsets = [1, 0], sizes = [3, 512], strides = [1, 1]} : vector<5x512xbf16> to vector<3x512xbf16>
    %c3 = arith.constant 3 : index
    %c0_19 = arith.constant 0 : index
    %c0_20 = arith.constant 0 : index
    %24 = vector.load %arg2[%c3, %c0_19, %c0_20] : memref<4x512x128xbf16, #tpu.memory_space<vmem>>, vector<1x512x128xbf16>
    %25 = vector.shape_cast %24 : vector<1x512x128xbf16> to vector<512x128xbf16>
    %cst_21 = arith.constant dense<0.000000e+00> : vector<3x128xf32>
    %26 = tpu.matmul %23, %25, %cst_21 {dimension_numbers = #tpu.dot_dimension_numbers<[1], [0], [0], [1], [0, 0, 1, 1], [], []>} : vector<3x512xbf16>, vector<512x128xbf16>, vector<3x128xf32> -> vector<3x128xf32>
    %27 = arith.addf %22, %26 : vector<3x128xf32>
    %cst_22 = arith.constant dense<0.000000e+00> : vector<128xf32>
    %28 = vector.multi_reduction <add>, %27, %cst_22 [0] : vector<3x128xf32> to vector<128xf32>
    %29 = vector.shape_cast %28 : vector<128xf32> to vector<1x128xf32>
    %30 = arith.mulf %27, %27 : vector<3x128xf32>
    %cst_23 = arith.constant dense<0.000000e+00> : vector<128xf32>
    %31 = vector.multi_reduction <add>, %30, %cst_23 [0] : vector<3x128xf32> to vector<128xf32>
    %32 = vector.shape_cast %31 : vector<128xf32> to vector<1x128xf32>
    %33 = tpu.concatenate %29, %32 in 0 : vector<1x128xf32>, vector<1x128xf32> -> vector<2x128xf32>
    %34 = vector.shape_cast %33 : vector<2x128xf32> to vector<1x1x2x128xf32>
    %c0_24 = arith.constant 0 : index
    %c0_25 = arith.constant 0 : index
    %c0_26 = arith.constant 0 : index
    %c0_27 = arith.constant 0 : index
    %35 = vector.load %arg7[%c0_24, %c0_25, %c0_26, %c0_27] : memref<1x1x2x128xf32, #tpu.memory_space<vmem>>, vector<1x1x2x128xf32>
    tpu.vector_store %arg7[%c0_24, %c0_25, %c0_26, %c0_27], %34 {strides = array<i32>} : memref<1x1x2x128xf32, #tpu.memory_space<vmem>>, vector<1x1x2x128xf32>,
    %36 = vector.shape_cast %27 : vector<3x128xf32> to vector<1x1x3x128xf32>
    %37 = arith.truncf %36 : vector<1x1x3x128xf32> to vector<1x1x3x128xbf16>
    %c0_28 = arith.constant 0 : index
    %c0_29 = arith.constant 0 : index
    %c0_30 = arith.constant 0 : index
    %c0_31 = arith.constant 0 : index
    %38 = vector.load %arg6[%c0_28, %c0_29, %c0_30, %c0_31] : memref<1x1x3x128xbf16, #tpu.memory_space<vmem>>, vector<1x1x3x128xbf16>
    tpu.vector_store %arg6[%c0_28, %c0_29, %c0_30, %c0_31], %37 {strides = array<i32>} : memref<1x1x3x128xbf16, #tpu.memory_space<vmem>>, vector<1x1x3x128xbf16>,
    return
  }
  func.func @transform_0(%arg0: i32, %arg1: i32) -> (i32, i32, i32) {
    %c0_i32 = arith.constant 0 : i32
    %c0_i32_0 = arith.constant 0 : i32
    %c0_i32_1 = arith.constant 0 : i32
    %c0_i32_2 = arith.constant 0 : i32
    return %c0_i32, %c0_i32_0, %c0_i32_1 : i32, i32, i32
  }
  func.func @transform_1(%arg0: i32, %arg1: i32) -> (i32, i32) {
    %c0_i32 = arith.constant 0 : i32
    %c0_i32_0 = arith.constant 0 : i32
    %c0_i32_1 = arith.constant 0 : i32
    return %c0_i32, %c0_i32_0 : i32, i32
  }
  func.func @transform_2(%arg0: i32, %arg1: i32) -> (i32, i32, i32, i32) {
    %c0_i32 = arith.constant 0 : i32
    %0 = arith.addi %arg1, %c0_i32 : i32
    %c0_i32_0 = arith.constant 0 : i32
    %c0_i32_1 = arith.constant 0 : i32
    %c0_i32_2 = arith.constant 0 : i32
    return %arg0, %0, %c0_i32_0, %c0_i32_1 : i32, i32, i32, i32
  }
  func.func @transform_3(%arg0: i32, %arg1: i32) -> (i32, i32, i32, i32) {
    %c1_i32 = arith.constant 1 : i32
    %0 = arith.addi %arg1, %c1_i32 : i32
    %c0_i32 = arith.constant 0 : i32
    %c0_i32_0 = arith.constant 0 : i32
    %c0_i32_1 = arith.constant 0 : i32
    return %arg0, %0, %c0_i32, %c0_i32_0 : i32, i32, i32, i32
  }
  func.func @transform_4(%arg0: i32, %arg1: i32) -> (i32, i32, i32, i32) {
    %c0_i32 = arith.constant 0 : i32
    %c0_i32_0 = arith.constant 0 : i32
    %c0_i32_1 = arith.constant 0 : i32
    return %arg0, %arg1, %c0_i32, %c0_i32_0 : i32, i32, i32, i32
  }
  func.func @transform_5(%arg0: i32, %arg1: i32) -> (i32, i32, i32, i32) {
    %c0_i32 = arith.constant 0 : i32
    %c0_i32_0 = arith.constant 0 : i32
    %c0_i32_1 = arith.constant 0 : i32
    return %arg0, %arg1, %c0_i32, %c0_i32_0 : i32, i32, i32, i32
  }
}

module attributes {stable_mosaic.version = 11 : i64} {
  func.func @_bn_act_kernel(%arg0: i32, %arg1: i32, %arg2: memref<1x1x3x128xbf16, #tpu.memory_space<vmem>>, %arg3: memref<1x128xf32, #tpu.memory_space<vmem>>, %arg4: memref<1x128xf32, #tpu.memory_space<vmem>>, %arg5: memref<1x1x3x128xbf16, #tpu.memory_space<vmem>>) attributes {dimension_semantics = [#tpu.dimension_semantics<parallel>, #tpu.dimension_semantics<parallel>], iteration_bounds = array<i64: 2, 3>, scalar_prefetch = 0 : i64, scratch_operands = 0 : i64, tpu.core_type = #tpu.core_type<tc>, window_params = [{transform_indices = @transform_0, window_bounds = array<i64: 1, 1, 3, 128>}, {pipeline_mode = #tpu.pipeline_mode<synchronous>, transform_indices = @transform_1, window_bounds = array<i64: 1, 128>}, {pipeline_mode = #tpu.pipeline_mode<synchronous>, transform_indices = @transform_2, window_bounds = array<i64: 1, 128>}, {transform_indices = @transform_3, window_bounds = array<i64: 1, 1, 3, 128>}]} {
    %c0 = arith.constant 0 : index
    %c0_0 = arith.constant 0 : index
    %c0_1 = arith.constant 0 : index
    %c0_2 = arith.constant 0 : index
    %0 = vector.load %arg2[%c0, %c0_0, %c0_1, %c0_2] : memref<1x1x3x128xbf16, #tpu.memory_space<vmem>>, vector<1x1x3x128xbf16>
    %1 = arith.extf %0 : vector<1x1x3x128xbf16> to vector<1x1x3x128xf32>
    %c0_3 = arith.constant 0 : index
    %c0_4 = arith.constant 0 : index
    %2 = vector.load %arg3[%c0_3, %c0_4] : memref<1x128xf32, #tpu.memory_space<vmem>>, vector<1x128xf32>
    %3 = vector.shape_cast %2 : vector<1x128xf32> to vector<1x1x1x128xf32>
    %4 = vector.broadcast %3 : vector<1x1x1x128xf32> to vector<1x1x3x128xf32>
    %5 = arith.mulf %1, %4 : vector<1x1x3x128xf32>
    %c0_5 = arith.constant 0 : index
    %c0_6 = arith.constant 0 : index
    %6 = vector.load %arg4[%c0_5, %c0_6] : memref<1x128xf32, #tpu.memory_space<vmem>>, vector<1x128xf32>
    %7 = vector.shape_cast %6 : vector<1x128xf32> to vector<1x1x1x128xf32>
    %8 = vector.broadcast %7 : vector<1x1x1x128xf32> to vector<1x1x3x128xf32>
    %9 = arith.addf %5, %8 : vector<1x1x3x128xf32>
    %cst = arith.constant 0.000000e+00 : f32
    %10 = vector.broadcast %cst : f32 to vector<1x1x3x128xf32>
    %11 = arith.cmpf oge, %9, %10 : vector<1x1x3x128xf32>
    %cst_7 = arith.constant 2.000000e-01 : f32
    %12 = vector.broadcast %cst_7 : f32 to vector<1x1x3x128xf32>
    %13 = arith.mulf %12, %9 : vector<1x1x3x128xf32>
    %14 = arith.select %11, %9, %13 : vector<1x1x3x128xi1>, vector<1x1x3x128xf32>
    %15 = arith.truncf %14 : vector<1x1x3x128xf32> to vector<1x1x3x128xbf16>
    %c0_8 = arith.constant 0 : index
    %c0_9 = arith.constant 0 : index
    %c0_10 = arith.constant 0 : index
    %c0_11 = arith.constant 0 : index
    %16 = vector.load %arg5[%c0_8, %c0_9, %c0_10, %c0_11] : memref<1x1x3x128xbf16, #tpu.memory_space<vmem>>, vector<1x1x3x128xbf16>
    tpu.vector_store %arg5[%c0_8, %c0_9, %c0_10, %c0_11], %15 {strides = array<i32>} : memref<1x1x3x128xbf16, #tpu.memory_space<vmem>>, vector<1x1x3x128xbf16>,
    return
  }
  func.func @transform_0(%arg0: i32, %arg1: i32) -> (i32, i32, i32, i32) {
    %c0_i32 = arith.constant 0 : i32
    %c0_i32_0 = arith.constant 0 : i32
    %c0_i32_1 = arith.constant 0 : i32
    return %arg0, %arg1, %c0_i32, %c0_i32_0 : i32, i32, i32, i32
  }
  func.func @transform_1(%arg0: i32, %arg1: i32) -> (i32, i32) {
    %c0_i32 = arith.constant 0 : i32
    %c0_i32_0 = arith.constant 0 : i32
    %c0_i32_1 = arith.constant 0 : i32
    return %c0_i32, %c0_i32_0 : i32, i32
  }
  func.func @transform_2(%arg0: i32, %arg1: i32) -> (i32, i32) {
    %c0_i32 = arith.constant 0 : i32
    %c0_i32_0 = arith.constant 0 : i32
    %c0_i32_1 = arith.constant 0 : i32
    return %c0_i32, %c0_i32_0 : i32, i32
  }
  func.func @transform_3(%arg0: i32, %arg1: i32) -> (i32, i32, i32, i32) {
    %c0_i32 = arith.constant 0 : i32
    %c0_i32_0 = arith.constant 0 : i32
    %c0_i32_1 = arith.constant 0 : i32
    return %arg0, %arg1, %c0_i32, %c0_i32_0 : i32, i32, i32, i32
  }
}

module attributes {stable_mosaic.version = 11 : i64} {
  func.func @_conv_row_kernel(%arg0: i32, %arg1: i32, %arg2: memref<16x128x128xbf16, #tpu.memory_space<vmem>>, %arg3: memref<1x128xf32, #tpu.memory_space<vmem>>, %arg4: memref<1x1x7x128xbf16, #tpu.memory_space<vmem>>, %arg5: memref<1x1x7x128xbf16, #tpu.memory_space<vmem>>, %arg6: memref<1x1x7x128xbf16, #tpu.memory_space<vmem>>, %arg7: memref<1x1x7x128xbf16, #tpu.memory_space<vmem>>, %arg8: memref<1x1x4x128xbf16, #tpu.memory_space<vmem>>, %arg9: memref<1x1x2x128xf32, #tpu.memory_space<vmem>>) attributes {dimension_semantics = [#tpu.dimension_semantics<parallel>, #tpu.dimension_semantics<parallel>], iteration_bounds = array<i64: 2, 4>, scalar_prefetch = 0 : i64, scratch_operands = 0 : i64, tpu.core_type = #tpu.core_type<tc>, window_params = [{pipeline_mode = #tpu.pipeline_mode<synchronous>, transform_indices = @transform_0, window_bounds = array<i64: 16, 128, 128>}, {pipeline_mode = #tpu.pipeline_mode<synchronous>, transform_indices = @transform_1, window_bounds = array<i64: 1, 128>}, {transform_indices = @transform_2, window_bounds = array<i64: 1, 1, 7, 128>}, {transform_indices = @transform_3, window_bounds = array<i64: 1, 1, 7, 128>}, {transform_indices = @transform_4, window_bounds = array<i64: 1, 1, 7, 128>}, {transform_indices = @transform_5, window_bounds = array<i64: 1, 1, 7, 128>}, {transform_indices = @transform_6, window_bounds = array<i64: 1, 1, 4, 128>}, {transform_indices = @transform_7, window_bounds = array<i64: 1, 1, 2, 128>}]} {
    %cst = arith.constant 0.000000e+00 : f32
    %0 = vector.broadcast %cst : f32 to vector<4x128xf32>
    %c0 = arith.constant 0 : index
    %c0_0 = arith.constant 0 : index
    %1 = vector.load %arg3[%c0, %c0_0] : memref<1x128xf32, #tpu.memory_space<vmem>>, vector<1x128xf32>
    %2 = vector.broadcast %1 : vector<1x128xf32> to vector<4x128xf32>
    %3 = arith.addf %0, %2 : vector<4x128xf32>
    %c0_1 = arith.constant 0 : index
    %c0_2 = arith.constant 0 : index
    %c0_3 = arith.constant 0 : index
    %c0_4 = arith.constant 0 : index
    %4 = vector.load %arg4[%c0_1, %c0_2, %c0_3, %c0_4] : memref<1x1x7x128xbf16, #tpu.memory_space<vmem>>, vector<1x1x7x128xbf16>
    %5 = vector.shape_cast %4 : vector<1x1x7x128xbf16> to vector<7x128xbf16>
    %6 = vector.extract_strided_slice %5 {offsets = [0, 0], sizes = [4, 128], strides = [1, 1]} : vector<7x128xbf16> to vector<4x128xbf16>
    %c0_5 = arith.constant 0 : index
    %c0_6 = arith.constant 0 : index
    %c0_7 = arith.constant 0 : index
    %7 = vector.load %arg2[%c0_5, %c0_6, %c0_7] : memref<16x128x128xbf16, #tpu.memory_space<vmem>>, vector<1x128x128xbf16>
    %8 = vector.shape_cast %7 : vector<1x128x128xbf16> to vector<128x128xbf16>
    %cst_8 = arith.constant dense<0.000000e+00> : vector<4x128xf32>
    %9 = tpu.matmul %6, %8, %cst_8 {dimension_numbers = #tpu.dot_dimension_numbers<[1], [0], [0], [1], [0, 0, 1, 1], [], []>} : vector<4x128xbf16>, vector<128x128xbf16>, vector<4x128xf32> -> vector<4x128xf32>
    %10 = arith.addf %3, %9 : vector<4x128xf32>
    %11 = vector.extract_strided_slice %5 {offsets = [1, 0], sizes = [4, 128], strides = [1, 1]} : vector<7x128xbf16> to vector<4x128xbf16>
    %c1 = arith.constant 1 : index
    %c0_9 = arith.constant 0 : index
    %c0_10 = arith.constant 0 : index
    %12 = vector.load %arg2[%c1, %c0_9, %c0_10] : memref<16x128x128xbf16, #tpu.memory_space<vmem>>, vector<1x128x128xbf16>
    %13 = vector.shape_cast %12 : vector<1x128x128xbf16> to vector<128x128xbf16>
    %cst_11 = arith.constant dense<0.000000e+00> : vector<4x128xf32>
    %14 = tpu.matmul %11, %13, %cst_11 {dimension_numbers = #tpu.dot_dimension_numbers<[1], [0], [0], [1], [0, 0, 1, 1], [], []>} : vector<4x128xbf16>, vector<128x128xbf16>, vector<4x128xf32> -> vector<4x128xf32>
    %15 = arith.addf %10, %14 : vector<4x128xf32>
    %16 = vector.extract_strided_slice %5 {offsets = [2, 0], sizes = [4, 128], strides = [1, 1]} : vector<7x128xbf16> to vector<4x128xbf16>
    %c2 = arith.constant 2 : index
    %c0_12 = arith.constant 0 : index
    %c0_13 = arith.constant 0 : index
    %17 = vector.load %arg2[%c2, %c0_12, %c0_13] : memref<16x128x128xbf16, #tpu.memory_space<vmem>>, vector<1x128x128xbf16>
    %18 = vector.shape_cast %17 : vector<1x128x128xbf16> to vector<128x128xbf16>
    %cst_14 = arith.constant dense<0.000000e+00> : vector<4x128xf32>
    %19 = tpu.matmul %16, %18, %cst_14 {dimension_numbers = #tpu.dot_dimension_numbers<[1], [0], [0], [1], [0, 0, 1, 1], [], []>} : vector<4x128xbf16>, vector<128x128xbf16>, vector<4x128xf32> -> vector<4x128xf32>
    %20 = arith.addf %15, %19 : vector<4x128xf32>
    %21 = vector.extract_strided_slice %5 {offsets = [3, 0], sizes = [4, 128], strides = [1, 1]} : vector<7x128xbf16> to vector<4x128xbf16>
    %c3 = arith.constant 3 : index
    %c0_15 = arith.constant 0 : index
    %c0_16 = arith.constant 0 : index
    %22 = vector.load %arg2[%c3, %c0_15, %c0_16] : memref<16x128x128xbf16, #tpu.memory_space<vmem>>, vector<1x128x128xbf16>
    %23 = vector.shape_cast %22 : vector<1x128x128xbf16> to vector<128x128xbf16>
    %cst_17 = arith.constant dense<0.000000e+00> : vector<4x128xf32>
    %24 = tpu.matmul %21, %23, %cst_17 {dimension_numbers = #tpu.dot_dimension_numbers<[1], [0], [0], [1], [0, 0, 1, 1], [], []>} : vector<4x128xbf16>, vector<128x128xbf16>, vector<4x128xf32> -> vector<4x128xf32>
    %25 = arith.addf %20, %24 : vector<4x128xf32>
    %c0_18 = arith.constant 0 : index
    %c0_19 = arith.constant 0 : index
    %c0_20 = arith.constant 0 : index
    %c0_21 = arith.constant 0 : index
    %26 = vector.load %arg5[%c0_18, %c0_19, %c0_20, %c0_21] : memref<1x1x7x128xbf16, #tpu.memory_space<vmem>>, vector<1x1x7x128xbf16>
    %27 = vector.shape_cast %26 : vector<1x1x7x128xbf16> to vector<7x128xbf16>
    %28 = vector.extract_strided_slice %27 {offsets = [0, 0], sizes = [4, 128], strides = [1, 1]} : vector<7x128xbf16> to vector<4x128xbf16>
    %c4 = arith.constant 4 : index
    %c0_22 = arith.constant 0 : index
    %c0_23 = arith.constant 0 : index
    %29 = vector.load %arg2[%c4, %c0_22, %c0_23] : memref<16x128x128xbf16, #tpu.memory_space<vmem>>, vector<1x128x128xbf16>
    %30 = vector.shape_cast %29 : vector<1x128x128xbf16> to vector<128x128xbf16>
    %cst_24 = arith.constant dense<0.000000e+00> : vector<4x128xf32>
    %31 = tpu.matmul %28, %30, %cst_24 {dimension_numbers = #tpu.dot_dimension_numbers<[1], [0], [0], [1], [0, 0, 1, 1], [], []>} : vector<4x128xbf16>, vector<128x128xbf16>, vector<4x128xf32> -> vector<4x128xf32>
    %32 = arith.addf %25, %31 : vector<4x128xf32>
    %33 = vector.extract_strided_slice %27 {offsets = [1, 0], sizes = [4, 128], strides = [1, 1]} : vector<7x128xbf16> to vector<4x128xbf16>
    %c5 = arith.constant 5 : index
    %c0_25 = arith.constant 0 : index
    %c0_26 = arith.constant 0 : index
    %34 = vector.load %arg2[%c5, %c0_25, %c0_26] : memref<16x128x128xbf16, #tpu.memory_space<vmem>>, vector<1x128x128xbf16>
    %35 = vector.shape_cast %34 : vector<1x128x128xbf16> to vector<128x128xbf16>
    %cst_27 = arith.constant dense<0.000000e+00> : vector<4x128xf32>
    %36 = tpu.matmul %33, %35, %cst_27 {dimension_numbers = #tpu.dot_dimension_numbers<[1], [0], [0], [1], [0, 0, 1, 1], [], []>} : vector<4x128xbf16>, vector<128x128xbf16>, vector<4x128xf32> -> vector<4x128xf32>
    %37 = arith.addf %32, %36 : vector<4x128xf32>
    %38 = vector.extract_strided_slice %27 {offsets = [2, 0], sizes = [4, 128], strides = [1, 1]} : vector<7x128xbf16> to vector<4x128xbf16>
    %c6 = arith.constant 6 : index
    %c0_28 = arith.constant 0 : index
    %c0_29 = arith.constant 0 : index
    %39 = vector.load %arg2[%c6, %c0_28, %c0_29] : memref<16x128x128xbf16, #tpu.memory_space<vmem>>, vector<1x128x128xbf16>
    %40 = vector.shape_cast %39 : vector<1x128x128xbf16> to vector<128x128xbf16>
    %cst_30 = arith.constant dense<0.000000e+00> : vector<4x128xf32>
    %41 = tpu.matmul %38, %40, %cst_30 {dimension_numbers = #tpu.dot_dimension_numbers<[1], [0], [0], [1], [0, 0, 1, 1], [], []>} : vector<4x128xbf16>, vector<128x128xbf16>, vector<4x128xf32> -> vector<4x128xf32>
    %42 = arith.addf %37, %41 : vector<4x128xf32>
    %43 = vector.extract_strided_slice %27 {offsets = [3, 0], sizes = [4, 128], strides = [1, 1]} : vector<7x128xbf16> to vector<4x128xbf16>
    %c7 = arith.constant 7 : index
    %c0_31 = arith.constant 0 : index
    %c0_32 = arith.constant 0 : index
    %44 = vector.load %arg2[%c7, %c0_31, %c0_32] : memref<16x128x128xbf16, #tpu.memory_space<vmem>>, vector<1x128x128xbf16>
    %45 = vector.shape_cast %44 : vector<1x128x128xbf16> to vector<128x128xbf16>
    %cst_33 = arith.constant dense<0.000000e+00> : vector<4x128xf32>
    %46 = tpu.matmul %43, %45, %cst_33 {dimension_numbers = #tpu.dot_dimension_numbers<[1], [0], [0], [1], [0, 0, 1, 1], [], []>} : vector<4x128xbf16>, vector<128x128xbf16>, vector<4x128xf32> -> vector<4x128xf32>
    %47 = arith.addf %42, %46 : vector<4x128xf32>
    %c0_34 = arith.constant 0 : index
    %c0_35 = arith.constant 0 : index
    %c0_36 = arith.constant 0 : index
    %c0_37 = arith.constant 0 : index
    %48 = vector.load %arg6[%c0_34, %c0_35, %c0_36, %c0_37] : memref<1x1x7x128xbf16, #tpu.memory_space<vmem>>, vector<1x1x7x128xbf16>
    %49 = vector.shape_cast %48 : vector<1x1x7x128xbf16> to vector<7x128xbf16>
    %50 = vector.extract_strided_slice %49 {offsets = [0, 0], sizes = [4, 128], strides = [1, 1]} : vector<7x128xbf16> to vector<4x128xbf16>
    %c8 = arith.constant 8 : index
    %c0_38 = arith.constant 0 : index
    %c0_39 = arith.constant 0 : index
    %51 = vector.load %arg2[%c8, %c0_38, %c0_39] : memref<16x128x128xbf16, #tpu.memory_space<vmem>>, vector<1x128x128xbf16>
    %52 = vector.shape_cast %51 : vector<1x128x128xbf16> to vector<128x128xbf16>
    %cst_40 = arith.constant dense<0.000000e+00> : vector<4x128xf32>
    %53 = tpu.matmul %50, %52, %cst_40 {dimension_numbers = #tpu.dot_dimension_numbers<[1], [0], [0], [1], [0, 0, 1, 1], [], []>} : vector<4x128xbf16>, vector<128x128xbf16>, vector<4x128xf32> -> vector<4x128xf32>
    %54 = arith.addf %47, %53 : vector<4x128xf32>
    %55 = vector.extract_strided_slice %49 {offsets = [1, 0], sizes = [4, 128], strides = [1, 1]} : vector<7x128xbf16> to vector<4x128xbf16>
    %c9 = arith.constant 9 : index
    %c0_41 = arith.constant 0 : index
    %c0_42 = arith.constant 0 : index
    %56 = vector.load %arg2[%c9, %c0_41, %c0_42] : memref<16x128x128xbf16, #tpu.memory_space<vmem>>, vector<1x128x128xbf16>
    %57 = vector.shape_cast %56 : vector<1x128x128xbf16> to vector<128x128xbf16>
    %cst_43 = arith.constant dense<0.000000e+00> : vector<4x128xf32>
    %58 = tpu.matmul %55, %57, %cst_43 {dimension_numbers = #tpu.dot_dimension_numbers<[1], [0], [0], [1], [0, 0, 1, 1], [], []>} : vector<4x128xbf16>, vector<128x128xbf16>, vector<4x128xf32> -> vector<4x128xf32>
    %59 = arith.addf %54, %58 : vector<4x128xf32>
    %60 = vector.extract_strided_slice %49 {offsets = [2, 0], sizes = [4, 128], strides = [1, 1]} : vector<7x128xbf16> to vector<4x128xbf16>
    %c10 = arith.constant 10 : index
    %c0_44 = arith.constant 0 : index
    %c0_45 = arith.constant 0 : index
    %61 = vector.load %arg2[%c10, %c0_44, %c0_45] : memref<16x128x128xbf16, #tpu.memory_space<vmem>>, vector<1x128x128xbf16>
    %62 = vector.shape_cast %61 : vector<1x128x128xbf16> to vector<128x128xbf16>
    %cst_46 = arith.constant dense<0.000000e+00> : vector<4x128xf32>
    %63 = tpu.matmul %60, %62, %cst_46 {dimension_numbers = #tpu.dot_dimension_numbers<[1], [0], [0], [1], [0, 0, 1, 1], [], []>} : vector<4x128xbf16>, vector<128x128xbf16>, vector<4x128xf32> -> vector<4x128xf32>
    %64 = arith.addf %59, %63 : vector<4x128xf32>
    %65 = vector.extract_strided_slice %49 {offsets = [3, 0], sizes = [4, 128], strides = [1, 1]} : vector<7x128xbf16> to vector<4x128xbf16>
    %c11 = arith.constant 11 : index
    %c0_47 = arith.constant 0 : index
    %c0_48 = arith.constant 0 : index
    %66 = vector.load %arg2[%c11, %c0_47, %c0_48] : memref<16x128x128xbf16, #tpu.memory_space<vmem>>, vector<1x128x128xbf16>
    %67 = vector.shape_cast %66 : vector<1x128x128xbf16> to vector<128x128xbf16>
    %cst_49 = arith.constant dense<0.000000e+00> : vector<4x128xf32>
    %68 = tpu.matmul %65, %67, %cst_49 {dimension_numbers = #tpu.dot_dimension_numbers<[1], [0], [0], [1], [0, 0, 1, 1], [], []>} : vector<4x128xbf16>, vector<128x128xbf16>, vector<4x128xf32> -> vector<4x128xf32>
    %69 = arith.addf %64, %68 : vector<4x128xf32>
    %c0_50 = arith.constant 0 : index
    %c0_51 = arith.constant 0 : index
    %c0_52 = arith.constant 0 : index
    %c0_53 = arith.constant 0 : index
    %70 = vector.load %arg7[%c0_50, %c0_51, %c0_52, %c0_53] : memref<1x1x7x128xbf16, #tpu.memory_space<vmem>>, vector<1x1x7x128xbf16>
    %71 = vector.shape_cast %70 : vector<1x1x7x128xbf16> to vector<7x128xbf16>
    %72 = vector.extract_strided_slice %71 {offsets = [0, 0], sizes = [4, 128], strides = [1, 1]} : vector<7x128xbf16> to vector<4x128xbf16>
    %c12 = arith.constant 12 : index
    %c0_54 = arith.constant 0 : index
    %c0_55 = arith.constant 0 : index
    %73 = vector.load %arg2[%c12, %c0_54, %c0_55] : memref<16x128x128xbf16, #tpu.memory_space<vmem>>, vector<1x128x128xbf16>
    %74 = vector.shape_cast %73 : vector<1x128x128xbf16> to vector<128x128xbf16>
    %cst_56 = arith.constant dense<0.000000e+00> : vector<4x128xf32>
    %75 = tpu.matmul %72, %74, %cst_56 {dimension_numbers = #tpu.dot_dimension_numbers<[1], [0], [0], [1], [0, 0, 1, 1], [], []>} : vector<4x128xbf16>, vector<128x128xbf16>, vector<4x128xf32> -> vector<4x128xf32>
    %76 = arith.addf %69, %75 : vector<4x128xf32>
    %77 = vector.extract_strided_slice %71 {offsets = [1, 0], sizes = [4, 128], strides = [1, 1]} : vector<7x128xbf16> to vector<4x128xbf16>
    %c13 = arith.constant 13 : index
    %c0_57 = arith.constant 0 : index
    %c0_58 = arith.constant 0 : index
    %78 = vector.load %arg2[%c13, %c0_57, %c0_58] : memref<16x128x128xbf16, #tpu.memory_space<vmem>>, vector<1x128x128xbf16>
    %79 = vector.shape_cast %78 : vector<1x128x128xbf16> to vector<128x128xbf16>
    %cst_59 = arith.constant dense<0.000000e+00> : vector<4x128xf32>
    %80 = tpu.matmul %77, %79, %cst_59 {dimension_numbers = #tpu.dot_dimension_numbers<[1], [0], [0], [1], [0, 0, 1, 1], [], []>} : vector<4x128xbf16>, vector<128x128xbf16>, vector<4x128xf32> -> vector<4x128xf32>
    %81 = arith.addf %76, %80 : vector<4x128xf32>
    %82 = vector.extract_strided_slice %71 {offsets = [2, 0], sizes = [4, 128], strides = [1, 1]} : vector<7x128xbf16> to vector<4x128xbf16>
    %c14 = arith.constant 14 : index
    %c0_60 = arith.constant 0 : index
    %c0_61 = arith.constant 0 : index
    %83 = vector.load %arg2[%c14, %c0_60, %c0_61] : memref<16x128x128xbf16, #tpu.memory_space<vmem>>, vector<1x128x128xbf16>
    %84 = vector.shape_cast %83 : vector<1x128x128xbf16> to vector<128x128xbf16>
    %cst_62 = arith.constant dense<0.000000e+00> : vector<4x128xf32>
    %85 = tpu.matmul %82, %84, %cst_62 {dimension_numbers = #tpu.dot_dimension_numbers<[1], [0], [0], [1], [0, 0, 1, 1], [], []>} : vector<4x128xbf16>, vector<128x128xbf16>, vector<4x128xf32> -> vector<4x128xf32>
    %86 = arith.addf %81, %85 : vector<4x128xf32>
    %87 = vector.extract_strided_slice %71 {offsets = [3, 0], sizes = [4, 128], strides = [1, 1]} : vector<7x128xbf16> to vector<4x128xbf16>
    %c15 = arith.constant 15 : index
    %c0_63 = arith.constant 0 : index
    %c0_64 = arith.constant 0 : index
    %88 = vector.load %arg2[%c15, %c0_63, %c0_64] : memref<16x128x128xbf16, #tpu.memory_space<vmem>>, vector<1x128x128xbf16>
    %89 = vector.shape_cast %88 : vector<1x128x128xbf16> to vector<128x128xbf16>
    %cst_65 = arith.constant dense<0.000000e+00> : vector<4x128xf32>
    %90 = tpu.matmul %87, %89, %cst_65 {dimension_numbers = #tpu.dot_dimension_numbers<[1], [0], [0], [1], [0, 0, 1, 1], [], []>} : vector<4x128xbf16>, vector<128x128xbf16>, vector<4x128xf32> -> vector<4x128xf32>
    %91 = arith.addf %86, %90 : vector<4x128xf32>
    %cst_66 = arith.constant dense<0.000000e+00> : vector<128xf32>
    %92 = vector.multi_reduction <add>, %91, %cst_66 [0] : vector<4x128xf32> to vector<128xf32>
    %93 = vector.shape_cast %92 : vector<128xf32> to vector<1x128xf32>
    %94 = arith.mulf %91, %91 : vector<4x128xf32>
    %cst_67 = arith.constant dense<0.000000e+00> : vector<128xf32>
    %95 = vector.multi_reduction <add>, %94, %cst_67 [0] : vector<4x128xf32> to vector<128xf32>
    %96 = vector.shape_cast %95 : vector<128xf32> to vector<1x128xf32>
    %97 = tpu.concatenate %93, %96 in 0 : vector<1x128xf32>, vector<1x128xf32> -> vector<2x128xf32>
    %98 = vector.shape_cast %97 : vector<2x128xf32> to vector<1x1x2x128xf32>
    %c0_68 = arith.constant 0 : index
    %c0_69 = arith.constant 0 : index
    %c0_70 = arith.constant 0 : index
    %c0_71 = arith.constant 0 : index
    %99 = vector.load %arg9[%c0_68, %c0_69, %c0_70, %c0_71] : memref<1x1x2x128xf32, #tpu.memory_space<vmem>>, vector<1x1x2x128xf32>
    tpu.vector_store %arg9[%c0_68, %c0_69, %c0_70, %c0_71], %98 {strides = array<i32>} : memref<1x1x2x128xf32, #tpu.memory_space<vmem>>, vector<1x1x2x128xf32>,
    %100 = vector.shape_cast %91 : vector<4x128xf32> to vector<1x1x4x128xf32>
    %101 = arith.truncf %100 : vector<1x1x4x128xf32> to vector<1x1x4x128xbf16>
    %c0_72 = arith.constant 0 : index
    %c0_73 = arith.constant 0 : index
    %c0_74 = arith.constant 0 : index
    %c0_75 = arith.constant 0 : index
    %102 = vector.load %arg8[%c0_72, %c0_73, %c0_74, %c0_75] : memref<1x1x4x128xbf16, #tpu.memory_space<vmem>>, vector<1x1x4x128xbf16>
    tpu.vector_store %arg8[%c0_72, %c0_73, %c0_74, %c0_75], %101 {strides = array<i32>} : memref<1x1x4x128xbf16, #tpu.memory_space<vmem>>, vector<1x1x4x128xbf16>,
    return
  }
  func.func @transform_0(%arg0: i32, %arg1: i32) -> (i32, i32, i32) {
    %c0_i32 = arith.constant 0 : i32
    %c0_i32_0 = arith.constant 0 : i32
    %c0_i32_1 = arith.constant 0 : i32
    %c0_i32_2 = arith.constant 0 : i32
    return %c0_i32, %c0_i32_0, %c0_i32_1 : i32, i32, i32
  }
  func.func @transform_1(%arg0: i32, %arg1: i32) -> (i32, i32) {
    %c0_i32 = arith.constant 0 : i32
    %c0_i32_0 = arith.constant 0 : i32
    %c0_i32_1 = arith.constant 0 : i32
    return %c0_i32, %c0_i32_0 : i32, i32
  }
  func.func @transform_2(%arg0: i32, %arg1: i32) -> (i32, i32, i32, i32) {
    %c0_i32 = arith.constant 0 : i32
    %0 = arith.addi %arg1, %c0_i32 : i32
    %c0_i32_0 = arith.constant 0 : i32
    %c0_i32_1 = arith.constant 0 : i32
    %c0_i32_2 = arith.constant 0 : i32
    return %arg0, %0, %c0_i32_0, %c0_i32_1 : i32, i32, i32, i32
  }
  func.func @transform_3(%arg0: i32, %arg1: i32) -> (i32, i32, i32, i32) {
    %c1_i32 = arith.constant 1 : i32
    %0 = arith.addi %arg1, %c1_i32 : i32
    %c0_i32 = arith.constant 0 : i32
    %c0_i32_0 = arith.constant 0 : i32
    %c0_i32_1 = arith.constant 0 : i32
    return %arg0, %0, %c0_i32, %c0_i32_0 : i32, i32, i32, i32
  }
  func.func @transform_4(%arg0: i32, %arg1: i32) -> (i32, i32, i32, i32) {
    %c2_i32 = arith.constant 2 : i32
    %0 = arith.addi %arg1, %c2_i32 : i32
    %c0_i32 = arith.constant 0 : i32
    %c0_i32_0 = arith.constant 0 : i32
    %c0_i32_1 = arith.constant 0 : i32
    return %arg0, %0, %c0_i32, %c0_i32_0 : i32, i32, i32, i32
  }
  func.func @transform_5(%arg0: i32, %arg1: i32) -> (i32, i32, i32, i32) {
    %c3_i32 = arith.constant 3 : i32
    %0 = arith.addi %arg1, %c3_i32 : i32
    %c0_i32 = arith.constant 0 : i32
    %c0_i32_0 = arith.constant 0 : i32
    %c0_i32_1 = arith.constant 0 : i32
    return %arg0, %0, %c0_i32, %c0_i32_0 : i32, i32, i32, i32
  }
  func.func @transform_6(%arg0: i32, %arg1: i32) -> (i32, i32, i32, i32) {
    %c0_i32 = arith.constant 0 : i32
    %c0_i32_0 = arith.constant 0 : i32
    %c0_i32_1 = arith.constant 0 : i32
    return %arg0, %arg1, %c0_i32, %c0_i32_0 : i32, i32, i32, i32
  }
  func.func @transform_7(%arg0: i32, %arg1: i32) -> (i32, i32, i32, i32) {
    %c0_i32 = arith.constant 0 : i32
    %c0_i32_0 = arith.constant 0 : i32
    %c0_i32_1 = arith.constant 0 : i32
    return %arg0, %arg1, %c0_i32, %c0_i32_0 : i32, i32, i32, i32
  }
}

module attributes {stable_mosaic.version = 11 : i64} {
  func.func @_bn_act_kernel(%arg0: i32, %arg1: i32, %arg2: memref<1x1x4x128xbf16, #tpu.memory_space<vmem>>, %arg3: memref<1x128xf32, #tpu.memory_space<vmem>>, %arg4: memref<1x128xf32, #tpu.memory_space<vmem>>, %arg5: memref<1x1x4x128xbf16, #tpu.memory_space<vmem>>) attributes {dimension_semantics = [#tpu.dimension_semantics<parallel>, #tpu.dimension_semantics<parallel>], iteration_bounds = array<i64: 2, 4>, scalar_prefetch = 0 : i64, scratch_operands = 0 : i64, tpu.core_type = #tpu.core_type<tc>, window_params = [{transform_indices = @transform_0, window_bounds = array<i64: 1, 1, 4, 128>}, {pipeline_mode = #tpu.pipeline_mode<synchronous>, transform_indices = @transform_1, window_bounds = array<i64: 1, 128>}, {pipeline_mode = #tpu.pipeline_mode<synchronous>, transform_indices = @transform_2, window_bounds = array<i64: 1, 128>}, {transform_indices = @transform_3, window_bounds = array<i64: 1, 1, 4, 128>}]} {
    %c0 = arith.constant 0 : index
    %c0_0 = arith.constant 0 : index
    %c0_1 = arith.constant 0 : index
    %c0_2 = arith.constant 0 : index
    %0 = vector.load %arg2[%c0, %c0_0, %c0_1, %c0_2] : memref<1x1x4x128xbf16, #tpu.memory_space<vmem>>, vector<1x1x4x128xbf16>
    %1 = arith.extf %0 : vector<1x1x4x128xbf16> to vector<1x1x4x128xf32>
    %c0_3 = arith.constant 0 : index
    %c0_4 = arith.constant 0 : index
    %2 = vector.load %arg3[%c0_3, %c0_4] : memref<1x128xf32, #tpu.memory_space<vmem>>, vector<1x128xf32>
    %3 = vector.shape_cast %2 : vector<1x128xf32> to vector<1x1x1x128xf32>
    %4 = vector.broadcast %3 : vector<1x1x1x128xf32> to vector<1x1x4x128xf32>
    %5 = arith.mulf %1, %4 : vector<1x1x4x128xf32>
    %c0_5 = arith.constant 0 : index
    %c0_6 = arith.constant 0 : index
    %6 = vector.load %arg4[%c0_5, %c0_6] : memref<1x128xf32, #tpu.memory_space<vmem>>, vector<1x128xf32>
    %7 = vector.shape_cast %6 : vector<1x128xf32> to vector<1x1x1x128xf32>
    %8 = vector.broadcast %7 : vector<1x1x1x128xf32> to vector<1x1x4x128xf32>
    %9 = arith.addf %5, %8 : vector<1x1x4x128xf32>
    %cst = arith.constant 0.000000e+00 : f32
    %10 = vector.broadcast %cst : f32 to vector<1x1x4x128xf32>
    %11 = arith.cmpf oge, %9, %10 : vector<1x1x4x128xf32>
    %cst_7 = arith.constant 2.000000e-01 : f32
    %12 = vector.broadcast %cst_7 : f32 to vector<1x1x4x128xf32>
    %13 = arith.mulf %12, %9 : vector<1x1x4x128xf32>
    %14 = arith.select %11, %9, %13 : vector<1x1x4x128xi1>, vector<1x1x4x128xf32>
    %15 = arith.truncf %14 : vector<1x1x4x128xf32> to vector<1x1x4x128xbf16>
    %c0_8 = arith.constant 0 : index
    %c0_9 = arith.constant 0 : index
    %c0_10 = arith.constant 0 : index
    %c0_11 = arith.constant 0 : index
    %16 = vector.load %arg5[%c0_8, %c0_9, %c0_10, %c0_11] : memref<1x1x4x128xbf16, #tpu.memory_space<vmem>>, vector<1x1x4x128xbf16>
    tpu.vector_store %arg5[%c0_8, %c0_9, %c0_10, %c0_11], %15 {strides = array<i32>} : memref<1x1x4x128xbf16, #tpu.memory_space<vmem>>, vector<1x1x4x128xbf16>,
    return
  }
  func.func @transform_0(%arg0: i32, %arg1: i32) -> (i32, i32, i32, i32) {
    %c0_i32 = arith.constant 0 : i32
    %c0_i32_0 = arith.constant 0 : i32
    %c0_i32_1 = arith.constant 0 : i32
    return %arg0, %arg1, %c0_i32, %c0_i32_0 : i32, i32, i32, i32
  }
  func.func @transform_1(%arg0: i32, %arg1: i32) -> (i32, i32) {
    %c0_i32 = arith.constant 0 : i32
    %c0_i32_0 = arith.constant 0 : i32
    %c0_i32_1 = arith.constant 0 : i32
    return %c0_i32, %c0_i32_0 : i32, i32
  }
  func.func @transform_2(%arg0: i32, %arg1: i32) -> (i32, i32) {
    %c0_i32 = arith.constant 0 : i32
    %c0_i32_0 = arith.constant 0 : i32
    %c0_i32_1 = arith.constant 0 : i32
    return %c0_i32, %c0_i32_0 : i32, i32
  }
  func.func @transform_3(%arg0: i32, %arg1: i32) -> (i32, i32, i32, i32) {
    %c0_i32 = arith.constant 0 : i32
    %c0_i32_0 = arith.constant 0 : i32
    %c0_i32_1 = arith.constant 0 : i32
    return %arg0, %arg1, %c0_i32, %c0_i32_0 : i32, i32, i32, i32
  }
}

module attributes {stable_mosaic.version = 11 : i64} {
  func.func @_conv_row_kernel(%arg0: i32, %arg1: i32, %arg2: memref<16x128x128xbf16, #tpu.memory_space<vmem>>, %arg3: memref<1x128xf32, #tpu.memory_space<vmem>>, %arg4: memref<1x1x8x128xbf16, #tpu.memory_space<vmem>>, %arg5: memref<1x1x8x128xbf16, #tpu.memory_space<vmem>>, %arg6: memref<1x1x8x128xbf16, #tpu.memory_space<vmem>>, %arg7: memref<1x1x8x128xbf16, #tpu.memory_space<vmem>>, %arg8: memref<1x1x5x128xf32, #tpu.memory_space<vmem>>, %arg9: memref<1x1x2x128xf32, #tpu.memory_space<vmem>>) attributes {dimension_semantics = [#tpu.dimension_semantics<parallel>, #tpu.dimension_semantics<parallel>], iteration_bounds = array<i64: 2, 5>, scalar_prefetch = 0 : i64, scratch_operands = 0 : i64, tpu.core_type = #tpu.core_type<tc>, window_params = [{pipeline_mode = #tpu.pipeline_mode<synchronous>, transform_indices = @transform_0, window_bounds = array<i64: 16, 128, 128>}, {pipeline_mode = #tpu.pipeline_mode<synchronous>, transform_indices = @transform_1, window_bounds = array<i64: 1, 128>}, {transform_indices = @transform_2, window_bounds = array<i64: 1, 1, 8, 128>}, {transform_indices = @transform_3, window_bounds = array<i64: 1, 1, 8, 128>}, {transform_indices = @transform_4, window_bounds = array<i64: 1, 1, 8, 128>}, {transform_indices = @transform_5, window_bounds = array<i64: 1, 1, 8, 128>}, {transform_indices = @transform_6, window_bounds = array<i64: 1, 1, 5, 128>}, {transform_indices = @transform_7, window_bounds = array<i64: 1, 1, 2, 128>}]} {
    %cst = arith.constant 0.000000e+00 : f32
    %0 = vector.broadcast %cst : f32 to vector<5x128xf32>
    %c0 = arith.constant 0 : index
    %c0_0 = arith.constant 0 : index
    %1 = vector.load %arg3[%c0, %c0_0] : memref<1x128xf32, #tpu.memory_space<vmem>>, vector<1x128xf32>
    %2 = vector.broadcast %1 : vector<1x128xf32> to vector<5x128xf32>
    %3 = arith.addf %0, %2 : vector<5x128xf32>
    %c0_1 = arith.constant 0 : index
    %c0_2 = arith.constant 0 : index
    %c0_3 = arith.constant 0 : index
    %c0_4 = arith.constant 0 : index
    %4 = vector.load %arg4[%c0_1, %c0_2, %c0_3, %c0_4] : memref<1x1x8x128xbf16, #tpu.memory_space<vmem>>, vector<1x1x8x128xbf16>
    %5 = vector.shape_cast %4 : vector<1x1x8x128xbf16> to vector<8x128xbf16>
    %6 = vector.extract_strided_slice %5 {offsets = [0, 0], sizes = [5, 128], strides = [1, 1]} : vector<8x128xbf16> to vector<5x128xbf16>
    %c0_5 = arith.constant 0 : index
    %c0_6 = arith.constant 0 : index
    %c0_7 = arith.constant 0 : index
    %7 = vector.load %arg2[%c0_5, %c0_6, %c0_7] : memref<16x128x128xbf16, #tpu.memory_space<vmem>>, vector<1x128x128xbf16>
    %8 = vector.shape_cast %7 : vector<1x128x128xbf16> to vector<128x128xbf16>
    %cst_8 = arith.constant dense<0.000000e+00> : vector<5x128xf32>
    %9 = tpu.matmul %6, %8, %cst_8 {dimension_numbers = #tpu.dot_dimension_numbers<[1], [0], [0], [1], [0, 0, 1, 1], [], []>} : vector<5x128xbf16>, vector<128x128xbf16>, vector<5x128xf32> -> vector<5x128xf32>
    %10 = arith.addf %3, %9 : vector<5x128xf32>
    %11 = vector.extract_strided_slice %5 {offsets = [1, 0], sizes = [5, 128], strides = [1, 1]} : vector<8x128xbf16> to vector<5x128xbf16>
    %c1 = arith.constant 1 : index
    %c0_9 = arith.constant 0 : index
    %c0_10 = arith.constant 0 : index
    %12 = vector.load %arg2[%c1, %c0_9, %c0_10] : memref<16x128x128xbf16, #tpu.memory_space<vmem>>, vector<1x128x128xbf16>
    %13 = vector.shape_cast %12 : vector<1x128x128xbf16> to vector<128x128xbf16>
    %cst_11 = arith.constant dense<0.000000e+00> : vector<5x128xf32>
    %14 = tpu.matmul %11, %13, %cst_11 {dimension_numbers = #tpu.dot_dimension_numbers<[1], [0], [0], [1], [0, 0, 1, 1], [], []>} : vector<5x128xbf16>, vector<128x128xbf16>, vector<5x128xf32> -> vector<5x128xf32>
    %15 = arith.addf %10, %14 : vector<5x128xf32>
    %16 = vector.extract_strided_slice %5 {offsets = [2, 0], sizes = [5, 128], strides = [1, 1]} : vector<8x128xbf16> to vector<5x128xbf16>
    %c2 = arith.constant 2 : index
    %c0_12 = arith.constant 0 : index
    %c0_13 = arith.constant 0 : index
    %17 = vector.load %arg2[%c2, %c0_12, %c0_13] : memref<16x128x128xbf16, #tpu.memory_space<vmem>>, vector<1x128x128xbf16>
    %18 = vector.shape_cast %17 : vector<1x128x128xbf16> to vector<128x128xbf16>
    %cst_14 = arith.constant dense<0.000000e+00> : vector<5x128xf32>
    %19 = tpu.matmul %16, %18, %cst_14 {dimension_numbers = #tpu.dot_dimension_numbers<[1], [0], [0], [1], [0, 0, 1, 1], [], []>} : vector<5x128xbf16>, vector<128x128xbf16>, vector<5x128xf32> -> vector<5x128xf32>
    %20 = arith.addf %15, %19 : vector<5x128xf32>
    %21 = vector.extract_strided_slice %5 {offsets = [3, 0], sizes = [5, 128], strides = [1, 1]} : vector<8x128xbf16> to vector<5x128xbf16>
    %c3 = arith.constant 3 : index
    %c0_15 = arith.constant 0 : index
    %c0_16 = arith.constant 0 : index
    %22 = vector.load %arg2[%c3, %c0_15, %c0_16] : memref<16x128x128xbf16, #tpu.memory_space<vmem>>, vector<1x128x128xbf16>
    %23 = vector.shape_cast %22 : vector<1x128x128xbf16> to vector<128x128xbf16>
    %cst_17 = arith.constant dense<0.000000e+00> : vector<5x128xf32>
    %24 = tpu.matmul %21, %23, %cst_17 {dimension_numbers = #tpu.dot_dimension_numbers<[1], [0], [0], [1], [0, 0, 1, 1], [], []>} : vector<5x128xbf16>, vector<128x128xbf16>, vector<5x128xf32> -> vector<5x128xf32>
    %25 = arith.addf %20, %24 : vector<5x128xf32>
    %c0_18 = arith.constant 0 : index
    %c0_19 = arith.constant 0 : index
    %c0_20 = arith.constant 0 : index
    %c0_21 = arith.constant 0 : index
    %26 = vector.load %arg5[%c0_18, %c0_19, %c0_20, %c0_21] : memref<1x1x8x128xbf16, #tpu.memory_space<vmem>>, vector<1x1x8x128xbf16>
    %27 = vector.shape_cast %26 : vector<1x1x8x128xbf16> to vector<8x128xbf16>
    %28 = vector.extract_strided_slice %27 {offsets = [0, 0], sizes = [5, 128], strides = [1, 1]} : vector<8x128xbf16> to vector<5x128xbf16>
    %c4 = arith.constant 4 : index
    %c0_22 = arith.constant 0 : index
    %c0_23 = arith.constant 0 : index
    %29 = vector.load %arg2[%c4, %c0_22, %c0_23] : memref<16x128x128xbf16, #tpu.memory_space<vmem>>, vector<1x128x128xbf16>
    %30 = vector.shape_cast %29 : vector<1x128x128xbf16> to vector<128x128xbf16>
    %cst_24 = arith.constant dense<0.000000e+00> : vector<5x128xf32>
    %31 = tpu.matmul %28, %30, %cst_24 {dimension_numbers = #tpu.dot_dimension_numbers<[1], [0], [0], [1], [0, 0, 1, 1], [], []>} : vector<5x128xbf16>, vector<128x128xbf16>, vector<5x128xf32> -> vector<5x128xf32>
    %32 = arith.addf %25, %31 : vector<5x128xf32>
    %33 = vector.extract_strided_slice %27 {offsets = [1, 0], sizes = [5, 128], strides = [1, 1]} : vector<8x128xbf16> to vector<5x128xbf16>
    %c5 = arith.constant 5 : index
    %c0_25 = arith.constant 0 : index
    %c0_26 = arith.constant 0 : index
    %34 = vector.load %arg2[%c5, %c0_25, %c0_26] : memref<16x128x128xbf16, #tpu.memory_space<vmem>>, vector<1x128x128xbf16>
    %35 = vector.shape_cast %34 : vector<1x128x128xbf16> to vector<128x128xbf16>
    %cst_27 = arith.constant dense<0.000000e+00> : vector<5x128xf32>
    %36 = tpu.matmul %33, %35, %cst_27 {dimension_numbers = #tpu.dot_dimension_numbers<[1], [0], [0], [1], [0, 0, 1, 1], [], []>} : vector<5x128xbf16>, vector<128x128xbf16>, vector<5x128xf32> -> vector<5x128xf32>
    %37 = arith.addf %32, %36 : vector<5x128xf32>
    %38 = vector.extract_strided_slice %27 {offsets = [2, 0], sizes = [5, 128], strides = [1, 1]} : vector<8x128xbf16> to vector<5x128xbf16>
    %c6 = arith.constant 6 : index
    %c0_28 = arith.constant 0 : index
    %c0_29 = arith.constant 0 : index
    %39 = vector.load %arg2[%c6, %c0_28, %c0_29] : memref<16x128x128xbf16, #tpu.memory_space<vmem>>, vector<1x128x128xbf16>
    %40 = vector.shape_cast %39 : vector<1x128x128xbf16> to vector<128x128xbf16>
    %cst_30 = arith.constant dense<0.000000e+00> : vector<5x128xf32>
    %41 = tpu.matmul %38, %40, %cst_30 {dimension_numbers = #tpu.dot_dimension_numbers<[1], [0], [0], [1], [0, 0, 1, 1], [], []>} : vector<5x128xbf16>, vector<128x128xbf16>, vector<5x128xf32> -> vector<5x128xf32>
    %42 = arith.addf %37, %41 : vector<5x128xf32>
    %43 = vector.extract_strided_slice %27 {offsets = [3, 0], sizes = [5, 128], strides = [1, 1]} : vector<8x128xbf16> to vector<5x128xbf16>
    %c7 = arith.constant 7 : index
    %c0_31 = arith.constant 0 : index
    %c0_32 = arith.constant 0 : index
    %44 = vector.load %arg2[%c7, %c0_31, %c0_32] : memref<16x128x128xbf16, #tpu.memory_space<vmem>>, vector<1x128x128xbf16>
    %45 = vector.shape_cast %44 : vector<1x128x128xbf16> to vector<128x128xbf16>
    %cst_33 = arith.constant dense<0.000000e+00> : vector<5x128xf32>
    %46 = tpu.matmul %43, %45, %cst_33 {dimension_numbers = #tpu.dot_dimension_numbers<[1], [0], [0], [1], [0, 0, 1, 1], [], []>} : vector<5x128xbf16>, vector<128x128xbf16>, vector<5x128xf32> -> vector<5x128xf32>
    %47 = arith.addf %42, %46 : vector<5x128xf32>
    %c0_34 = arith.constant 0 : index
    %c0_35 = arith.constant 0 : index
    %c0_36 = arith.constant 0 : index
    %c0_37 = arith.constant 0 : index
    %48 = vector.load %arg6[%c0_34, %c0_35, %c0_36, %c0_37] : memref<1x1x8x128xbf16, #tpu.memory_space<vmem>>, vector<1x1x8x128xbf16>
    %49 = vector.shape_cast %48 : vector<1x1x8x128xbf16> to vector<8x128xbf16>
    %50 = vector.extract_strided_slice %49 {offsets = [0, 0], sizes = [5, 128], strides = [1, 1]} : vector<8x128xbf16> to vector<5x128xbf16>
    %c8 = arith.constant 8 : index
    %c0_38 = arith.constant 0 : index
    %c0_39 = arith.constant 0 : index
    %51 = vector.load %arg2[%c8, %c0_38, %c0_39] : memref<16x128x128xbf16, #tpu.memory_space<vmem>>, vector<1x128x128xbf16>
    %52 = vector.shape_cast %51 : vector<1x128x128xbf16> to vector<128x128xbf16>
    %cst_40 = arith.constant dense<0.000000e+00> : vector<5x128xf32>
    %53 = tpu.matmul %50, %52, %cst_40 {dimension_numbers = #tpu.dot_dimension_numbers<[1], [0], [0], [1], [0, 0, 1, 1], [], []>} : vector<5x128xbf16>, vector<128x128xbf16>, vector<5x128xf32> -> vector<5x128xf32>
    %54 = arith.addf %47, %53 : vector<5x128xf32>
    %55 = vector.extract_strided_slice %49 {offsets = [1, 0], sizes = [5, 128], strides = [1, 1]} : vector<8x128xbf16> to vector<5x128xbf16>
    %c9 = arith.constant 9 : index
    %c0_41 = arith.constant 0 : index
    %c0_42 = arith.constant 0 : index
    %56 = vector.load %arg2[%c9, %c0_41, %c0_42] : memref<16x128x128xbf16, #tpu.memory_space<vmem>>, vector<1x128x128xbf16>
    %57 = vector.shape_cast %56 : vector<1x128x128xbf16> to vector<128x128xbf16>
    %cst_43 = arith.constant dense<0.000000e+00> : vector<5x128xf32>
    %58 = tpu.matmul %55, %57, %cst_43 {dimension_numbers = #tpu.dot_dimension_numbers<[1], [0], [0], [1], [0, 0, 1, 1], [], []>} : vector<5x128xbf16>, vector<128x128xbf16>, vector<5x128xf32> -> vector<5x128xf32>
    %59 = arith.addf %54, %58 : vector<5x128xf32>
    %60 = vector.extract_strided_slice %49 {offsets = [2, 0], sizes = [5, 128], strides = [1, 1]} : vector<8x128xbf16> to vector<5x128xbf16>
    %c10 = arith.constant 10 : index
    %c0_44 = arith.constant 0 : index
    %c0_45 = arith.constant 0 : index
    %61 = vector.load %arg2[%c10, %c0_44, %c0_45] : memref<16x128x128xbf16, #tpu.memory_space<vmem>>, vector<1x128x128xbf16>
    %62 = vector.shape_cast %61 : vector<1x128x128xbf16> to vector<128x128xbf16>
    %cst_46 = arith.constant dense<0.000000e+00> : vector<5x128xf32>
    %63 = tpu.matmul %60, %62, %cst_46 {dimension_numbers = #tpu.dot_dimension_numbers<[1], [0], [0], [1], [0, 0, 1, 1], [], []>} : vector<5x128xbf16>, vector<128x128xbf16>, vector<5x128xf32> -> vector<5x128xf32>
    %64 = arith.addf %59, %63 : vector<5x128xf32>
    %65 = vector.extract_strided_slice %49 {offsets = [3, 0], sizes = [5, 128], strides = [1, 1]} : vector<8x128xbf16> to vector<5x128xbf16>
    %c11 = arith.constant 11 : index
    %c0_47 = arith.constant 0 : index
    %c0_48 = arith.constant 0 : index
    %66 = vector.load %arg2[%c11, %c0_47, %c0_48] : memref<16x128x128xbf16, #tpu.memory_space<vmem>>, vector<1x128x128xbf16>
    %67 = vector.shape_cast %66 : vector<1x128x128xbf16> to vector<128x128xbf16>
    %cst_49 = arith.constant dense<0.000000e+00> : vector<5x128xf32>
    %68 = tpu.matmul %65, %67, %cst_49 {dimension_numbers = #tpu.dot_dimension_numbers<[1], [0], [0], [1], [0, 0, 1, 1], [], []>} : vector<5x128xbf16>, vector<128x128xbf16>, vector<5x128xf32> -> vector<5x128xf32>
    %69 = arith.addf %64, %68 : vector<5x128xf32>
    %c0_50 = arith.constant 0 : index
    %c0_51 = arith.constant 0 : index
    %c0_52 = arith.constant 0 : index
    %c0_53 = arith.constant 0 : index
    %70 = vector.load %arg7[%c0_50, %c0_51, %c0_52, %c0_53] : memref<1x1x8x128xbf16, #tpu.memory_space<vmem>>, vector<1x1x8x128xbf16>
    %71 = vector.shape_cast %70 : vector<1x1x8x128xbf16> to vector<8x128xbf16>
    %72 = vector.extract_strided_slice %71 {offsets = [0, 0], sizes = [5, 128], strides = [1, 1]} : vector<8x128xbf16> to vector<5x128xbf16>
    %c12 = arith.constant 12 : index
    %c0_54 = arith.constant 0 : index
    %c0_55 = arith.constant 0 : index
    %73 = vector.load %arg2[%c12, %c0_54, %c0_55] : memref<16x128x128xbf16, #tpu.memory_space<vmem>>, vector<1x128x128xbf16>
    %74 = vector.shape_cast %73 : vector<1x128x128xbf16> to vector<128x128xbf16>
    %cst_56 = arith.constant dense<0.000000e+00> : vector<5x128xf32>
    %75 = tpu.matmul %72, %74, %cst_56 {dimension_numbers = #tpu.dot_dimension_numbers<[1], [0], [0], [1], [0, 0, 1, 1], [], []>} : vector<5x128xbf16>, vector<128x128xbf16>, vector<5x128xf32> -> vector<5x128xf32>
    %76 = arith.addf %69, %75 : vector<5x128xf32>
    %77 = vector.extract_strided_slice %71 {offsets = [1, 0], sizes = [5, 128], strides = [1, 1]} : vector<8x128xbf16> to vector<5x128xbf16>
    %c13 = arith.constant 13 : index
    %c0_57 = arith.constant 0 : index
    %c0_58 = arith.constant 0 : index
    %78 = vector.load %arg2[%c13, %c0_57, %c0_58] : memref<16x128x128xbf16, #tpu.memory_space<vmem>>, vector<1x128x128xbf16>
    %79 = vector.shape_cast %78 : vector<1x128x128xbf16> to vector<128x128xbf16>
    %cst_59 = arith.constant dense<0.000000e+00> : vector<5x128xf32>
    %80 = tpu.matmul %77, %79, %cst_59 {dimension_numbers = #tpu.dot_dimension_numbers<[1], [0], [0], [1], [0, 0, 1, 1], [], []>} : vector<5x128xbf16>, vector<128x128xbf16>, vector<5x128xf32> -> vector<5x128xf32>
    %81 = arith.addf %76, %80 : vector<5x128xf32>
    %82 = vector.extract_strided_slice %71 {offsets = [2, 0], sizes = [5, 128], strides = [1, 1]} : vector<8x128xbf16> to vector<5x128xbf16>
    %c14 = arith.constant 14 : index
    %c0_60 = arith.constant 0 : index
    %c0_61 = arith.constant 0 : index
    %83 = vector.load %arg2[%c14, %c0_60, %c0_61] : memref<16x128x128xbf16, #tpu.memory_space<vmem>>, vector<1x128x128xbf16>
    %84 = vector.shape_cast %83 : vector<1x128x128xbf16> to vector<128x128xbf16>
    %cst_62 = arith.constant dense<0.000000e+00> : vector<5x128xf32>
    %85 = tpu.matmul %82, %84, %cst_62 {dimension_numbers = #tpu.dot_dimension_numbers<[1], [0], [0], [1], [0, 0, 1, 1], [], []>} : vector<5x128xbf16>, vector<128x128xbf16>, vector<5x128xf32> -> vector<5x128xf32>
    %86 = arith.addf %81, %85 : vector<5x128xf32>
    %87 = vector.extract_strided_slice %71 {offsets = [3, 0], sizes = [5, 128], strides = [1, 1]} : vector<8x128xbf16> to vector<5x128xbf16>
    %c15 = arith.constant 15 : index
    %c0_63 = arith.constant 0 : index
    %c0_64 = arith.constant 0 : index
    %88 = vector.load %arg2[%c15, %c0_63, %c0_64] : memref<16x128x128xbf16, #tpu.memory_space<vmem>>, vector<1x128x128xbf16>
    %89 = vector.shape_cast %88 : vector<1x128x128xbf16> to vector<128x128xbf16>
    %cst_65 = arith.constant dense<0.000000e+00> : vector<5x128xf32>
    %90 = tpu.matmul %87, %89, %cst_65 {dimension_numbers = #tpu.dot_dimension_numbers<[1], [0], [0], [1], [0, 0, 1, 1], [], []>} : vector<5x128xbf16>, vector<128x128xbf16>, vector<5x128xf32> -> vector<5x128xf32>
    %91 = arith.addf %86, %90 : vector<5x128xf32>
    %cst_66 = arith.constant dense<0.000000e+00> : vector<128xf32>
    %92 = vector.multi_reduction <add>, %91, %cst_66 [0] : vector<5x128xf32> to vector<128xf32>
    %93 = vector.shape_cast %92 : vector<128xf32> to vector<1x128xf32>
    %94 = arith.mulf %91, %91 : vector<5x128xf32>
    %cst_67 = arith.constant dense<0.000000e+00> : vector<128xf32>
    %95 = vector.multi_reduction <add>, %94, %cst_67 [0] : vector<5x128xf32> to vector<128xf32>
    %96 = vector.shape_cast %95 : vector<128xf32> to vector<1x128xf32>
    %97 = tpu.concatenate %93, %96 in 0 : vector<1x128xf32>, vector<1x128xf32> -> vector<2x128xf32>
    %98 = vector.shape_cast %97 : vector<2x128xf32> to vector<1x1x2x128xf32>
    %c0_68 = arith.constant 0 : index
    %c0_69 = arith.constant 0 : index
    %c0_70 = arith.constant 0 : index
    %c0_71 = arith.constant 0 : index
    %99 = vector.load %arg9[%c0_68, %c0_69, %c0_70, %c0_71] : memref<1x1x2x128xf32, #tpu.memory_space<vmem>>, vector<1x1x2x128xf32>
    tpu.vector_store %arg9[%c0_68, %c0_69, %c0_70, %c0_71], %98 {strides = array<i32>} : memref<1x1x2x128xf32, #tpu.memory_space<vmem>>, vector<1x1x2x128xf32>,
    %100 = vector.shape_cast %91 : vector<5x128xf32> to vector<1x1x5x128xf32>
    %c0_72 = arith.constant 0 : index
    %c0_73 = arith.constant 0 : index
    %c0_74 = arith.constant 0 : index
    %c0_75 = arith.constant 0 : index
    %101 = vector.load %arg8[%c0_72, %c0_73, %c0_74, %c0_75] : memref<1x1x5x128xf32, #tpu.memory_space<vmem>>, vector<1x1x5x128xf32>
    tpu.vector_store %arg8[%c0_72, %c0_73, %c0_74, %c0_75], %100 {strides = array<i32>} : memref<1x1x5x128xf32, #tpu.memory_space<vmem>>, vector<1x1x5x128xf32>,
    return
  }
  func.func @transform_0(%arg0: i32, %arg1: i32) -> (i32, i32, i32) {
    %c0_i32 = arith.constant 0 : i32
    %c0_i32_0 = arith.constant 0 : i32
    %c0_i32_1 = arith.constant 0 : i32
    %c0_i32_2 = arith.constant 0 : i32
    return %c0_i32, %c0_i32_0, %c0_i32_1 : i32, i32, i32
  }
  func.func @transform_1(%arg0: i32, %arg1: i32) -> (i32, i32) {
    %c0_i32 = arith.constant 0 : i32
    %c0_i32_0 = arith.constant 0 : i32
    %c0_i32_1 = arith.constant 0 : i32
    return %c0_i32, %c0_i32_0 : i32, i32
  }
  func.func @transform_2(%arg0: i32, %arg1: i32) -> (i32, i32, i32, i32) {
    %c0_i32 = arith.constant 0 : i32
    %0 = arith.addi %arg1, %c0_i32 : i32
    %c0_i32_0 = arith.constant 0 : i32
    %c0_i32_1 = arith.constant 0 : i32
    %c0_i32_2 = arith.constant 0 : i32
    return %arg0, %0, %c0_i32_0, %c0_i32_1 : i32, i32, i32, i32
  }
  func.func @transform_3(%arg0: i32, %arg1: i32) -> (i32, i32, i32, i32) {
    %c1_i32 = arith.constant 1 : i32
    %0 = arith.addi %arg1, %c1_i32 : i32
    %c0_i32 = arith.constant 0 : i32
    %c0_i32_0 = arith.constant 0 : i32
    %c0_i32_1 = arith.constant 0 : i32
    return %arg0, %0, %c0_i32, %c0_i32_0 : i32, i32, i32, i32
  }
  func.func @transform_4(%arg0: i32, %arg1: i32) -> (i32, i32, i32, i32) {
    %c2_i32 = arith.constant 2 : i32
    %0 = arith.addi %arg1, %c2_i32 : i32
    %c0_i32 = arith.constant 0 : i32
    %c0_i32_0 = arith.constant 0 : i32
    %c0_i32_1 = arith.constant 0 : i32
    return %arg0, %0, %c0_i32, %c0_i32_0 : i32, i32, i32, i32
  }
  func.func @transform_5(%arg0: i32, %arg1: i32) -> (i32, i32, i32, i32) {
    %c3_i32 = arith.constant 3 : i32
    %0 = arith.addi %arg1, %c3_i32 : i32
    %c0_i32 = arith.constant 0 : i32
    %c0_i32_0 = arith.constant 0 : i32
    %c0_i32_1 = arith.constant 0 : i32
    return %arg0, %0, %c0_i32, %c0_i32_0 : i32, i32, i32, i32
  }
  func.func @transform_6(%arg0: i32, %arg1: i32) -> (i32, i32, i32, i32) {
    %c0_i32 = arith.constant 0 : i32
    %c0_i32_0 = arith.constant 0 : i32
    %c0_i32_1 = arith.constant 0 : i32
    return %arg0, %arg1, %c0_i32, %c0_i32_0 : i32, i32, i32, i32
  }
  func.func @transform_7(%arg0: i32, %arg1: i32) -> (i32, i32, i32, i32) {
    %c0_i32 = arith.constant 0 : i32
    %c0_i32_0 = arith.constant 0 : i32
    %c0_i32_1 = arith.constant 0 : i32
    return %arg0, %arg1, %c0_i32, %c0_i32_0 : i32, i32, i32, i32
  }
}

</mosaic_0001>

<bundles_post_ra>
// kernel: _lambda_.8
= control target key start
LH: loop header
LB: loop body
LE: loop exit
PB: predicated region body
PF: predicated region fallthrough
CT: control target
= control target key end

     0   :  { %s1083_s0 = inlined_call_operand.vmem [shape: bf16[4,16,128], index: 0, kind: input, shape index: {}]   ;;  %s1084_s1 = inlined_call_operand.vmem [shape: f32[1,128], index: 1, kind: input, shape index: {}]   ;;  %s1085_s2 = inlined_call_operand.vmem [shape: bf16[2,10,10,16], index: 2, kind: input, shape index: {}, may-alias: {2,3}]   ;;  %s1086_s3 = inlined_call_operand.vmem [shape: bf16[2,10,10,16], index: 3, kind: input, shape index: {}, may-alias: {2,3}]   ;;  %s1087_s4 = inlined_call_operand.vmem [shape: bf16[2,9,9,128], index: 4, kind: output, shape index: {0}]   ;;  %s1088_s5 = inlined_call_operand.hbm [shape: f32[2,9,2,128], index: 5, kind: output, shape index: {1}]  }
   0x1   :  { %1089 = sst [smem:[#allocation5_spill]] %s1083_s0 }
   0x2   :  { %11 = vsyncpa [#allocation3], 0 }
   0x3   :  { %13 = vsyncpa [#allocation3 + $0x1], 0  ;;  %s925_s18 = smov 0   ;;  %s927_s19 = smov 0  }
   0x4   :  { %s929_s20 = smov 0   ;;  %s931_s21 = smov 0  }
   0x5   :  { %s933_s22 = smov 0   ;;  %s935_s23 = smov 0  }
   0x6   :  { %s937_s24 = smov 0   ;;  %s939_s25 = smov 0  }
   0x7 LB: > { %s668_s26 = sadd.s32 4294967295, %s893_s25   ;;  %s669_s27 = sadd.s32 4294967294, %s893_s25   ;;  %s893_s25 = sphi %s939_s25, %s19_s25   ;;  %s889_s24 = sphi %s937_s24, %s1099_s24   ;;  %s885_s23 = sphi %s935_s23, %s1098_s23   ;;  %s881_s22 = sphi %s933_s22, %s1097_s22   ;;  %s877_s21 = sphi %s931_s21, %s1096_s21   ;;  %s873_s20 = sphi %s929_s20, %s1095_s20   ;;  %s869_s19 = sphi %s927_s19, %s1094_s19   ;;  %s865_s18 = sphi %s925_s18, %s1093_s18  }
   0x8   : > { %s28_s28 = sadd.s32 1, %s885_s23  ;;  %s31_s29 = sadd.s32 1, %s889_s24 }
   0x9   : > { %p29_p0 = scmp.ge.s32.totalorder %s28_s28, 9  ;;  %p178_p1 = scmp.ne.s32.totalorder %s873_s20, %s869_s19 }
   0xa   : > { %p179_p2 = scmp.eq.s32.totalorder %s668_s26, 17  ;;  %p184_p5 = scmp.ne.s32.totalorder %s869_s19, %s865_s18 }
   0xb   : > { %s1101_s28 = smov (%p29_p0, %s28_s28), 0  ;;  %s1103_s29 = smov (!%p29_p0, %s31_s29), %s889_s24 }
   0xc   : > { %s164_s30 = ssub.s32 %s885_s23, %s1101_s28  ;;  %p976_p3 = por %p179_p2, %p178_p1 }
   0xd   : > { %p33_p4 = scmp.ge.s32.totalorder %s1103_s29, 2  ;;  %p185_p6 = scmp.eq.s32.totalorder %s669_s27, 17 }
   0xe   : > { %p672_p7 = scmp.ge.s32.totalorder %s893_s25, 1  ;;  %p235_p9 = scmp.lt.s32.totalorder %s893_s25, 19 }
   0xf   : > { %s1105_s29 = smov (%p33_p4, %s1103_s29), 0  ;;  %p985_p8 = por %p185_p6, %p184_p5 }
  0x10   : > { %s163_s8 = ssub.s32 %s889_s24, %s1105_s29  ;;  %s168_s9 = sadd.s32 1, %s873_s20 }
  0x11   : > { %s165_s10 = sor.u32 %s164_s30, %s163_s8  ;;  %p236_p10 = pnand %p672_p7, %p235_p9 }
  0x12   : > { %p166_p11 = scmp.eq.s32.totalorder %s165_s10, 0  ;;  %s1092_s0 = sld [smem:[#allocation5_spill]] (!%p236_p10) }
  0x13   : > { %239 = sbr.rel (%p236_p10) target bundleno = 204 (0xcc), region = 36  ;;  %p286_p12 = scmp.lt.s32.totalorder (!%p236_p10), %s881_s22, 1 }
  0x14   : > { %s994_s11 = scalar_select %p166_p11, %s873_s20, %s168_s9  }
  0x15   : > { %p288_p13 = scmp.lt.s32.totalorder (!%p236_p10), %s877_s21, 9  ;;  %s295_s26 = sadd.s32 (!%p236_p10), 1, %s877_s21 }
  0x16   : > { %p298_p0 = scmp.lt.s32.totalorder (!%p236_p10), %s295_s26, 9  ;;  %p308_p1 = scmp.lt.s32.totalorder (!%p236_p10), %s877_s21, 8 }
  0x18   : > { %v719_v0 = vld [vmem:[%s1092_s0] sm:$0xff]  ;;  %v722_v1 = vld [vmem:[%s1092_s0 + $0x10] sm:$0xff]  ;;  %v720_v2 = vld [vmem:[%s1092_s0 + $0x8] sm:$0xff]  ;;  %s1012_s8 = scalar_select %p286_p12, %s881_s22, 1  ;;  %vm336_vm0 = vcmask 130048   ;;  %vm459_vm2 = vcmask 1040384  }
  0x19   : > { %v723_v3 = vld [vmem:[%s1092_s0 + $0x18] sm:$0xff]  ;;  %347 = vmatpush.bf16.msra.mxu0 %v719_v0  ;;  %416 = vmatpush.bf16.msra.mxu2 %v722_v1  ;;  %s289_s9 = scalar_select %p288_p13, %s877_s21, 9  ;;  %v798_v18 = vld [vmem:[%s1084_s1] ss:$0 sm:$0xff]  ;;  %vm490_vm3 = vsmask.f32 256 }
  0x1a   : > { %381 = vmatpush.bf16.msra.mxu1 %v720_v2  ;;  %450 = vmatpush.bf16.msra.mxu3 %v723_v3  ;;  %s724_s10 = smul.u32 20, %s1012_s8  ;;  %s1107_s26 = smov (!%p298_p0, %s295_s26), 9  ;;  %vm491_vm5 = vmand %vm459_vm2, %vm490_vm3 }
  0x1b   : > { %s674_s12 = sshll.u32 %s289_s9, 1  ;;  %s676_s27 = sshll.u32 %s1107_s26, 1 }
  0x1c   : > { %s292_s13 = sadd.s32 %s724_s10, %s674_s12  ;;  %s302_s30 = sadd.s32 %s724_s10, %s676_s27 }
  0x1d   : > { %s675_s14 = sshll.u32 %s292_s13, 2  ;;  %s677_s9 = sshll.u32 %s302_s30, 2 }
  0x1e   : > { %s294_s17 = scalar_lea.vmem %s1085_s2, %s675_s14  ;;  %s304_s0 = scalar_lea.vmem %s1086_s3, %s677_s9 }
  0x1f   : > { %v682_v4 = vld [vmem:[%s294_s17] sm:$0xf]  ;;  %v718_v5 = vld [vmem:[%s294_s17] sm:$0x10]  ;;  %s725_s14 = smul.u32 18, %s1012_s8  ;;  %s283_s12 = sand.u32 1, %s869_s19  }
  0x20   : > { %v683_v6 = vor.u32 %v718_v5, %v682_v4  ;;  %v700_v10 = vld [vmem:[%s304_s0] sm:$0xf]  ;;  %v721_v11 = vld [vmem:[%s304_s0] sm:$0x10]  ;;  %s309_s0 = scalar_select %p308_p1, %s877_s21, 8 }
  0x21   : > { %v701_v13 = vor.u32 %v721_v11, %v700_v10  ;;  %s726_s8 = smul.u32 9, %s881_s22  ;;  %s673_s26 = sshll.u32 %s283_s12, 1 }
  0x22   : > { %688 = vmatmul.msk.bf16.vlgmr.msra.gmra.mxu0 %vm336_vm0, %v683_v6  ;;  %v359_v7 = vshrl.u32 %v683_v6, 16  ;;  %v361_v8 = vshll.u32 %v683_v6, 16  ;;  %s678_s15 = sshll.u32 %s309_s0, 1 }
  0x23   : > { %706 = vmatmul.msk.bf16.vlgmr.msra.gmra.mxu2 %vm336_vm0, %v701_v13  ;;  %v428_v14 = vshrl.u32 %v701_v13, 16  ;;  %v430_v15 = vshll.u32 %v701_v13, 16  ;;  %s312_s16 = sadd.s32 %s725_s14, %s678_s15  ;;  %s518_s13 = sadd.s32 %s877_s21, %s726_s8 }
  0x24   : > { %v363_v9 = vrot.slane %v361_v8, 1  ;;  %s679_s17 = sshll.u32 %s312_s16, 2  ;;  %s715_s22 = sshll.u32 %s518_s13, 1 }
  0x25   : > { %v432_v16 = vrot.slane %v430_v15, 1  ;;  %s314_s9 = scalar_lea.vmem %s1087_s4, %s679_s17  ;;  %s520_s14 = scalar_lea.hbm %s1088_s5, %s715_s22 }
  0x26   : > { %v364_v12 = vor.u32 %v363_v9, %v359_v7  ;;  %v492_v45 = vld [vmem:[%s314_s9 + $0x4] sm:$0x1]  ;;  %s285_s15 = scalar_lea.vmem [#allocation2], %s673_s26  ;;  %s524_s16 = sshll.u32 %s520_s14, 4  ;;  %s525_s16 = int_to_ptr.hbm [resolvable:$true] %s524_s16 }
  0x27   : > { %v433_v17 = vor.u32 %v432_v16, %v428_v14  ;;  %s522_s21 = sshll.u32 %s285_s15, 4  ;;  %s505_s17 = scalar_lea.sflag [#allocation3], %s283_s12  ;;  %s523_s21 = int_to_ptr.vmem [resolvable:$true] %s522_s21 }
  0x28   : > { %695 = vmatmul.msk.bf16.vlgmr.msra.gmra.mxu1 %vm336_vm0, %v364_v12  ;;  %s813_s27 = sshra.s32 %s525_s16, 4  ;;  %s819_s13 = scalar_lea.hbm %s1088_s5, 36  ;;  %s814_s27 = int_to_ptr.hbm [resolvable:$true] %s813_s27 }
  0x29   : > { %713 = vmatmul.msk.bf16.vlgmr.msra.gmra.mxu3 %vm336_vm0, %v433_v17  ;;  %s815_s30 = scalar_lea.hbm %s814_s27, 2  ;;  %p820_p6 = scmp.lt.s32.totalorder %s814_s27, %s1088_s5 }
  0x2a   : > { %p816_p2 = scmp.ne.s32.totalorder %s814_s27, %s815_s30  ;;  %p821_p7 = scmp.lt.s32.totalorder %s819_s13, %s815_s30 }
  0x2c   : > { %p817_p4 = pnand %p816_p2, %p976_p3  ;;  %p822_p9 = por %p821_p7, %p820_p6 }
  0x2e   : > { %p818_p5 = pneg %p817_p4 }
  0x30   : > { %p823_p10 = pnand %p822_p9, %p818_p5 }
  0x9f   : > { %v349_v19 = vpop.f32.mrf.mxu0 }
  0xa0   : > { %v354_v20 = vadd.f32 %v798_v18, %v349_v19 }
  0xa5   : > { %v383_v21 = vpop.f32.mrf.mxu1 }
  0xa6   : > { %v388_v22 = vadd.f32 %v383_v21, %v354_v20  ;;  %v418_v23 = vpop.f32.mrf.mxu2 }
  0xa7   : > { %v351_v25 = vpop.f32.mrf.mxu0 }
  0xa8   : > { %v423_v24 = vadd.f32 %v418_v23, %v388_v22  ;;  %v355_v28 = vadd.f32 %v798_v18, %v351_v25 }
  0xac   : > { %v452_v26 = vpop.f32.mrf.mxu3 }
  0xad   : > { %v385_v27 = vpop.f32.mrf.mxu1  ;;  %v457_v29 = vadd.f32 %v452_v26, %v423_v24 }
  0xae   : > { %v389_v31 = vadd.f32 %v385_v27, %v355_v28  ;;  %v420_v34 = vpop.f32.mrf.mxu2 }
  0xaf   : > { %vm480_vm1 = vcmp.ge.f32.partialorder %v457_v29, 0.0  ;;  %v482_v30 = vmul.f32 0.2, %v457_v29  ;;  %v468_v41 = vmul.f32 %v457_v29, %v457_v29 }
  0xb0   : > { %v424_v35 = vadd.f32 %v420_v34, %v389_v31 }
  0xb1   : > { %v484_v32 = vsel %vm480_vm1, %v457_v29, %v482_v30 }
  0xb2   : > { %v486_v33 = vpack.c.bf16 %v484_v32, %v484_v32 }
  0xb4   : > { %488 = vst [vmem:[%s314_s9] sm:$0xf] %v486_v33  ;;  %v454_v36 = vpop.f32.mrf.mxu3 }
  0xb5   : > { %v458_v37 = vadd.f32 %v454_v36, %v424_v35 }
  0xb7   : > { %v469_v38 = vmul.f32 %v458_v37, %v458_v37  ;;  %vm481_vm4 = vcmp.ge.f32.partialorder %v458_v37, 0.0  ;;  %v483_v39 = vmul.f32 0.2, %v458_v37  ;;  %v460_v40 = vsel %vm459_vm2, %v458_v37, 0.0 }
  0xb8   : > { %v461_v42 = vadd.f32 %v460_v40, %v457_v29 }
  0xb9   : > { %v485_v43 = vsel %vm481_vm4, %v458_v37, %v483_v39  ;;  %v470_v44 = vsel %vm459_vm2, %v469_v38, 0.0 }
  0xba   : > { %v487_v46 = vpack.c.bf16 %v485_v43, %v485_v43  ;;  %v462_v47 = vrot.slane %v461_v42, 4  ;;  %v471_v48 = vadd.f32 %v470_v44, %v468_v41 }
  0xbc   : > { %v463_v49 = vadd.f32 %v462_v47, %v461_v42  ;;  %v472_v50 = vrot.slane %v471_v48, 4  ;;  %v493_v51 = vsel %vm491_vm5, %v487_v46, %v492_v45 }
  0xbd   : > { %494 = vst [vmem:[%s314_s9 + $0x4] sm:$0x1] %v493_v51 }
  0xbe   : > { %v464_v52 = vrot.slane %v463_v49, 2  ;;  %v473_v53 = vadd.f32 %v472_v50, %v471_v48 }
  0xc0   : > { %v465_v54 = vadd.f32 %v464_v52, %v463_v49  ;;  %v474_v55 = vrot.slane %v473_v53, 2 }
  0xc2   : > { %v466_v56 = vrot.slane %v465_v54, 1  ;;  %v475_v57 = vadd.f32 %v474_v55, %v473_v53 }
  0xc4   : > { %v476_v58 = vrot.slane %v475_v57, 1  ;;  %v467_v59 = vadd.f32 %v466_v56, %v465_v54 }
  0xc6   : > { %v477_v60 = vadd.f32 %v476_v58, %v475_v57 }
  0xc8   : > { %v478_v61 = vsel %vm459_vm2, %v467_v59, %v477_v60 }
  0xc9   : > { %479 = vst [vmem:[%s285_s15] sm:$0x3] %v478_v61 }
  0xca   : > { %826 = shalt.err (!%p823_p10)
}
  0xcb   : > { %727 = dma.vmem_to_hbm [thread:$0]  (%p976_p3), %s523_s21, 32, %s525_s16, %s505_s17  }
  0xcc PF: > { %p733_p11 = scmp.ge.s32.totalorder %s893_s25, 2  ;;  %s548_s12 = sand.u32 1, %s865_s18  }
  0xcd   : > { %s549_s10 = scalar_lea.sflag [#allocation3], %s548_s12 }
  0xce   : > { %p730_p12 = pnand %p733_p11, %p985_p8 }
  0xd0   : > { %p731_p13 = pneg %p730_p12 }
  0xd2   : > { %860 = dma.done.wait (%p731_p13), %s549_s10, 32  }
  0xd3   : > { %862 = vsyncadd (%p731_p13), %s549_s10, 4294967264  ;;  %s19_s25 = sadd.s32 1, %s893_s25   ;;  %s1093_s18 = smov %s869_s19 }
  0xd4   : > { %p16_p0 = scmp.ge.s32.totalorder %s19_s25, 20   ;;  %s1094_s19 = smov %s873_s20 }
  0xd5   : > { %s1095_s20 = smov %s994_s11  ;;  %s1096_s21 = smov %s885_s23 }
  0xd6   : > { %s1097_s22 = smov %s889_s24  ;;  %s1098_s23 = smov %s1101_s28 }
  0xd7   : > { %s1099_s24 = smov %s1105_s29  ;;  %18 = sbr.rel (!%p16_p0) target bundleno = 7 (0x7), region = 89 }
  0xdc   :  { %555 = vsyncpa [#allocation3], 1 }
  0xdd   :  { %557 = vsyncpa [#allocation3 + $0x1], 1 }

// kernel: _lambda_.10
= control target key start
LH: loop header
LB: loop body
LE: loop exit
PB: predicated region body
PF: predicated region fallthrough
CT: control target
= control target key end

     0   :  { %s422_s12 = smov 0   ;;  %s424_s13 = smov 0   ;;  %s479_s0 = inlined_call_operand.vmem [shape: bf16[2,5,5,128], index: 0, kind: input, shape index: {}]   ;;  %s480_s1 = inlined_call_operand.vmem [shape: f32[1,128], index: 1, kind: input, shape index: {}]   ;;  %s481_s2 = inlined_call_operand.vmem [shape: f32[1,128], index: 2, kind: input, shape index: {}]   ;;  %s482_s3 = inlined_call_operand.vmem [shape: bf16[2,5,5,128], index: 3, kind: output, shape index: {}]  }
   0x1   :  { %s426_s14 = smov 0   ;;  %s428_s15 = smov 0  }
   0x2   :  { %s430_s16 = smov 0  }
   0x3 LB: > { %s22_s17 = sadd.s32 1, %s392_s14  ;;  %s25_s18 = sadd.s32 1, %s396_s15  ;;  %s400_s16 = sphi %s430_s16, %s13_s16   ;;  %s396_s15 = sphi %s428_s15, %s486_s15   ;;  %s392_s14 = sphi %s426_s14, %s485_s14   ;;  %s388_s13 = sphi %s424_s13, %s484_s13   ;;  %s384_s12 = sphi %s422_s12, %s483_s12  }
   0x4   : > { %p23_p0 = scmp.ge.s32.totalorder %s22_s17, 5  ;;  %p314_p1 = scmp.ge.s32.totalorder %s400_s16, 1 }
   0x5   : > { %p156_p2 = scmp.lt.s32.totalorder %s400_s16, 11 }
   0x6   : > { %s488_s17 = smov (%p23_p0, %s22_s17), 0  ;;  %s490_s18 = smov (!%p23_p0, %s25_s18), %s396_s15 }
   0x7   : > { %p157_p3 = pnand %p314_p1, %p156_p2  ;;  %p27_p4 = scmp.ge.s32.totalorder %s490_s18, 2 }
   0x8   : > { %p186_p5 = scmp.lt.s32.totalorder (!%p157_p3), %s388_s13, 1  ;;  %p188_p6 = scmp.lt.s32.totalorder (!%p157_p3), %s384_s12, 4 }
   0x9   : > { %s492_s18 = smov (%p27_p4, %s490_s18), 0  ;;  %160 = sbr.rel (%p157_p3) target bundleno = 34 (0x22), region = 32 }
   0xe   : > { %s494_s13 = smov (!%p186_p5, %s388_s13), 1  ;;  %s496_s12 = smov (!%p188_p6, %s384_s12), 4  ;;  %v360_v0 = vld [vmem:[%s480_s1] ss:$0 sm:$0xff]  ;;  %vm218_vm0 = vcmask 1042432  }
   0xf   : > { %s319_s19 = smul.u32 5, %s494_s13  ;;  %v361_v3 = vld [vmem:[%s481_s2] ss:$0 sm:$0xff]  ;;  %vm219_vm1 = vsmask.f32 2304 }
  0x10   : > { %vm220_vm3 = vmand %vm218_vm0, %vm219_vm1 }
  0x11   : > { %s191_s20 = sadd.s32 %s319_s19, %s496_s12 }
  0x12   : > { %s315_s21 = sshll.u32 %s191_s20, 2 }
  0x13   : > { %s193_s24 = scalar_lea.vmem %s479_s0, %s315_s21  ;;  %s201_s4 = scalar_lea.vmem %s482_s3, %s315_s21 }
  0x14   : > { %v202_v1 = vld [vmem:[%s193_s24] sm:$0x7] }
  0x15   : > { %v203_v2 = vunpack.c.l.bf16 %v202_v1  ;;  %v221_v8 = vld [vmem:[%s201_s4] sm:$0x7] }
  0x17   : > { %v208_v4 = vmul.f32 %v360_v0, %v203_v2 }
  0x19   : > { %v213_v5 = vadd.f32 %v361_v3, %v208_v4 }
  0x1b   : > { %vm214_vm2 = vcmp.ge.f32.partialorder %v213_v5, 0.0  ;;  %v215_v6 = vmul.f32 0.2, %v213_v5 }
  0x1d   : > { %v216_v7 = vsel %vm214_vm2, %v213_v5, %v215_v6 }
  0x1e   : > { %v217_v9 = vpack.c.bf16 %v216_v7, %v216_v7 }
  0x20   : > { %v222_v10 = vsel %vm220_vm3, %v217_v9, %v221_v8 }
  0x21   : > { %223 = vst [vmem:[%s201_s4] sm:$0x7] %v222_v10 }
  0x22 PF: > { %s13_s16 = sadd.s32 1, %s400_s16   ;;  %s483_s12 = smov %s392_s14 }
  0x23   : > { %p10_p7 = scmp.ge.s32.totalorder %s13_s16, 12   ;;  %s484_s13 = smov %s396_s15 }
  0x24   : > { %s485_s14 = smov %s488_s17  ;;  %s486_s15 = smov %s492_s18 }
  0x25   :  { %12 = sbr.rel (!%p10_p7) target bundleno = 3 (0x3), region = 62 }

// kernel: _lambda_.9
= control target key start
LH: loop header
LB: loop body
LE: loop exit
PB: predicated region body
PF: predicated region fallthrough
CT: control target
= control target key end

     0   :  { %s2802_s18 = smov 0   ;;  %s2804_s19 = smov 0   ;;  %s3309_s0 = inlined_call_operand.vmem [shape: bf16[4,512,128], index: 0, kind: input, shape index: {}]   ;;  %s3310_s1 = inlined_call_operand.vmem [shape: f32[1,128], index: 1, kind: input, shape index: {}]   ;;  %s3311_s2 = inlined_call_operand.vmem [shape: bf16[2,7,7,512], index: 2, kind: input, shape index: {}, may-alias: {2,3}]   ;;  %s3312_s3 = inlined_call_operand.vmem [shape: bf16[2,7,7,512], index: 3, kind: input, shape index: {}, may-alias: {2,3}]   ;;  %s3313_s4 = inlined_call_operand.vmem [shape: bf16[2,5,5,128], index: 4, kind: output, shape index: {0}]   ;;  %s3314_s5 = inlined_call_operand.vmem [shape: f32[2,5,2,128], index: 5, kind: output, shape index: {1}]  }
   0x1   :  { %s2806_s20 = smov 0   ;;  %s2808_s21 = smov 0  }
   0x2   :  { %s2810_s22 = smov 0  }
   0x3 LB: > { %s25_s23 = sadd.s32 1, %s2762_s20  ;;  %s28_s24 = sadd.s32 1, %s2766_s21  ;;  %s2770_s22 = sphi %s2810_s22, %s16_s22   ;;  %s2766_s21 = sphi %s2808_s21, %s3318_s21   ;;  %s2762_s20 = sphi %s2806_s20, %s3317_s20   ;;  %s2758_s19 = sphi %s2804_s19, %s3316_s19   ;;  %s2754_s18 = sphi %s2802_s18, %s3315_s18  }
   0x4   : > { %p26_p0 = scmp.ge.s32.totalorder %s25_s23, 5  ;;  %p1848_p1 = scmp.ge.s32.totalorder %s2770_s22, 1 }
   0x5   : > { %p232_p2 = scmp.lt.s32.totalorder %s2770_s22, 11 }
   0x6   : > { %s3320_s23 = smov (%p26_p0, %s25_s23), 0  ;;  %s3322_s24 = smov (!%p26_p0, %s28_s24), %s2766_s21 }
   0x7   : > { %p233_p3 = pnand %p1848_p1, %p232_p2  ;;  %p30_p4 = scmp.ge.s32.totalorder %s3322_s24, 2 }
   0x8   : > { %p285_p5 = scmp.lt.s32.totalorder (!%p233_p3), %s2758_s19, 1  ;;  %p287_p6 = scmp.lt.s32.totalorder (!%p233_p3), %s2754_s18, 6 }
   0x9   : > { %s3324_s24 = smov (%p30_p4, %s3322_s24), 0  ;;  %236 = sbr.rel (%p233_p3) target bundleno = 299 (0x12b), region = 36 }
   0xa   : > { %s294_s7 = sadd.s32 (!%p233_p3), 1, %s2754_s18  ;;  %p307_p8 = scmp.lt.s32.totalorder (!%p233_p3), %s2754_s18, 4 }
   0xb   : > { %p297_p7 = scmp.lt.s32.totalorder (!%p233_p3), %s294_s7, 6 }
   0xe   : > { %v2568_v0 = vld [vmem:[%s3309_s0 + $0x38] sm:$0xff]  ;;  %v2567_v4 = vld [vmem:[%s3309_s0 + $0x30] sm:$0xff]  ;;  %v2566_v8 = vld [vmem:[%s3309_s0 + $0x28] sm:$0xff]  ;;  %s3326_s19 = smov (!%p285_p5, %s2758_s19), 1  ;;  %s3328_s7 = smov (!%p297_p7, %s294_s7), 6  ;;  %vm1681_vm0 = vcmask 1042432  }
   0xf   : > { %v2576_v1 = vld [vmem:[%s3309_s0 + $0x78] sm:$0xff]  ;;  %598 = vmatpush.bf16.msra.mxu0 %v2568_v0  ;;  %v2575_v5 = vld [vmem:[%s3309_s0 + $0x70] sm:$0xff]  ;;  %v2574_v9 = vld [vmem:[%s3309_s0 + $0x68] sm:$0xff]  ;;  %s288_s6 = scalar_select %p287_p6, %s2754_s18, 6  ;;  %vm1682_vm1 = vsmask.f32 2304 }
  0x10   : > { %v2584_v2 = vld [vmem:[%s3309_s0 + $0xb8] sm:$0xff]  ;;  %611 = vmatpush.bf16.msra.mxu1 %v2576_v1  ;;  %v2583_v6 = vld [vmem:[%s3309_s0 + $0xb0] sm:$0xff]  ;;  %v2582_v10 = vld [vmem:[%s3309_s0 + $0xa8] sm:$0xff]  ;;  %s2689_s11 = smul.u32 28, %s3326_s19  ;;  %s3330_s18 = smov (!%p307_p8, %s2754_s18), 4  ;;  %vm1661_vm2 = vcmask 1044480  }
  0x11   : > { %v2592_v3 = vld [vmem:[%s3309_s0 + $0xf8] sm:$0xff]  ;;  %624 = vmatpush.bf16.msra.mxu2 %v2584_v2  ;;  %v2591_v7 = vld [vmem:[%s3309_s0 + $0xf0] sm:$0xff]  ;;  %v2590_v11 = vld [vmem:[%s3309_s0 + $0xe8] sm:$0xff]  ;;  %s1849_s16 = sshll.u32 %s288_s6, 2  ;;  %vm1677_vm4 = vcmask 1040384  }
  0x12   : > { %637 = vmatpush.bf16.msra.mxu3 %v2592_v3  ;;  %v2565_v12 = vld [vmem:[%s3309_s0 + $0x20] sm:$0xff]  ;;  %v2564_v16 = vld [vmem:[%s3309_s0 + $0x18] sm:$0xff]  ;;  %s291_s28 = sadd.s32 %s2689_s11, %s1849_s16  ;;  %v2563_v20 = vld [vmem:[%s3309_s0 + $0x10] sm:$0xff]  ;;  %s1851_s16 = sshll.u32 %s3328_s7, 2 }
  0x13   : > { %599 = vmatpush.bf16.msra.mxu0 %v2567_v4  ;;  %v2573_v13 = vld [vmem:[%s3309_s0 + $0x60] sm:$0xff]  ;;  %v2572_v17 = vld [vmem:[%s3309_s0 + $0x58] sm:$0xff]  ;;  %s1850_s8 = sshll.u32 %s291_s28, 2  ;;  %v2571_v21 = vld [vmem:[%s3309_s0 + $0x50] sm:$0xff]  ;;  %s301_s28 = sadd.s32 %s2689_s11, %s1851_s16 }
  0x14   : > { %612 = vmatpush.bf16.msra.mxu1 %v2575_v5  ;;  %v2581_v14 = vld [vmem:[%s3309_s0 + $0xa0] sm:$0xff]  ;;  %v2580_v18 = vld [vmem:[%s3309_s0 + $0x98] sm:$0xff]  ;;  %v2579_v22 = vld [vmem:[%s3309_s0 + $0x90] sm:$0xff]  ;;  %s293_s27 = scalar_lea.vmem %s3311_s2, %s1850_s8  ;;  %s1852_s9 = sshll.u32 %s301_s28, 2 }
  0x15   : > { %625 = vmatpush.bf16.msra.mxu2 %v2583_v6  ;;  %v2589_v15 = vld [vmem:[%s3309_s0 + $0xe0] sm:$0xff]  ;;  %v2588_v19 = vld [vmem:[%s3309_s0 + $0xd8] sm:$0xff]  ;;  %v2587_v23 = vld [vmem:[%s3309_s0 + $0xd0] sm:$0xff]  ;;  %s303_s26 = scalar_lea.vmem %s3312_s3, %s1852_s9  ;;  %s2690_s9 = smul.u32 5, %s3326_s19 }
  0x16   : > { %638 = vmatpush.bf16.msra.mxu3 %v2591_v7  ;;  %v2562_v24 = vld [vmem:[%s3309_s0 + $0x8] sm:$0xff]  ;;  %v326_v29 = vld [vmem:[%s293_s27] sm:$0xff]  ;;  %v2600_v38 = vld [vmem:[%s3309_s0 + $0x138] sm:$0xff] }
  0x17   : > { %600 = vmatpush.bf16.msra.mxu0 %v2566_v8  ;;  %v2570_v25 = vld [vmem:[%s3309_s0 + $0x48] sm:$0xff]  ;;  %v2561_v30 = vld [vmem:[%s3309_s0] sm:$0xff]  ;;  %v394_v36 = vunpack.c.l.b16 %v326_v29  ;;  %v395_v37 = vunpack.c.h.b16 %v326_v29  ;;  %v2608_v39 = vld [vmem:[%s3309_s0 + $0x178] sm:$0xff]  ;;  %s3284_s11 = sadd.s32 %s2690_s9, %s3330_s18 }
  0x18   : > { %613 = vmatpush.bf16.msra.mxu1 %v2574_v9  ;;  %v2578_v26 = vld [vmem:[%s3309_s0 + $0x88] sm:$0xff]  ;;  %v2569_v31 = vld [vmem:[%s3309_s0 + $0x40] sm:$0xff]  ;;  %v2616_v40 = vld [vmem:[%s3309_s0 + $0x1b8] sm:$0xff]  ;;  %s1853_s14 = sshll.u32 %s3284_s11, 2  ;;  %s1854_s18 = sshll.u32 %s3284_s11, 1 }
  0x19   : > { %626 = vmatpush.bf16.msra.mxu2 %v2582_v10  ;;  %v2586_v27 = vld [vmem:[%s3309_s0 + $0xc8] sm:$0xff]  ;;  %v2577_v34 = vld [vmem:[%s3309_s0 + $0x80] sm:$0xff]  ;;  %v2624_v41 = vld [vmem:[%s3309_s0 + $0x1f8] sm:$0xff]  ;;  %v2960_v44 = vpack.c.b16 %v394_v36, %v394_v36  ;;  %v2962_v45 = vpack.c.b16 %v395_v37, %v395_v37  ;;  %s312_s16 = scalar_lea.vmem %s3313_s4, %s1853_s14 }
  0x1a   : > { %639 = vmatpush.bf16.msra.mxu3 %v2590_v11  ;;  %v327_v28 = vld [vmem:[%s293_s27 + $0x8] sm:$0xff]  ;;  %v2585_v35 = vld [vmem:[%s3309_s0 + $0xc0] sm:$0xff]  ;;  %v2599_v46 = vld [vmem:[%s3309_s0 + $0x130] sm:$0xff] }
  0x1b   : > { %601 = vmatpush.bf16.msra.mxu0 %v2565_v12  ;;  %v396_v32 = vunpack.c.l.b16 %v327_v28  ;;  %v397_v33 = vunpack.c.h.b16 %v327_v28  ;;  %v2607_v47 = vld [vmem:[%s3309_s0 + $0x170] sm:$0xff]  ;;  %v2598_v50 = vld [vmem:[%s3309_s0 + $0x128] sm:$0xff]  ;;  %v2597_v54 = vld [vmem:[%s3309_s0 + $0x120] sm:$0xff]  ;;  %v719_v8 = vshll.u32 %v2960_v44, 16  ;;  %v726_v9 = vshll.u32 %v2962_v45, 16 }
  0x1c   : > { %614 = vmatpush.bf16.msra.mxu1 %v2573_v13  ;;  %v2615_v48 = vld [vmem:[%s3309_s0 + $0x1b0] sm:$0xff]  ;;  %v2606_v51 = vld [vmem:[%s3309_s0 + $0x168] sm:$0xff]  ;;  %v2605_v55 = vld [vmem:[%s3309_s0 + $0x160] sm:$0xff] }
  0x1d   : > { %627 = vmatpush.bf16.msra.mxu2 %v2581_v14  ;;  %v2956_v42 = vpack.c.b16 %v396_v32, %v396_v32  ;;  %v2958_v43 = vpack.c.b16 %v397_v33, %v397_v33  ;;  %v2623_v49 = vld [vmem:[%s3309_s0 + $0x1f0] sm:$0xff]  ;;  %v2614_v52 = vld [vmem:[%s3309_s0 + $0x1a8] sm:$0xff]  ;;  %v2613_v56 = vld [vmem:[%s3309_s0 + $0x1a0] sm:$0xff] }
  0x1e   : > { %640 = vmatpush.bf16.msra.mxu3 %v2589_v15  ;;  %v2622_v53 = vld [vmem:[%s3309_s0 + $0x1e8] sm:$0xff]  ;;  %v2621_v57 = vld [vmem:[%s3309_s0 + $0x1e0] sm:$0xff]  ;;  %v2596_v58 = vld [vmem:[%s3309_s0 + $0x118] sm:$0xff] }
  0x1f   : > { %602 = vmatpush.bf16.msra.mxu0 %v2564_v16  ;;  %v2604_v59 = vld [vmem:[%s3309_s0 + $0x158] sm:$0xff]  ;;  %v2595_v62 = vld [vmem:[%s3309_s0 + $0x110] sm:$0xff]  ;;  %v2594_v2 = vld [vmem:[%s3309_s0 + $0x108] sm:$0xff]  ;;  %v733_v4 = vshll.u32 %v2956_v42, 16  ;;  %v740_v5 = vshll.u32 %v2958_v43, 16  ;;  %v731_v12 = vshrl.u32 %v2956_v42, 16 }
  0x20   : > { %615 = vmatpush.bf16.msra.mxu1 %v2572_v17  ;;  %v2612_v60 = vld [vmem:[%s3309_s0 + $0x198] sm:$0xff]  ;;  %v2603_v63 = vld [vmem:[%s3309_s0 + $0x150] sm:$0xff]  ;;  %v2602_v3 = vld [vmem:[%s3309_s0 + $0x148] sm:$0xff]  ;;  %v738_v14 = vshrl.u32 %v2958_v43, 16 }
  0x21   : > { %628 = vmatpush.bf16.msra.mxu2 %v2580_v18  ;;  %v2620_v61 = vld [vmem:[%s3309_s0 + $0x1d8] sm:$0xff]  ;;  %v2611_v0 = vld [vmem:[%s3309_s0 + $0x190] sm:$0xff]  ;;  %v2610_v6 = vld [vmem:[%s3309_s0 + $0x188] sm:$0xff]  ;;  %v735_v13 = vrot.slane %v733_v4, 1  ;;  %v742_v15 = vrot.slane %v740_v5, 1  ;;  %v717_v18 = vshrl.u32 %v2960_v44, 16 }
  0x22   : > { %641 = vmatpush.bf16.msra.mxu3 %v2588_v19  ;;  %v2619_v1 = vld [vmem:[%s3309_s0 + $0x1d0] sm:$0xff]  ;;  %v2618_v7 = vld [vmem:[%s3309_s0 + $0x1c8] sm:$0xff]  ;;  %v2593_v10 = vld [vmem:[%s3309_s0 + $0x100] sm:$0xff]  ;;  %v721_v19 = vrot.slane %v719_v8, 1 }
  0x23   : > { %603 = vmatpush.bf16.msra.mxu0 %v2563_v20  ;;  %v2601_v11 = vld [vmem:[%s3309_s0 + $0x140] sm:$0xff]  ;;  %v724_v20 = vshrl.u32 %v2962_v45, 16  ;;  %v2647_v32 = vld [vmem:[%s3309_s0 + $0x2b0] sm:$0xff]  ;;  %v2646_v36 = vld [vmem:[%s3309_s0 + $0x2a8] sm:$0xff] }
  0x24   : > { %616 = vmatpush.bf16.msra.mxu1 %v2571_v21  ;;  %v2609_v16 = vld [vmem:[%s3309_s0 + $0x180] sm:$0xff]  ;;  %v728_v21 = vrot.slane %v726_v9, 1  ;;  %v722_v28 = vor.u32 %v721_v19, %v717_v18  ;;  %v2655_v33 = vld [vmem:[%s3309_s0 + $0x2f0] sm:$0xff]  ;;  %v2654_v37 = vld [vmem:[%s3309_s0 + $0x2e8] sm:$0xff] }
  0x25   : > { %629 = vmatpush.bf16.msra.mxu2 %v2579_v22  ;;  %v2617_v17 = vld [vmem:[%s3309_s0 + $0x1c0] sm:$0xff]  ;;  %v2632_v22 = vld [vmem:[%s3309_s0 + $0x238] sm:$0xff]  ;;  %v2663_v8 = vld [vmem:[%s3309_s0 + $0x330] sm:$0xff] }
  0x26   : > { %642 = vmatpush.bf16.msra.mxu3 %v2587_v23  ;;  %v2640_v23 = vld [vmem:[%s3309_s0 + $0x278] sm:$0xff]  ;;  %v729_v29 = vor.u32 %v728_v21, %v724_v20  ;;  %v2671_v9 = vld [vmem:[%s3309_s0 + $0x370] sm:$0xff]  ;;  %v2677_v18 = vld [vmem:[%s3309_s0 + $0x3a0] sm:$0xff] }
  0x27   : > { %604 = vmatpush.bf16.msra.mxu0 %v2562_v24  ;;  %v2648_v24 = vld [vmem:[%s3309_s0 + $0x2b8] sm:$0xff]  ;;  %v2685_v19 = vld [vmem:[%s3309_s0 + $0x3e0] sm:$0xff]  ;;  %vm1683_vm3 = vmand %vm1681_vm0, %vm1682_vm1 }
  0x28   : > { %617 = vmatpush.bf16.msra.mxu1 %v2570_v25  ;;  %v2656_v25 = vld [vmem:[%s3309_s0 + $0x2f8] sm:$0xff] }
  0x29   : > { %630 = vmatpush.bf16.msra.mxu2 %v2578_v26  ;;  %v736_v26 = vor.u32 %v735_v13, %v731_v12  ;;  %v2662_v12 = vld [vmem:[%s3309_s0 + $0x328] sm:$0xff]  ;;  %v2660_v20 = vld [vmem:[%s3309_s0 + $0x318] sm:$0xff] }
  0x2a   : > { %643 = vmatpush.bf16.msra.mxu3 %v2586_v27  ;;  %v743_v27 = vor.u32 %v742_v15, %v738_v14  ;;  %v2670_v13 = vld [vmem:[%s3309_s0 + $0x368] sm:$0xff]  ;;  %v2668_v21 = vld [vmem:[%s3309_s0 + $0x358] sm:$0xff] }
  0x2b   : > { %605 = vmatpush.bf16.msra.mxu0 %v2561_v30  ;;  %v2631_v30 = vld [vmem:[%s3309_s0 + $0x230] sm:$0xff]  ;;  %v2678_v14 = vld [vmem:[%s3309_s0 + $0x3a8] sm:$0xff] }
  0x2c   : > { %618 = vmatpush.bf16.msra.mxu1 %v2569_v31  ;;  %v2639_v31 = vld [vmem:[%s3309_s0 + $0x270] sm:$0xff]  ;;  %v2686_v15 = vld [vmem:[%s3309_s0 + $0x3e8] sm:$0xff] }
  0x2d   : > { %631 = vmatpush.bf16.msra.mxu2 %v2577_v34  ;;  %v2630_v34 = vld [vmem:[%s3309_s0 + $0x228] sm:$0xff] }
  0x2e   : > { %644 = vmatpush.bf16.msra.mxu3 %v2585_v35  ;;  %606 = vmatmul.bf16.vlgmr.msra.gmra.mxu0 %v2960_v44  ;;  %v2638_v35 = vld [vmem:[%s3309_s0 + $0x268] sm:$0xff]  ;;  %v2644_v44 = vld [vmem:[%s3309_s0 + $0x298] sm:$0xff] }
  0x2f   : > { %940 = vmatpush.bf16.msrb.mxu0 %v2600_v38  ;;  %619 = vmatmul.bf16.vlgmr.msra.gmra.mxu1 %v2962_v45  ;;  %v2629_v38 = vld [vmem:[%s3309_s0 + $0x220] sm:$0xff]  ;;  %v2652_v45 = vld [vmem:[%s3309_s0 + $0x2d8] sm:$0xff] }
  0x30   : > { %953 = vmatpush.bf16.msrb.mxu1 %v2608_v39  ;;  %632 = vmatmul.bf16.vlgmr.msra.gmra.mxu2 %v2956_v42  ;;  %v2637_v39 = vld [vmem:[%s3309_s0 + $0x260] sm:$0xff]  ;;  %v2628_v42 = vld [vmem:[%s3309_s0 + $0x218] sm:$0xff] }
  0x31   : > { %966 = vmatpush.bf16.msrb.mxu2 %v2616_v40  ;;  %645 = vmatmul.bf16.vlgmr.msra.gmra.mxu3 %v2958_v43  ;;  %v2645_v40 = vld [vmem:[%s3309_s0 + $0x2a0] sm:$0xff]  ;;  %v2636_v43 = vld [vmem:[%s3309_s0 + $0x258] sm:$0xff] }
  0x32   : > { %979 = vmatpush.bf16.msrb.mxu3 %v2624_v41  ;;  %v2653_v41 = vld [vmem:[%s3309_s0 + $0x2e0] sm:$0xff] }
  0x33   : > { %941 = vmatpush.bf16.msrb.mxu0 %v2599_v46  ;;  %v2627_v46 = vld [vmem:[%s3309_s0 + $0x210] sm:$0xff] }
  0x34   : > { %954 = vmatpush.bf16.msrb.mxu1 %v2607_v47  ;;  %v2635_v47 = vld [vmem:[%s3309_s0 + $0x250] sm:$0xff] }
  0x35   : > { %967 = vmatpush.bf16.msrb.mxu2 %v2615_v48  ;;  %v2643_v48 = vld [vmem:[%s3309_s0 + $0x290] sm:$0xff] }
  0x36   : > { %980 = vmatpush.bf16.msrb.mxu3 %v2623_v49  ;;  %v2651_v49 = vld [vmem:[%s3309_s0 + $0x2d0] sm:$0xff] }
  0x37   : > { %942 = vmatpush.bf16.msrb.mxu0 %v2598_v50  ;;  %v2626_v50 = vld [vmem:[%s3309_s0 + $0x208] sm:$0xff] }
  0x38   : > { %955 = vmatpush.bf16.msrb.mxu1 %v2606_v51  ;;  %v2634_v51 = vld [vmem:[%s3309_s0 + $0x248] sm:$0xff] }
  0x39   : > { %968 = vmatpush.bf16.msrb.mxu2 %v2614_v52  ;;  %v2642_v52 = vld [vmem:[%s3309_s0 + $0x288] sm:$0xff] }
  0x3a   : > { %981 = vmatpush.bf16.msrb.mxu3 %v2622_v53  ;;  %v2650_v53 = vld [vmem:[%s3309_s0 + $0x2c8] sm:$0xff] }
  0x3b   : > { %943 = vmatpush.bf16.msrb.mxu0 %v2597_v54  ;;  %v994_v54 = vld [vmem:[%s303_s26 + $0x8] sm:$0xff] }
  0x3c   : > { %956 = vmatpush.bf16.msrb.mxu1 %v2605_v55  ;;  %v993_v55 = vld [vmem:[%s303_s26] sm:$0xff]  ;;  %s320_s26 = scalar_lea.vmem %s3314_s5, %s1854_s18 }
  0x3d   : > { %969 = vmatpush.bf16.msrb.mxu2 %v2613_v56  ;;  %v2625_v56 = vld [vmem:[%s3309_s0 + $0x200] sm:$0xff] }
  0x3e   : > { %982 = vmatpush.bf16.msrb.mxu3 %v2621_v57  ;;  %v2633_v57 = vld [vmem:[%s3309_s0 + $0x240] sm:$0xff] }
  0x3f   : > { %944 = vmatpush.bf16.msrb.mxu0 %v2596_v58  ;;  %v1064_v58 = vunpack.c.l.b16 %v994_v54 }
  0x40   : > { %957 = vmatpush.bf16.msrb.mxu1 %v2604_v59  ;;  %v1065_v59 = vunpack.c.h.b16 %v994_v54 }
  0x41   : > { %970 = vmatpush.bf16.msrb.mxu2 %v2612_v60  ;;  %v2641_v60 = vld [vmem:[%s3309_s0 + $0x280] sm:$0xff]  ;;  %v3174_v4 = vpack.c.b16 %v1064_v58, %v1064_v58 }
  0x42   : > { %983 = vmatpush.bf16.msrb.mxu3 %v2620_v61  ;;  %v2649_v61 = vld [vmem:[%s3309_s0 + $0x2c0] sm:$0xff]  ;;  %v3176_v5 = vpack.c.b16 %v1065_v59, %v1065_v59 }
  0x43   : > { %945 = vmatpush.bf16.msrb.mxu0 %v2595_v62  ;;  %v1062_v62 = vunpack.c.l.b16 %v993_v55 }
  0x44   : > { %958 = vmatpush.bf16.msrb.mxu1 %v2603_v63  ;;  %v1063_v63 = vunpack.c.h.b16 %v993_v55 }
  0x45   : > { %971 = vmatpush.bf16.msrb.mxu2 %v2611_v0  ;;  %v2664_v0 = vld [vmem:[%s3309_s0 + $0x338] sm:$0xff] }
  0x46   : > { %984 = vmatpush.bf16.msrb.mxu3 %v2619_v1  ;;  %v2672_v1 = vld [vmem:[%s3309_s0 + $0x378] sm:$0xff] }
  0x47   : > { %946 = vmatpush.bf16.msrb.mxu0 %v2594_v2  ;;  %v2680_v2 = vld [vmem:[%s3309_s0 + $0x3b8] sm:$0xff] }
  0x48   : > { %959 = vmatpush.bf16.msrb.mxu1 %v2602_v3  ;;  %v2688_v3 = vld [vmem:[%s3309_s0 + $0x3f8] sm:$0xff] }
  0x49   : > { %972 = vmatpush.bf16.msrb.mxu2 %v2610_v6  ;;  %v3178_v6 = vpack.c.b16 %v1062_v62, %v1062_v62 }
  0x4a   : > { %985 = vmatpush.bf16.msrb.mxu3 %v2618_v7  ;;  %v3180_v7 = vpack.c.b16 %v1063_v63, %v1063_v63 }
  0x4b   : > { %947 = vmatpush.bf16.msrb.mxu0 %v2593_v10  ;;  %v2679_v10 = vld [vmem:[%s3309_s0 + $0x3b0] sm:$0xff] }
  0x4c   : > { %960 = vmatpush.bf16.msrb.mxu1 %v2601_v11  ;;  %v2687_v11 = vld [vmem:[%s3309_s0 + $0x3f0] sm:$0xff] }
  0x4d   : > { %973 = vmatpush.bf16.msrb.mxu2 %v2609_v16  ;;  %v2661_v16 = vld [vmem:[%s3309_s0 + $0x320] sm:$0xff] }
  0x4e   : > { %986 = vmatpush.bf16.msrb.mxu3 %v2617_v17  ;;  %948 = vmatmul.bf16.vlgmr.msrb.gmra.mxu0 %v722_v28  ;;  %v2669_v17 = vld [vmem:[%s3309_s0 + $0x360] sm:$0xff]  ;;  %v1387_v28 = vshll.u32 %v3178_v6, 16 }
  0x4f   : > { %1266 = vmatpush.bf16.msra.mxu0 %v2632_v22  ;;  %961 = vmatmul.bf16.vlgmr.msrb.gmra.mxu1 %v729_v29  ;;  %v2676_v22 = vld [vmem:[%s3309_s0 + $0x398] sm:$0xff]  ;;  %v1394_v29 = vshll.u32 %v3180_v7, 16 }
  0x50   : > { %1279 = vmatpush.bf16.msra.mxu1 %v2640_v23  ;;  %974 = vmatmul.bf16.vlgmr.msrb.gmra.mxu2 %v736_v26  ;;  %v2684_v23 = vld [vmem:[%s3309_s0 + $0x3d8] sm:$0xff]  ;;  %v2675_v26 = vld [vmem:[%s3309_s0 + $0x390] sm:$0xff] }
  0x51   : > { %1292 = vmatpush.bf16.msra.mxu2 %v2648_v24  ;;  %987 = vmatmul.bf16.vlgmr.msrb.gmra.mxu3 %v743_v27  ;;  %v2659_v24 = vld [vmem:[%s3309_s0 + $0x310] sm:$0xff] }
  0x52   : > { %1305 = vmatpush.bf16.msra.mxu3 %v2656_v25  ;;  %v2667_v25 = vld [vmem:[%s3309_s0 + $0x350] sm:$0xff] }
  0x53   : > { %1267 = vmatpush.bf16.msra.mxu0 %v2631_v30  ;;  %v2683_v27 = vld [vmem:[%s3309_s0 + $0x3d0] sm:$0xff]  ;;  %v2658_v30 = vld [vmem:[%s3309_s0 + $0x308] sm:$0xff] }
  0x54   : > { %1280 = vmatpush.bf16.msra.mxu1 %v2639_v31  ;;  %v2666_v31 = vld [vmem:[%s3309_s0 + $0x348] sm:$0xff] }
  0x55   : > { %1293 = vmatpush.bf16.msra.mxu2 %v2647_v32  ;;  %v1401_v32 = vshll.u32 %v3174_v4, 16 }
  0x56   : > { %1306 = vmatpush.bf16.msra.mxu3 %v2655_v33  ;;  %v1408_v33 = vshll.u32 %v3176_v5, 16 }
  0x57   : > { %1268 = vmatpush.bf16.msra.mxu0 %v2630_v34  ;;  %v2674_v34 = vld [vmem:[%s3309_s0 + $0x388] sm:$0xff] }
  0x58   : > { %1281 = vmatpush.bf16.msra.mxu1 %v2638_v35  ;;  %v2682_v35 = vld [vmem:[%s3309_s0 + $0x3c8] sm:$0xff] }
  0x59   : > { %1294 = vmatpush.bf16.msra.mxu2 %v2646_v36  ;;  %v1385_v36 = vshrl.u32 %v3178_v6, 16 }
  0x5a   : > { %1307 = vmatpush.bf16.msra.mxu3 %v2654_v37  ;;  %v1389_v37 = vrot.slane %v1387_v28, 1 }
  0x5b   : > { %1269 = vmatpush.bf16.msra.mxu0 %v2629_v38  ;;  %v1392_v38 = vshrl.u32 %v3180_v7, 16 }
  0x5c   : > { %1282 = vmatpush.bf16.msra.mxu1 %v2637_v39  ;;  %v1396_v39 = vrot.slane %v1394_v29, 1 }
  0x5d   : > { %1295 = vmatpush.bf16.msra.mxu2 %v2645_v40  ;;  %v2657_v40 = vld [vmem:[%s3309_s0 + $0x300] sm:$0xff] }
  0x5e   : > { %1308 = vmatpush.bf16.msra.mxu3 %v2653_v41  ;;  %v2665_v41 = vld [vmem:[%s3309_s0 + $0x340] sm:$0xff] }
  0x5f   : > { %1270 = vmatpush.bf16.msra.mxu0 %v2628_v42  ;;  %v1399_v42 = vshrl.u32 %v3174_v4, 16 }
  0x60   : > { %1283 = vmatpush.bf16.msra.mxu1 %v2636_v43  ;;  %v1403_v43 = vrot.slane %v1401_v32, 1 }
  0x61   : > { %1296 = vmatpush.bf16.msra.mxu2 %v2644_v44  ;;  %v1406_v44 = vshrl.u32 %v3176_v5, 16 }
  0x62   : > { %1309 = vmatpush.bf16.msra.mxu3 %v2652_v45  ;;  %v1410_v45 = vrot.slane %v1408_v33, 1 }
  0x63   : > { %1271 = vmatpush.bf16.msra.mxu0 %v2627_v46  ;;  %v2673_v46 = vld [vmem:[%s3309_s0 + $0x380] sm:$0xff] }
  0x64   : > { %1284 = vmatpush.bf16.msra.mxu1 %v2635_v47  ;;  %v2681_v47 = vld [vmem:[%s3309_s0 + $0x3c0] sm:$0xff] }
  0x65   : > { %1297 = vmatpush.bf16.msra.mxu2 %v2643_v48  ;;  %v1390_v48 = vor.u32 %v1389_v37, %v1385_v36 }
  0x66   : > { %1310 = vmatpush.bf16.msra.mxu3 %v2651_v49  ;;  %v1397_v49 = vor.u32 %v1396_v39, %v1392_v38 }
  0x67   : > { %1272 = vmatpush.bf16.msra.mxu0 %v2626_v50  ;;  %v1404_v50 = vor.u32 %v1403_v43, %v1399_v42 }
  0x68   : > { %1285 = vmatpush.bf16.msra.mxu1 %v2634_v51  ;;  %v1411_v51 = vor.u32 %v1410_v45, %v1406_v44 }
  0x69   : > { %1298 = vmatpush.bf16.msra.mxu2 %v2642_v52 }
  0x6a   : > { %1311 = vmatpush.bf16.msra.mxu3 %v2650_v53 }
  0x6b   : > { %1273 = vmatpush.bf16.msra.mxu0 %v2625_v56 }
  0x6c   : > { %1286 = vmatpush.bf16.msra.mxu1 %v2633_v57 }
  0x6d   : > { %1299 = vmatpush.bf16.msra.mxu2 %v2641_v60 }
  0x6e   : > { %1312 = vmatpush.bf16.msra.mxu3 %v2649_v61  ;;  %1274 = vmatmul.bf16.vlgmr.msra.gmra.mxu0 %v3178_v6 }
  0x6f   : > { %1608 = vmatpush.bf16.msrb.mxu0 %v2664_v0  ;;  %1287 = vmatmul.bf16.vlgmr.msra.gmra.mxu1 %v3180_v7 }
  0x70   : > { %1621 = vmatpush.bf16.msrb.mxu1 %v2672_v1  ;;  %1300 = vmatmul.bf16.vlgmr.msra.gmra.mxu2 %v3174_v4 }
  0x71   : > { %1634 = vmatpush.bf16.msrb.mxu2 %v2680_v2  ;;  %1313 = vmatmul.bf16.vlgmr.msra.gmra.mxu3 %v3176_v5 }
  0x72   : > { %1647 = vmatpush.bf16.msrb.mxu3 %v2688_v3 }
  0x73   : > { %1609 = vmatpush.bf16.msrb.mxu0 %v2663_v8 }
  0x74   : > { %1622 = vmatpush.bf16.msrb.mxu1 %v2671_v9 }
  0x75   : > { %1635 = vmatpush.bf16.msrb.mxu2 %v2679_v10 }
  0x76   : > { %1648 = vmatpush.bf16.msrb.mxu3 %v2687_v11 }
  0x77   : > { %1610 = vmatpush.bf16.msrb.mxu0 %v2662_v12 }
  0x78   : > { %1623 = vmatpush.bf16.msrb.mxu1 %v2670_v13 }
  0x79   : > { %1636 = vmatpush.bf16.msrb.mxu2 %v2678_v14 }
  0x7a   : > { %1649 = vmatpush.bf16.msrb.mxu3 %v2686_v15 }
  0x7b   : > { %1611 = vmatpush.bf16.msrb.mxu0 %v2661_v16 }
  0x7c   : > { %1624 = vmatpush.bf16.msrb.mxu1 %v2669_v17  ;;  %v2731_v17 = vld [vmem:[%s3310_s1] ss:$0 sm:$0xff] }
  0x7d   : > { %1637 = vmatpush.bf16.msrb.mxu2 %v2677_v18 }
  0x7e   : > { %1650 = vmatpush.bf16.msrb.mxu3 %v2685_v19 }
  0x7f   : > { %1612 = vmatpush.bf16.msrb.mxu0 %v2660_v20 }
  0x80   : > { %1625 = vmatpush.bf16.msrb.mxu1 %v2668_v21 }
  0x81   : > { %1638 = vmatpush.bf16.msrb.mxu2 %v2676_v22 }
  0x82   : > { %1651 = vmatpush.bf16.msrb.mxu3 %v2684_v23 }
  0x83   : > { %1613 = vmatpush.bf16.msrb.mxu0 %v2659_v24 }
  0x84   : > { %1626 = vmatpush.bf16.msrb.mxu1 %v2667_v25 }
  0x85   : > { %1639 = vmatpush.bf16.msrb.mxu2 %v2675_v26 }
  0x86   : > { %1652 = vmatpush.bf16.msrb.mxu3 %v2683_v27 }
  0x87   : > { %1614 = vmatpush.bf16.msrb.mxu0 %v2658_v30 }
  0x88   : > { %1627 = vmatpush.bf16.msrb.mxu1 %v2666_v31 }
  0x89   : > { %1640 = vmatpush.bf16.msrb.mxu2 %v2674_v34 }
  0x8a   : > { %1653 = vmatpush.bf16.msrb.mxu3 %v2682_v35  ;;  %v1684_v35 = vld [vmem:[%s312_s16] sm:$0x7] }
  0x8b   : > { %1615 = vmatpush.bf16.msrb.mxu0 %v2657_v40 }
  0x8c   : > { %1628 = vmatpush.bf16.msrb.mxu1 %v2665_v41 }
  0x8d   : > { %1641 = vmatpush.bf16.msrb.mxu2 %v2673_v46 }
  0x8e   : > { %1654 = vmatpush.bf16.msrb.mxu3 %v2681_v47  ;;  %1616 = vmatmul.bf16.vlgmr.msrb.gmra.mxu0 %v1390_v48 }
  0x8f   : > { %1629 = vmatmul.bf16.vlgmr.msrb.gmra.mxu1 %v1397_v49 }
  0x90   : > { %1642 = vmatmul.bf16.vlgmr.msrb.gmra.mxu2 %v1404_v50 }
  0x91   : > { %1655 = vmatmul.bf16.vlgmr.msrb.gmra.mxu3 %v1411_v51 }
  0xab   : > { %v607_v52 = vpop.f32.mrf.mxu0 }
  0xac   : > { %v620_v53 = vpop.f32.mrf.mxu1 }
  0xad   : > { %v621_v54 = vadd.f32 %v620_v53, %v607_v52 }
  0xb3   : > { %v633_v55 = vpop.f32.mrf.mxu2  ;;  %v609_v59 = vpop.f32.mrf.mxu0 }
  0xb4   : > { %v646_v56 = vpop.f32.mrf.mxu3  ;;  %v634_v57 = vadd.f32 %v633_v55, %v621_v54  ;;  %v622_v60 = vpop.f32.mrf.mxu1 }
  0xb6   : > { %v647_v58 = vadd.f32 %v646_v56, %v634_v57 }
  0xb8   : > { %v650_v22 = vadd.f32 %v2731_v17, %v647_v58 }
  0xbb   : > { %v635_v61 = vpop.f32.mrf.mxu2 }
  0xbc   : > { %v648_v62 = vpop.f32.mrf.mxu3 }
  0xcb   : > { %v949_v63 = vpop.f32.mrf.mxu0 }
  0xcc   : > { %v962_v0 = vpop.f32.mrf.mxu1 }
  0xcd   : > { %v963_v15 = vadd.f32 %v962_v0, %v949_v63 }
  0xd3   : > { %v975_v1 = vpop.f32.mrf.mxu2  ;;  %v951_v3 = vpop.f32.mrf.mxu0 }
  0xd4   : > { %v988_v2 = vpop.f32.mrf.mxu3  ;;  %v964_v4 = vpop.f32.mrf.mxu1  ;;  %v976_v18 = vadd.f32 %v975_v1, %v963_v15 }
  0xd6   : > { %v989_v23 = vadd.f32 %v988_v2, %v976_v18 }
  0xd8   : > { %v992_v28 = vadd.f32 %v989_v23, %v650_v22 }
  0xdb   : > { %v977_v5 = vpop.f32.mrf.mxu2 }
  0xdc   : > { %v990_v6 = vpop.f32.mrf.mxu3 }
  0xeb   : > { %v1275_v7 = vpop.f32.mrf.mxu0 }
  0xec   : > { %v1288_v8 = vpop.f32.mrf.mxu1 }
  0xed   : > { %v1289_v16 = vadd.f32 %v1288_v8, %v1275_v7 }
  0xf3   : > { %v1301_v9 = vpop.f32.mrf.mxu2  ;;  %v1277_v11 = vpop.f32.mrf.mxu0 }
  0xf4   : > { %v1314_v10 = vpop.f32.mrf.mxu3  ;;  %v1290_v12 = vpop.f32.mrf.mxu1  ;;  %v1302_v21 = vadd.f32 %v1301_v9, %v1289_v16 }
  0xf6   : > { %v1315_v25 = vadd.f32 %v1314_v10, %v1302_v21 }
  0xf8   : > { %v1318_v32 = vadd.f32 %v1315_v25, %v992_v28 }
  0xfb   : > { %v1303_v13 = vpop.f32.mrf.mxu2 }
  0xfc   : > { %v1316_v14 = vpop.f32.mrf.mxu3 }
 0x10b   : > { %v1617_v19 = vpop.f32.mrf.mxu0 }
 0x10c   : > { %v1630_v20 = vpop.f32.mrf.mxu1 }
 0x10d   : > { %v1631_v24 = vadd.f32 %v1630_v20, %v1617_v19 }
 0x113   : > { %v1643_v26 = vpop.f32.mrf.mxu2  ;;  %v1619_v30 = vpop.f32.mrf.mxu0 }
 0x114   : > { %v1656_v27 = vpop.f32.mrf.mxu3  ;;  %v1644_v29 = vadd.f32 %v1643_v26, %v1631_v24  ;;  %v1632_v31 = vpop.f32.mrf.mxu1 }
 0x116   : > { %v1657_v33 = vadd.f32 %v1656_v27, %v1644_v29 }
 0x118   : > { %v1660_v34 = vadd.f32 %v1657_v33, %v1318_v32 }
 0x11a   : > { %v1662_v36 = vsel %vm1661_vm2, %v1660_v34, 0.0  ;;  %v1669_v37 = vmul.f32 %v1660_v34, %v1660_v34  ;;  %v1680_v38 = vpack.c.bf16 %v1660_v34, %v1660_v34 }
 0x11b   : > { %v1663_v39 = vrot.slane %v1662_v36, 4  ;;  %v1645_v40 = vpop.f32.mrf.mxu2 }
 0x11c   : > { %v1658_v41 = vpop.f32.mrf.mxu3  ;;  %v1670_v42 = vsel %vm1661_vm2, %v1669_v37, 0.0  ;;  %v1685_v43 = vsel %vm1683_vm3, %v1680_v38, %v1684_v35 }
 0x11d   : > { %v1664_v44 = vadd.f32 %v1663_v39, %v1662_v36  ;;  %v1671_v45 = vrot.slane %v1670_v42, 4  ;;  %1686 = vst [vmem:[%s312_s16] sm:$0x7] %v1685_v43 }
 0x11f   : > { %v1665_v46 = vrot.slane %v1664_v44, 2  ;;  %v1672_v47 = vadd.f32 %v1671_v45, %v1670_v42 }
 0x121   : > { %v1666_v48 = vadd.f32 %v1665_v46, %v1664_v44  ;;  %v1673_v49 = vrot.slane %v1672_v47, 2 }
 0x123   : > { %v1667_v50 = vrot.slane %v1666_v48, 1  ;;  %v1674_v51 = vadd.f32 %v1673_v49, %v1672_v47 }
 0x125   : > { %v1675_v52 = vrot.slane %v1674_v51, 1  ;;  %v1668_v53 = vadd.f32 %v1667_v50, %v1666_v48 }
 0x127   : > { %v1676_v54 = vadd.f32 %v1675_v52, %v1674_v51 }
 0x129   : > { %v1678_v55 = vsel %vm1677_vm4, %v1668_v53, %v1676_v54 }
 0x12a   : > { %1679 = vst [vmem:[%s320_s26] sm:$0x3] %v1678_v55 }
 0x12b PF: > { %s16_s22 = sadd.s32 1, %s2770_s22   ;;  %s3315_s18 = smov %s2762_s20 }
 0x12c   : > { %p13_p9 = scmp.ge.s32.totalorder %s16_s22, 12   ;;  %s3316_s19 = smov %s2766_s21 }
 0x12d   : > { %s3317_s20 = smov %s3320_s23  ;;  %s3318_s21 = smov %s3324_s24 }
 0x12e   :  { %15 = sbr.rel (!%p13_p9) target bundleno = 3 (0x3), region = 84 }

// kernel: _lambda_.12
= control target key start
LH: loop header
LB: loop body
LE: loop exit
PB: predicated region body
PF: predicated region fallthrough
CT: control target
= control target key end

     0   :  { %s422_s12 = smov 0   ;;  %s424_s13 = smov 0   ;;  %s479_s0 = inlined_call_operand.vmem [shape: bf16[2,3,3,128], index: 0, kind: input, shape index: {}]   ;;  %s480_s1 = inlined_call_operand.vmem [shape: f32[1,128], index: 1, kind: input, shape index: {}]   ;;  %s481_s2 = inlined_call_operand.vmem [shape: f32[1,128], index: 2, kind: input, shape index: {}]   ;;  %s482_s3 = inlined_call_operand.vmem [shape: bf16[2,3,3,128], index: 3, kind: output, shape index: {}]  }
   0x1   :  { %s426_s14 = smov 0   ;;  %s428_s15 = smov 0  }
   0x2   :  { %s430_s16 = smov 0  }
   0x3 LB: > { %s22_s17 = sadd.s32 1, %s392_s14  ;;  %s25_s18 = sadd.s32 1, %s396_s15  ;;  %s400_s16 = sphi %s430_s16, %s13_s16   ;;  %s396_s15 = sphi %s428_s15, %s486_s15   ;;  %s392_s14 = sphi %s426_s14, %s485_s14   ;;  %s388_s13 = sphi %s424_s13, %s484_s13   ;;  %s384_s12 = sphi %s422_s12, %s483_s12  }
   0x4   : > { %p23_p0 = scmp.ge.s32.totalorder %s22_s17, 3  ;;  %p314_p1 = scmp.ge.s32.totalorder %s400_s16, 1 }
   0x5   : > { %p156_p2 = scmp.lt.s32.totalorder %s400_s16, 7 }
   0x6   : > { %s488_s17 = smov (%p23_p0, %s22_s17), 0  ;;  %s490_s18 = smov (!%p23_p0, %s25_s18), %s396_s15 }
   0x7   : > { %p157_p3 = pnand %p314_p1, %p156_p2  ;;  %p27_p4 = scmp.ge.s32.totalorder %s490_s18, 2 }
   0x8   : > { %p186_p5 = scmp.lt.s32.totalorder (!%p157_p3), %s388_s13, 1  ;;  %p188_p6 = scmp.lt.s32.totalorder (!%p157_p3), %s384_s12, 2 }
   0x9   : > { %s492_s18 = smov (%p27_p4, %s490_s18), 0  ;;  %160 = sbr.rel (%p157_p3) target bundleno = 34 (0x22), region = 32 }
   0xe   : > { %s494_s13 = smov (!%p186_p5, %s388_s13), 1  ;;  %s496_s12 = smov (!%p188_p6, %s384_s12), 2  ;;  %v360_v0 = vld [vmem:[%s480_s1] ss:$0 sm:$0xff]  ;;  %vm218_vm0 = vcmask 1041408  }
   0xf   : > { %s319_s19 = smul.u32 3, %s494_s13  ;;  %v361_v3 = vld [vmem:[%s481_s2] ss:$0 sm:$0xff]  ;;  %vm219_vm1 = vsmask.f32 1280 }
  0x10   : > { %vm220_vm3 = vmand %vm218_vm0, %vm219_vm1 }
  0x11   : > { %s191_s20 = sadd.s32 %s319_s19, %s496_s12 }
  0x12   : > { %s315_s21 = sshll.u32 %s191_s20, 1 }
  0x13   : > { %s193_s24 = scalar_lea.vmem %s479_s0, %s315_s21  ;;  %s201_s4 = scalar_lea.vmem %s482_s3, %s315_s21 }
  0x14   : > { %v202_v1 = vld [vmem:[%s193_s24] sm:$0x3] }
  0x15   : > { %v203_v2 = vunpack.c.l.bf16 %v202_v1  ;;  %v221_v8 = vld [vmem:[%s201_s4] sm:$0x3] }
  0x17   : > { %v208_v4 = vmul.f32 %v360_v0, %v203_v2 }
  0x19   : > { %v213_v5 = vadd.f32 %v361_v3, %v208_v4 }
  0x1b   : > { %vm214_vm2 = vcmp.ge.f32.partialorder %v213_v5, 0.0  ;;  %v215_v6 = vmul.f32 0.2, %v213_v5 }
  0x1d   : > { %v216_v7 = vsel %vm214_vm2, %v213_v5, %v215_v6 }
  0x1e   : > { %v217_v9 = vpack.c.bf16 %v216_v7, %v216_v7 }
  0x20   : > { %v222_v10 = vsel %vm220_vm3, %v217_v9, %v221_v8 }
  0x21   : > { %223 = vst [vmem:[%s201_s4] sm:$0x3] %v222_v10 }
  0x22 PF: > { %s13_s16 = sadd.s32 1, %s400_s16   ;;  %s483_s12 = smov %s392_s14 }
  0x23   : > { %p10_p7 = scmp.ge.s32.totalorder %s13_s16, 8   ;;  %s484_s13 = smov %s396_s15 }
  0x24   : > { %s485_s14 = smov %s488_s17  ;;  %s486_s15 = smov %s492_s18 }
  0x25   :  { %12 = sbr.rel (!%p10_p7) target bundleno = 3 (0x3), region = 62 }

// kernel: _lambda_.14
= control target key start
LH: loop header
LB: loop body
LE: loop exit
PB: predicated region body
PF: predicated region fallthrough
CT: control target
= control target key end

     0   :  { %s418_s12 = smov 0   ;;  %s420_s13 = smov 0   ;;  %s472_s0 = inlined_call_operand.vmem [shape: bf16[2,4,4,128], index: 0, kind: input, shape index: {}]   ;;  %s473_s1 = inlined_call_operand.vmem [shape: f32[1,128], index: 1, kind: input, shape index: {}]   ;;  %s474_s2 = inlined_call_operand.vmem [shape: f32[1,128], index: 2, kind: input, shape index: {}]   ;;  %s475_s3 = inlined_call_operand.vmem [shape: bf16[2,4,4,128], index: 3, kind: output, shape index: {}]  }
   0x1   :  { %s422_s14 = smov 0   ;;  %s424_s15 = smov 0  }
   0x2   :  { %s426_s16 = smov 0  }
   0x3 LB: > { %s22_s17 = sadd.s32 1, %s388_s14  ;;  %s25_s18 = sadd.s32 1, %s392_s15  ;;  %s396_s16 = sphi %s426_s16, %s13_s16   ;;  %s392_s15 = sphi %s424_s15, %s479_s15   ;;  %s388_s14 = sphi %s422_s14, %s478_s14   ;;  %s384_s13 = sphi %s420_s13, %s477_s13   ;;  %s380_s12 = sphi %s418_s12, %s476_s12  }
   0x4   : > { %p23_p0 = scmp.ge.s32.totalorder %s22_s17, 4  ;;  %p309_p1 = scmp.ge.s32.totalorder %s396_s16, 1 }
   0x5   : > { %p156_p2 = scmp.lt.s32.totalorder %s396_s16, 9 }
   0x6   : > { %s481_s17 = smov (%p23_p0, %s22_s17), 0  ;;  %s483_s18 = smov (!%p23_p0, %s25_s18), %s392_s15 }
   0x7   : > { %p157_p3 = pnand %p309_p1, %p156_p2  ;;  %p27_p4 = scmp.ge.s32.totalorder %s483_s18, 2 }
   0x8   : > { %p186_p5 = scmp.lt.s32.totalorder (!%p157_p3), %s384_s13, 1  ;;  %p188_p6 = scmp.lt.s32.totalorder (!%p157_p3), %s380_s12, 3 }
   0x9   : > { %s485_s18 = smov (%p27_p4, %s483_s18), 0  ;;  %160 = sbr.rel (%p157_p3) target bundleno = 32 (0x20), region = 32 }
   0xe   : > { %s487_s13 = smov (!%p186_p5, %s384_s13), 1  ;;  %s489_s12 = smov (!%p188_p6, %s380_s12), 3  ;;  %v356_v0 = vld [vmem:[%s473_s1] ss:$0 sm:$0xff] }
   0xf   : > { %s310_s19 = sshll.u32 %s487_s13, 2  ;;  %v357_v3 = vld [vmem:[%s474_s2] ss:$0 sm:$0xff] }
  0x10   : > { %s191_s20 = sadd.s32 %s310_s19, %s489_s12 }
  0x11   : > { %s311_s21 = sshll.u32 %s191_s20, 1 }
  0x12   : > { %s193_s24 = scalar_lea.vmem %s472_s0, %s311_s21  ;;  %s201_s4 = scalar_lea.vmem %s475_s3, %s311_s21 }
  0x13   : > { %v202_v1 = vld [vmem:[%s193_s24] sm:$0x3] }
  0x14   : > { %v203_v2 = vunpack.c.l.bf16 %v202_v1 }
  0x16   : > { %v208_v4 = vmul.f32 %v356_v0, %v203_v2 }
  0x18   : > { %v213_v5 = vadd.f32 %v357_v3, %v208_v4 }
  0x1a   : > { %vm214_vm0 = vcmp.ge.f32.partialorder %v213_v5, 0.0  ;;  %v215_v6 = vmul.f32 0.2, %v213_v5 }
  0x1c   : > { %v216_v7 = vsel %vm214_vm0, %v213_v5, %v215_v6 }
  0x1d   : > { %v217_v8 = vpack.c.bf16 %v216_v7, %v216_v7 }
  0x1f   : > { %218 = vst [vmem:[%s201_s4] sm:$0x3] %v217_v8 }
  0x20 PF: > { %s13_s16 = sadd.s32 1, %s396_s16   ;;  %s476_s12 = smov %s388_s14 }
  0x21   : > { %p10_p7 = scmp.ge.s32.totalorder %s13_s16, 10   ;;  %s477_s13 = smov %s392_s15 }
  0x22   : > { %s478_s14 = smov %s481_s17  ;;  %s479_s15 = smov %s485_s18 }
  0x23   :  { %12 = sbr.rel (!%p10_p7) target bundleno = 3 (0x3), region = 62 }

// kernel: _lambda_.11
= control target key start
LH: loop header
LB: loop body
LE: loop exit
PB: predicated region body
PF: predicated region fallthrough
CT: control target
= control target key end

     0   :  { %s2802_s18 = smov 0   ;;  %s2804_s19 = smov 0   ;;  %s3312_s0 = inlined_call_operand.vmem [shape: bf16[4,512,128], index: 0, kind: input, shape index: {}]   ;;  %s3313_s1 = inlined_call_operand.vmem [shape: f32[1,128], index: 1, kind: input, shape index: {}]   ;;  %s3314_s2 = inlined_call_operand.vmem [shape: bf16[2,5,5,512], index: 2, kind: input, shape index: {}, may-alias: {2,3}]   ;;  %s3315_s3 = inlined_call_operand.vmem [shape: bf16[2,5,5,512], index: 3, kind: input, shape index: {}, may-alias: {2,3}]   ;;  %s3316_s4 = inlined_call_operand.vmem [shape: bf16[2,3,3,128], index: 4, kind: output, shape index: {0}]   ;;  %s3317_s5 = inlined_call_operand.vmem [shape: f32[2,3,2,128], index: 5, kind: output, shape index: {1}]  }
   0x1   :  { %s2806_s20 = smov 0   ;;  %s2808_s21 = smov 0  }
   0x2   :  { %s2810_s22 = smov 0  }
   0x3 LB: > { %s25_s23 = sadd.s32 1, %s2762_s20  ;;  %s28_s24 = sadd.s32 1, %s2766_s21  ;;  %s2770_s22 = sphi %s2810_s22, %s16_s22   ;;  %s2766_s21 = sphi %s2808_s21, %s3321_s21   ;;  %s2762_s20 = sphi %s2806_s20, %s3320_s20   ;;  %s2758_s19 = sphi %s2804_s19, %s3319_s19   ;;  %s2754_s18 = sphi %s2802_s18, %s3318_s18  }
   0x4   : > { %p26_p0 = scmp.ge.s32.totalorder %s25_s23, 3  ;;  %p1848_p1 = scmp.ge.s32.totalorder %s2770_s22, 1 }
   0x5   : > { %p232_p2 = scmp.lt.s32.totalorder %s2770_s22, 7 }
   0x6   : > { %s3323_s23 = smov (%p26_p0, %s25_s23), 0  ;;  %s3325_s24 = smov (!%p26_p0, %s28_s24), %s2766_s21 }
   0x7   : > { %p233_p3 = pnand %p1848_p1, %p232_p2  ;;  %p30_p4 = scmp.ge.s32.totalorder %s3325_s24, 2 }
   0x8   : > { %p285_p5 = scmp.lt.s32.totalorder (!%p233_p3), %s2758_s19, 1  ;;  %p287_p6 = scmp.lt.s32.totalorder (!%p233_p3), %s2754_s18, 4 }
   0x9   : > { %s3327_s24 = smov (%p30_p4, %s3325_s24), 0  ;;  %236 = sbr.rel (%p233_p3) target bundleno = 299 (0x12b), region = 36 }
   0xa   : > { %s294_s7 = sadd.s32 (!%p233_p3), 1, %s2754_s18  ;;  %p307_p8 = scmp.lt.s32.totalorder (!%p233_p3), %s2754_s18, 2 }
   0xb   : > { %p297_p7 = scmp.lt.s32.totalorder (!%p233_p3), %s294_s7, 4 }
   0xe   : > { %v2568_v0 = vld [vmem:[%s3312_s0 + $0x38] sm:$0xff]  ;;  %v2567_v4 = vld [vmem:[%s3312_s0 + $0x30] sm:$0xff]  ;;  %v2566_v8 = vld [vmem:[%s3312_s0 + $0x28] sm:$0xff]  ;;  %s3329_s19 = smov (!%p285_p5, %s2758_s19), 1  ;;  %s3331_s7 = smov (!%p297_p7, %s294_s7), 4  ;;  %vm1681_vm0 = vcmask 1041408  }
   0xf   : > { %v2576_v1 = vld [vmem:[%s3312_s0 + $0x78] sm:$0xff]  ;;  %598 = vmatpush.bf16.msra.mxu0 %v2568_v0  ;;  %v2575_v5 = vld [vmem:[%s3312_s0 + $0x70] sm:$0xff]  ;;  %v2574_v9 = vld [vmem:[%s3312_s0 + $0x68] sm:$0xff]  ;;  %s288_s6 = scalar_select %p287_p6, %s2754_s18, 4  ;;  %vm1682_vm1 = vsmask.f32 1280 }
  0x10   : > { %v2584_v2 = vld [vmem:[%s3312_s0 + $0xb8] sm:$0xff]  ;;  %611 = vmatpush.bf16.msra.mxu1 %v2576_v1  ;;  %v2583_v6 = vld [vmem:[%s3312_s0 + $0xb0] sm:$0xff]  ;;  %v2582_v10 = vld [vmem:[%s3312_s0 + $0xa8] sm:$0xff]  ;;  %s2689_s11 = smul.u32 20, %s3329_s19  ;;  %s3333_s18 = smov (!%p307_p8, %s2754_s18), 2  ;;  %vm1661_vm2 = vcmask 1042432  }
  0x11   : > { %v2592_v3 = vld [vmem:[%s3312_s0 + $0xf8] sm:$0xff]  ;;  %624 = vmatpush.bf16.msra.mxu2 %v2584_v2  ;;  %v2591_v7 = vld [vmem:[%s3312_s0 + $0xf0] sm:$0xff]  ;;  %v2590_v11 = vld [vmem:[%s3312_s0 + $0xe8] sm:$0xff]  ;;  %s1849_s16 = sshll.u32 %s288_s6, 2  ;;  %vm1677_vm4 = vcmask 1040384  }
  0x12   : > { %637 = vmatpush.bf16.msra.mxu3 %v2592_v3  ;;  %v2565_v12 = vld [vmem:[%s3312_s0 + $0x20] sm:$0xff]  ;;  %v2564_v16 = vld [vmem:[%s3312_s0 + $0x18] sm:$0xff]  ;;  %s291_s28 = sadd.s32 %s2689_s11, %s1849_s16  ;;  %v2563_v20 = vld [vmem:[%s3312_s0 + $0x10] sm:$0xff]  ;;  %s1851_s16 = sshll.u32 %s3331_s7, 2 }
  0x13   : > { %599 = vmatpush.bf16.msra.mxu0 %v2567_v4  ;;  %v2573_v13 = vld [vmem:[%s3312_s0 + $0x60] sm:$0xff]  ;;  %v2572_v17 = vld [vmem:[%s3312_s0 + $0x58] sm:$0xff]  ;;  %s1850_s8 = sshll.u32 %s291_s28, 2  ;;  %v2571_v21 = vld [vmem:[%s3312_s0 + $0x50] sm:$0xff]  ;;  %s301_s28 = sadd.s32 %s2689_s11, %s1851_s16 }
  0x14   : > { %612 = vmatpush.bf16.msra.mxu1 %v2575_v5  ;;  %v2581_v14 = vld [vmem:[%s3312_s0 + $0xa0] sm:$0xff]  ;;  %v2580_v18 = vld [vmem:[%s3312_s0 + $0x98] sm:$0xff]  ;;  %v2579_v22 = vld [vmem:[%s3312_s0 + $0x90] sm:$0xff]  ;;  %s293_s27 = scalar_lea.vmem %s3314_s2, %s1850_s8  ;;  %s1852_s9 = sshll.u32 %s301_s28, 2 }
  0x15   : > { %625 = vmatpush.bf16.msra.mxu2 %v2583_v6  ;;  %v2589_v15 = vld [vmem:[%s3312_s0 + $0xe0] sm:$0xff]  ;;  %v2588_v19 = vld [vmem:[%s3312_s0 + $0xd8] sm:$0xff]  ;;  %v2587_v23 = vld [vmem:[%s3312_s0 + $0xd0] sm:$0xff]  ;;  %s303_s26 = scalar_lea.vmem %s3315_s3, %s1852_s9  ;;  %s2690_s9 = smul.u32 3, %s3329_s19 }
  0x16   : > { %638 = vmatpush.bf16.msra.mxu3 %v2591_v7  ;;  %v2562_v24 = vld [vmem:[%s3312_s0 + $0x8] sm:$0xff]  ;;  %v326_v29 = vld [vmem:[%s293_s27] sm:$0x77]  ;;  %v2600_v38 = vld [vmem:[%s3312_s0 + $0x138] sm:$0xff] }
  0x17   : > { %600 = vmatpush.bf16.msra.mxu0 %v2566_v8  ;;  %v2570_v25 = vld [vmem:[%s3312_s0 + $0x48] sm:$0xff]  ;;  %v2561_v30 = vld [vmem:[%s3312_s0] sm:$0xff]  ;;  %v394_v36 = vunpack.c.l.b16 %v326_v29  ;;  %v395_v37 = vunpack.c.h.b16 %v326_v29  ;;  %v2608_v39 = vld [vmem:[%s3312_s0 + $0x178] sm:$0xff]  ;;  %s3284_s11 = sadd.s32 %s2690_s9, %s3333_s18 }
  0x18   : > { %613 = vmatpush.bf16.msra.mxu1 %v2574_v9  ;;  %v2578_v26 = vld [vmem:[%s3312_s0 + $0x88] sm:$0xff]  ;;  %v2569_v31 = vld [vmem:[%s3312_s0 + $0x40] sm:$0xff]  ;;  %v2616_v40 = vld [vmem:[%s3312_s0 + $0x1b8] sm:$0xff]  ;;  %s1853_s14 = sshll.u32 %s3284_s11, 1 }
  0x19   : > { %626 = vmatpush.bf16.msra.mxu2 %v2582_v10  ;;  %v2586_v27 = vld [vmem:[%s3312_s0 + $0xc8] sm:$0xff]  ;;  %v2577_v34 = vld [vmem:[%s3312_s0 + $0x80] sm:$0xff]  ;;  %v2624_v41 = vld [vmem:[%s3312_s0 + $0x1f8] sm:$0xff]  ;;  %v2960_v44 = vpack.c.b16 %v394_v36, %v394_v36  ;;  %v2962_v45 = vpack.c.b16 %v395_v37, %v395_v37  ;;  %s312_s18 = scalar_lea.vmem %s3316_s4, %s1853_s14  ;;  %s320_s25 = scalar_lea.vmem %s3317_s5, %s1853_s14 }
  0x1a   : > { %639 = vmatpush.bf16.msra.mxu3 %v2590_v11  ;;  %v327_v28 = vld [vmem:[%s293_s27 + $0x8] sm:$0x77]  ;;  %v2585_v35 = vld [vmem:[%s3312_s0 + $0xc0] sm:$0xff]  ;;  %v2599_v46 = vld [vmem:[%s3312_s0 + $0x130] sm:$0xff] }
  0x1b   : > { %601 = vmatpush.bf16.msra.mxu0 %v2565_v12  ;;  %v396_v32 = vunpack.c.l.b16 %v327_v28  ;;  %v397_v33 = vunpack.c.h.b16 %v327_v28  ;;  %v2607_v47 = vld [vmem:[%s3312_s0 + $0x170] sm:$0xff]  ;;  %v2598_v50 = vld [vmem:[%s3312_s0 + $0x128] sm:$0xff]  ;;  %v2597_v54 = vld [vmem:[%s3312_s0 + $0x120] sm:$0xff]  ;;  %v719_v8 = vshll.u32 %v2960_v44, 16  ;;  %v726_v9 = vshll.u32 %v2962_v45, 16 }
  0x1c   : > { %614 = vmatpush.bf16.msra.mxu1 %v2573_v13  ;;  %v2615_v48 = vld [vmem:[%s3312_s0 + $0x1b0] sm:$0xff]  ;;  %v2606_v51 = vld [vmem:[%s3312_s0 + $0x168] sm:$0xff]  ;;  %v2605_v55 = vld [vmem:[%s3312_s0 + $0x160] sm:$0xff] }
  0x1d   : > { %627 = vmatpush.bf16.msra.mxu2 %v2581_v14  ;;  %v2956_v42 = vpack.c.b16 %v396_v32, %v396_v32  ;;  %v2958_v43 = vpack.c.b16 %v397_v33, %v397_v33  ;;  %v2623_v49 = vld [vmem:[%s3312_s0 + $0x1f0] sm:$0xff]  ;;  %v2614_v52 = vld [vmem:[%s3312_s0 + $0x1a8] sm:$0xff]  ;;  %v2613_v56 = vld [vmem:[%s3312_s0 + $0x1a0] sm:$0xff] }
  0x1e   : > { %640 = vmatpush.bf16.msra.mxu3 %v2589_v15  ;;  %v2622_v53 = vld [vmem:[%s3312_s0 + $0x1e8] sm:$0xff]  ;;  %v2621_v57 = vld [vmem:[%s3312_s0 + $0x1e0] sm:$0xff]  ;;  %v2596_v58 = vld [vmem:[%s3312_s0 + $0x118] sm:$0xff] }
  0x1f   : > { %602 = vmatpush.bf16.msra.mxu0 %v2564_v16  ;;  %v2604_v59 = vld [vmem:[%s3312_s0 + $0x158] sm:$0xff]  ;;  %v2595_v62 = vld [vmem:[%s3312_s0 + $0x110] sm:$0xff]  ;;  %v2594_v2 = vld [vmem:[%s3312_s0 + $0x108] sm:$0xff]  ;;  %v733_v4 = vshll.u32 %v2956_v42, 16  ;;  %v740_v5 = vshll.u32 %v2958_v43, 16  ;;  %v731_v12 = vshrl.u32 %v2956_v42, 16 }
  0x20   : > { %615 = vmatpush.bf16.msra.mxu1 %v2572_v17  ;;  %v2612_v60 = vld [vmem:[%s3312_s0 + $0x198] sm:$0xff]  ;;  %v2603_v63 = vld [vmem:[%s3312_s0 + $0x150] sm:$0xff]  ;;  %v2602_v3 = vld [vmem:[%s3312_s0 + $0x148] sm:$0xff]  ;;  %v738_v14 = vshrl.u32 %v2958_v43, 16 }
  0x21   : > { %628 = vmatpush.bf16.msra.mxu2 %v2580_v18  ;;  %v2620_v61 = vld [vmem:[%s3312_s0 + $0x1d8] sm:$0xff]  ;;  %v2611_v0 = vld [vmem:[%s3312_s0 + $0x190] sm:$0xff]  ;;  %v2610_v6 = vld [vmem:[%s3312_s0 + $0x188] sm:$0xff]  ;;  %v735_v13 = vrot.slane %v733_v4, 1  ;;  %v742_v15 = vrot.slane %v740_v5, 1  ;;  %v717_v18 = vshrl.u32 %v2960_v44, 16 }
  0x22   : > { %641 = vmatpush.bf16.msra.mxu3 %v2588_v19  ;;  %v2619_v1 = vld [vmem:[%s3312_s0 + $0x1d0] sm:$0xff]  ;;  %v2618_v7 = vld [vmem:[%s3312_s0 + $0x1c8] sm:$0xff]  ;;  %v2593_v10 = vld [vmem:[%s3312_s0 + $0x100] sm:$0xff]  ;;  %v721_v19 = vrot.slane %v719_v8, 1 }
  0x23   : > { %603 = vmatpush.bf16.msra.mxu0 %v2563_v20  ;;  %v2601_v11 = vld [vmem:[%s3312_s0 + $0x140] sm:$0xff]  ;;  %v724_v20 = vshrl.u32 %v2962_v45, 16  ;;  %v2647_v32 = vld [vmem:[%s3312_s0 + $0x2b0] sm:$0xff]  ;;  %v2646_v36 = vld [vmem:[%s3312_s0 + $0x2a8] sm:$0xff] }
  0x24   : > { %616 = vmatpush.bf16.msra.mxu1 %v2571_v21  ;;  %v2609_v16 = vld [vmem:[%s3312_s0 + $0x180] sm:$0xff]  ;;  %v728_v21 = vrot.slane %v726_v9, 1  ;;  %v722_v28 = vor.u32 %v721_v19, %v717_v18  ;;  %v2655_v33 = vld [vmem:[%s3312_s0 + $0x2f0] sm:$0xff]  ;;  %v2654_v37 = vld [vmem:[%s3312_s0 + $0x2e8] sm:$0xff] }
  0x25   : > { %629 = vmatpush.bf16.msra.mxu2 %v2579_v22  ;;  %v2617_v17 = vld [vmem:[%s3312_s0 + $0x1c0] sm:$0xff]  ;;  %v2632_v22 = vld [vmem:[%s3312_s0 + $0x238] sm:$0xff]  ;;  %v2663_v8 = vld [vmem:[%s3312_s0 + $0x330] sm:$0xff] }
  0x26   : > { %642 = vmatpush.bf16.msra.mxu3 %v2587_v23  ;;  %v2640_v23 = vld [vmem:[%s3312_s0 + $0x278] sm:$0xff]  ;;  %v729_v29 = vor.u32 %v728_v21, %v724_v20  ;;  %v2671_v9 = vld [vmem:[%s3312_s0 + $0x370] sm:$0xff]  ;;  %v2677_v18 = vld [vmem:[%s3312_s0 + $0x3a0] sm:$0xff] }
  0x27   : > { %604 = vmatpush.bf16.msra.mxu0 %v2562_v24  ;;  %v2648_v24 = vld [vmem:[%s3312_s0 + $0x2b8] sm:$0xff]  ;;  %v2685_v19 = vld [vmem:[%s3312_s0 + $0x3e0] sm:$0xff]  ;;  %vm1683_vm3 = vmand %vm1681_vm0, %vm1682_vm1 }
  0x28   : > { %617 = vmatpush.bf16.msra.mxu1 %v2570_v25  ;;  %v2656_v25 = vld [vmem:[%s3312_s0 + $0x2f8] sm:$0xff] }
  0x29   : > { %630 = vmatpush.bf16.msra.mxu2 %v2578_v26  ;;  %v736_v26 = vor.u32 %v735_v13, %v731_v12  ;;  %v2662_v12 = vld [vmem:[%s3312_s0 + $0x328] sm:$0xff]  ;;  %v2660_v20 = vld [vmem:[%s3312_s0 + $0x318] sm:$0xff] }
  0x2a   : > { %643 = vmatpush.bf16.msra.mxu3 %v2586_v27  ;;  %v743_v27 = vor.u32 %v742_v15, %v738_v14  ;;  %v2670_v13 = vld [vmem:[%s3312_s0 + $0x368] sm:$0xff]  ;;  %v2668_v21 = vld [vmem:[%s3312_s0 + $0x358] sm:$0xff] }
  0x2b   : > { %605 = vmatpush.bf16.msra.mxu0 %v2561_v30  ;;  %v2631_v30 = vld [vmem:[%s3312_s0 + $0x230] sm:$0xff]  ;;  %v2678_v14 = vld [vmem:[%s3312_s0 + $0x3a8] sm:$0xff] }
  0x2c   : > { %618 = vmatpush.bf16.msra.mxu1 %v2569_v31  ;;  %v2639_v31 = vld [vmem:[%s3312_s0 + $0x270] sm:$0xff]  ;;  %v2686_v15 = vld [vmem:[%s3312_s0 + $0x3e8] sm:$0xff] }
  0x2d   : > { %631 = vmatpush.bf16.msra.mxu2 %v2577_v34  ;;  %v2630_v34 = vld [vmem:[%s3312_s0 + $0x228] sm:$0xff] }
  0x2e   : > { %644 = vmatpush.bf16.msra.mxu3 %v2585_v35  ;;  %606 = vmatmul.bf16.vlgmr.msra.gmra.mxu0 %v2960_v44  ;;  %v2638_v35 = vld [vmem:[%s3312_s0 + $0x268] sm:$0xff]  ;;  %v2644_v44 = vld [vmem:[%s3312_s0 + $0x298] sm:$0xff] }
  0x2f   : > { %940 = vmatpush.bf16.msrb.mxu0 %v2600_v38  ;;  %619 = vmatmul.bf16.vlgmr.msra.gmra.mxu1 %v2962_v45  ;;  %v2629_v38 = vld [vmem:[%s3312_s0 + $0x220] sm:$0xff]  ;;  %v2652_v45 = vld [vmem:[%s3312_s0 + $0x2d8] sm:$0xff] }
  0x30   : > { %953 = vmatpush.bf16.msrb.mxu1 %v2608_v39  ;;  %632 = vmatmul.bf16.vlgmr.msra.gmra.mxu2 %v2956_v42  ;;  %v2637_v39 = vld [vmem:[%s3312_s0 + $0x260] sm:$0xff]  ;;  %v2628_v42 = vld [vmem:[%s3312_s0 + $0x218] sm:$0xff] }
  0x31   : > { %966 = vmatpush.bf16.msrb.mxu2 %v2616_v40  ;;  %645 = vmatmul.bf16.vlgmr.msra.gmra.mxu3 %v2958_v43  ;;  %v2645_v40 = vld [vmem:[%s3312_s0 + $0x2a0] sm:$0xff]  ;;  %v2636_v43 = vld [vmem:[%s3312_s0 + $0x258] sm:$0xff] }
  0x32   : > { %979 = vmatpush.bf16.msrb.mxu3 %v2624_v41  ;;  %v2653_v41 = vld [vmem:[%s3312_s0 + $0x2e0] sm:$0xff] }
  0x33   : > { %941 = vmatpush.bf16.msrb.mxu0 %v2599_v46  ;;  %v2627_v46 = vld [vmem:[%s3312_s0 + $0x210] sm:$0xff] }
  0x34   : > { %954 = vmatpush.bf16.msrb.mxu1 %v2607_v47  ;;  %v2635_v47 = vld [vmem:[%s3312_s0 + $0x250] sm:$0xff] }
  0x35   : > { %967 = vmatpush.bf16.msrb.mxu2 %v2615_v48  ;;  %v2643_v48 = vld [vmem:[%s3312_s0 + $0x290] sm:$0xff] }
  0x36   : > { %980 = vmatpush.bf16.msrb.mxu3 %v2623_v49  ;;  %v2651_v49 = vld [vmem:[%s3312_s0 + $0x2d0] sm:$0xff] }
  0x37   : > { %942 = vmatpush.bf16.msrb.mxu0 %v2598_v50  ;;  %v2626_v50 = vld [vmem:[%s3312_s0 + $0x208] sm:$0xff] }
  0x38   : > { %955 = vmatpush.bf16.msrb.mxu1 %v2606_v51  ;;  %v2634_v51 = vld [vmem:[%s3312_s0 + $0x248] sm:$0xff] }
  0x39   : > { %968 = vmatpush.bf16.msrb.mxu2 %v2614_v52  ;;  %v2642_v52 = vld [vmem:[%s3312_s0 + $0x288] sm:$0xff] }
  0x3a   : > { %981 = vmatpush.bf16.msrb.mxu3 %v2622_v53  ;;  %v2650_v53 = vld [vmem:[%s3312_s0 + $0x2c8] sm:$0xff] }
  0x3b   : > { %943 = vmatpush.bf16.msrb.mxu0 %v2597_v54  ;;  %v994_v54 = vld [vmem:[%s303_s26 + $0x8] sm:$0x77] }
  0x3c   : > { %956 = vmatpush.bf16.msrb.mxu1 %v2605_v55  ;;  %v993_v55 = vld [vmem:[%s303_s26] sm:$0x77] }
  0x3d   : > { %969 = vmatpush.bf16.msrb.mxu2 %v2613_v56  ;;  %v2625_v56 = vld [vmem:[%s3312_s0 + $0x200] sm:$0xff] }
  0x3e   : > { %982 = vmatpush.bf16.msrb.mxu3 %v2621_v57  ;;  %v2633_v57 = vld [vmem:[%s3312_s0 + $0x240] sm:$0xff] }
  0x3f   : > { %944 = vmatpush.bf16.msrb.mxu0 %v2596_v58  ;;  %v1064_v58 = vunpack.c.l.b16 %v994_v54 }
  0x40   : > { %957 = vmatpush.bf16.msrb.mxu1 %v2604_v59  ;;  %v1065_v59 = vunpack.c.h.b16 %v994_v54 }
  0x41   : > { %970 = vmatpush.bf16.msrb.mxu2 %v2612_v60  ;;  %v2641_v60 = vld [vmem:[%s3312_s0 + $0x280] sm:$0xff]  ;;  %v3174_v4 = vpack.c.b16 %v1064_v58, %v1064_v58 }
  0x42   : > { %983 = vmatpush.bf16.msrb.mxu3 %v2620_v61  ;;  %v2649_v61 = vld [vmem:[%s3312_s0 + $0x2c0] sm:$0xff]  ;;  %v3176_v5 = vpack.c.b16 %v1065_v59, %v1065_v59 }
  0x43   : > { %945 = vmatpush.bf16.msrb.mxu0 %v2595_v62  ;;  %v1062_v62 = vunpack.c.l.b16 %v993_v55 }
  0x44   : > { %958 = vmatpush.bf16.msrb.mxu1 %v2603_v63  ;;  %v1063_v63 = vunpack.c.h.b16 %v993_v55 }
  0x45   : > { %971 = vmatpush.bf16.msrb.mxu2 %v2611_v0  ;;  %v2664_v0 = vld [vmem:[%s3312_s0 + $0x338] sm:$0xff] }
  0x46   : > { %984 = vmatpush.bf16.msrb.mxu3 %v2619_v1  ;;  %v2672_v1 = vld [vmem:[%s3312_s0 + $0x378] sm:$0xff] }
  0x47   : > { %946 = vmatpush.bf16.msrb.mxu0 %v2594_v2  ;;  %v2680_v2 = vld [vmem:[%s3312_s0 + $0x3b8] sm:$0xff] }
  0x48   : > { %959 = vmatpush.bf16.msrb.mxu1 %v2602_v3  ;;  %v2688_v3 = vld [vmem:[%s3312_s0 + $0x3f8] sm:$0xff] }
  0x49   : > { %972 = vmatpush.bf16.msrb.mxu2 %v2610_v6  ;;  %v3178_v6 = vpack.c.b16 %v1062_v62, %v1062_v62 }
  0x4a   : > { %985 = vmatpush.bf16.msrb.mxu3 %v2618_v7  ;;  %v3180_v7 = vpack.c.b16 %v1063_v63, %v1063_v63 }
  0x4b   : > { %947 = vmatpush.bf16.msrb.mxu0 %v2593_v10  ;;  %v2679_v10 = vld [vmem:[%s3312_s0 + $0x3b0] sm:$0xff] }
  0x4c   : > { %960 = vmatpush.bf16.msrb.mxu1 %v2601_v11  ;;  %v2687_v11 = vld [vmem:[%s3312_s0 + $0x3f0] sm:$0xff] }
  0x4d   : > { %973 = vmatpush.bf16.msrb.mxu2 %v2609_v16  ;;  %v2661_v16 = vld [vmem:[%s3312_s0 + $0x320] sm:$0xff] }
  0x4e   : > { %986 = vmatpush.bf16.msrb.mxu3 %v2617_v17  ;;  %948 = vmatmul.bf16.vlgmr.msrb.gmra.mxu0 %v722_v28  ;;  %v2669_v17 = vld [vmem:[%s3312_s0 + $0x360] sm:$0xff]  ;;  %v1387_v28 = vshll.u32 %v3178_v6, 16 }
  0x4f   : > { %1266 = vmatpush.bf16.msra.mxu0 %v2632_v22  ;;  %961 = vmatmul.bf16.vlgmr.msrb.gmra.mxu1 %v729_v29  ;;  %v2676_v22 = vld [vmem:[%s3312_s0 + $0x398] sm:$0xff]  ;;  %v1394_v29 = vshll.u32 %v3180_v7, 16 }
  0x50   : > { %1279 = vmatpush.bf16.msra.mxu1 %v2640_v23  ;;  %974 = vmatmul.bf16.vlgmr.msrb.gmra.mxu2 %v736_v26  ;;  %v2684_v23 = vld [vmem:[%s3312_s0 + $0x3d8] sm:$0xff]  ;;  %v2675_v26 = vld [vmem:[%s3312_s0 + $0x390] sm:$0xff] }
  0x51   : > { %1292 = vmatpush.bf16.msra.mxu2 %v2648_v24  ;;  %987 = vmatmul.bf16.vlgmr.msrb.gmra.mxu3 %v743_v27  ;;  %v2659_v24 = vld [vmem:[%s3312_s0 + $0x310] sm:$0xff] }
  0x52   : > { %1305 = vmatpush.bf16.msra.mxu3 %v2656_v25  ;;  %v2667_v25 = vld [vmem:[%s3312_s0 + $0x350] sm:$0xff] }
  0x53   : > { %1267 = vmatpush.bf16.msra.mxu0 %v2631_v30  ;;  %v2683_v27 = vld [vmem:[%s3312_s0 + $0x3d0] sm:$0xff]  ;;  %v2658_v30 = vld [vmem:[%s3312_s0 + $0x308] sm:$0xff] }
  0x54   : > { %1280 = vmatpush.bf16.msra.mxu1 %v2639_v31  ;;  %v2666_v31 = vld [vmem:[%s3312_s0 + $0x348] sm:$0xff] }
  0x55   : > { %1293 = vmatpush.bf16.msra.mxu2 %v2647_v32  ;;  %v1401_v32 = vshll.u32 %v3174_v4, 16 }
  0x56   : > { %1306 = vmatpush.bf16.msra.mxu3 %v2655_v33  ;;  %v1408_v33 = vshll.u32 %v3176_v5, 16 }
  0x57   : > { %1268 = vmatpush.bf16.msra.mxu0 %v2630_v34  ;;  %v2674_v34 = vld [vmem:[%s3312_s0 + $0x388] sm:$0xff] }
  0x58   : > { %1281 = vmatpush.bf16.msra.mxu1 %v2638_v35  ;;  %v2682_v35 = vld [vmem:[%s3312_s0 + $0x3c8] sm:$0xff] }
  0x59   : > { %1294 = vmatpush.bf16.msra.mxu2 %v2646_v36  ;;  %v1385_v36 = vshrl.u32 %v3178_v6, 16 }
  0x5a   : > { %1307 = vmatpush.bf16.msra.mxu3 %v2654_v37  ;;  %v1389_v37 = vrot.slane %v1387_v28, 1 }
  0x5b   : > { %1269 = vmatpush.bf16.msra.mxu0 %v2629_v38  ;;  %v1392_v38 = vshrl.u32 %v3180_v7, 16 }
  0x5c   : > { %1282 = vmatpush.bf16.msra.mxu1 %v2637_v39  ;;  %v1396_v39 = vrot.slane %v1394_v29, 1 }
  0x5d   : > { %1295 = vmatpush.bf16.msra.mxu2 %v2645_v40  ;;  %v2657_v40 = vld [vmem:[%s3312_s0 + $0x300] sm:$0xff] }
  0x5e   : > { %1308 = vmatpush.bf16.msra.mxu3 %v2653_v41  ;;  %v2665_v41 = vld [vmem:[%s3312_s0 + $0x340] sm:$0xff] }
  0x5f   : > { %1270 = vmatpush.bf16.msra.mxu0 %v2628_v42  ;;  %v1399_v42 = vshrl.u32 %v3174_v4, 16 }
  0x60   : > { %1283 = vmatpush.bf16.msra.mxu1 %v2636_v43  ;;  %v1403_v43 = vrot.slane %v1401_v32, 1 }
  0x61   : > { %1296 = vmatpush.bf16.msra.mxu2 %v2644_v44  ;;  %v1406_v44 = vshrl.u32 %v3176_v5, 16 }
  0x62   : > { %1309 = vmatpush.bf16.msra.mxu3 %v2652_v45  ;;  %v1410_v45 = vrot.slane %v1408_v33, 1 }
  0x63   : > { %1271 = vmatpush.bf16.msra.mxu0 %v2627_v46  ;;  %v2673_v46 = vld [vmem:[%s3312_s0 + $0x380] sm:$0xff] }
  0x64   : > { %1284 = vmatpush.bf16.msra.mxu1 %v2635_v47  ;;  %v2681_v47 = vld [vmem:[%s3312_s0 + $0x3c0] sm:$0xff] }
  0x65   : > { %1297 = vmatpush.bf16.msra.mxu2 %v2643_v48  ;;  %v1390_v48 = vor.u32 %v1389_v37, %v1385_v36 }
  0x66   : > { %1310 = vmatpush.bf16.msra.mxu3 %v2651_v49  ;;  %v1397_v49 = vor.u32 %v1396_v39, %v1392_v38 }
  0x67   : > { %1272 = vmatpush.bf16.msra.mxu0 %v2626_v50  ;;  %v1404_v50 = vor.u32 %v1403_v43, %v1399_v42 }
  0x68   : > { %1285 = vmatpush.bf16.msra.mxu1 %v2634_v51  ;;  %v1411_v51 = vor.u32 %v1410_v45, %v1406_v44 }
  0x69   : > { %1298 = vmatpush.bf16.msra.mxu2 %v2642_v52 }
  0x6a   : > { %1311 = vmatpush.bf16.msra.mxu3 %v2650_v53 }
  0x6b   : > { %1273 = vmatpush.bf16.msra.mxu0 %v2625_v56 }
  0x6c   : > { %1286 = vmatpush.bf16.msra.mxu1 %v2633_v57 }
  0x6d   : > { %1299 = vmatpush.bf16.msra.mxu2 %v2641_v60 }
  0x6e   : > { %1312 = vmatpush.bf16.msra.mxu3 %v2649_v61  ;;  %1274 = vmatmul.bf16.vlgmr.msra.gmra.mxu0 %v3178_v6 }
  0x6f   : > { %1608 = vmatpush.bf16.msrb.mxu0 %v2664_v0  ;;  %1287 = vmatmul.bf16.vlgmr.msra.gmra.mxu1 %v3180_v7 }
  0x70   : > { %1621 = vmatpush.bf16.msrb.mxu1 %v2672_v1  ;;  %1300 = vmatmul.bf16.vlgmr.msra.gmra.mxu2 %v3174_v4 }
  0x71   : > { %1634 = vmatpush.bf16.msrb.mxu2 %v2680_v2  ;;  %1313 = vmatmul.bf16.vlgmr.msra.gmra.mxu3 %v3176_v5 }
  0x72   : > { %1647 = vmatpush.bf16.msrb.mxu3 %v2688_v3 }
  0x73   : > { %1609 = vmatpush.bf16.msrb.mxu0 %v2663_v8 }
  0x74   : > { %1622 = vmatpush.bf16.msrb.mxu1 %v2671_v9 }
  0x75   : > { %1635 = vmatpush.bf16.msrb.mxu2 %v2679_v10 }
  0x76   : > { %1648 = vmatpush.bf16.msrb.mxu3 %v2687_v11 }
  0x77   : > { %1610 = vmatpush.bf16.msrb.mxu0 %v2662_v12 }
  0x78   : > { %1623 = vmatpush.bf16.msrb.mxu1 %v2670_v13 }
  0x79   : > { %1636 = vmatpush.bf16.msrb.mxu2 %v2678_v14 }
  0x7a   : > { %1649 = vmatpush.bf16.msrb.mxu3 %v2686_v15 }
  0x7b   : > { %1611 = vmatpush.bf16.msrb.mxu0 %v2661_v16 }
  0x7c   : > { %1624 = vmatpush.bf16.msrb.mxu1 %v2669_v17  ;;  %v2731_v17 = vld [vmem:[%s3313_s1] ss:$0 sm:$0xff] }
  0x7d   : > { %1637 = vmatpush.bf16.msrb.mxu2 %v2677_v18 }
  0x7e   : > { %1650 = vmatpush.bf16.msrb.mxu3 %v2685_v19 }
  0x7f   : > { %1612 = vmatpush.bf16.msrb.mxu0 %v2660_v20 }
  0x80   : > { %1625 = vmatpush.bf16.msrb.mxu1 %v2668_v21 }
  0x81   : > { %1638 = vmatpush.bf16.msrb.mxu2 %v2676_v22 }
  0x82   : > { %1651 = vmatpush.bf16.msrb.mxu3 %v2684_v23 }
  0x83   : > { %1613 = vmatpush.bf16.msrb.mxu0 %v2659_v24 }
  0x84   : > { %1626 = vmatpush.bf16.msrb.mxu1 %v2667_v25 }
  0x85   : > { %1639 = vmatpush.bf16.msrb.mxu2 %v2675_v26 }
  0x86   : > { %1652 = vmatpush.bf16.msrb.mxu3 %v2683_v27 }
  0x87   : > { %1614 = vmatpush.bf16.msrb.mxu0 %v2658_v30 }
  0x88   : > { %1627 = vmatpush.bf16.msrb.mxu1 %v2666_v31 }
  0x89   : > { %1640 = vmatpush.bf16.msrb.mxu2 %v2674_v34 }
  0x8a   : > { %1653 = vmatpush.bf16.msrb.mxu3 %v2682_v35  ;;  %v1684_v35 = vld [vmem:[%s312_s18] sm:$0x3] }
  0x8b   : > { %1615 = vmatpush.bf16.msrb.mxu0 %v2657_v40 }
  0x8c   : > { %1628 = vmatpush.bf16.msrb.mxu1 %v2665_v41 }
  0x8d   : > { %1641 = vmatpush.bf16.msrb.mxu2 %v2673_v46 }
  0x8e   : > { %1654 = vmatpush.bf16.msrb.mxu3 %v2681_v47  ;;  %1616 = vmatmul.bf16.vlgmr.msrb.gmra.mxu0 %v1390_v48 }
  0x8f   : > { %1629 = vmatmul.bf16.vlgmr.msrb.gmra.mxu1 %v1397_v49 }
  0x90   : > { %1642 = vmatmul.bf16.vlgmr.msrb.gmra.mxu2 %v1404_v50 }
  0x91   : > { %1655 = vmatmul.bf16.vlgmr.msrb.gmra.mxu3 %v1411_v51 }
  0xab   : > { %v607_v52 = vpop.f32.mrf.mxu0 }
  0xac   : > { %v620_v53 = vpop.f32.mrf.mxu1 }
  0xad   : > { %v621_v54 = vadd.f32 %v620_v53, %v607_v52 }
  0xb3   : > { %v633_v55 = vpop.f32.mrf.mxu2  ;;  %v609_v59 = vpop.f32.mrf.mxu0 }
  0xb4   : > { %v646_v56 = vpop.f32.mrf.mxu3  ;;  %v634_v57 = vadd.f32 %v633_v55, %v621_v54  ;;  %v622_v60 = vpop.f32.mrf.mxu1 }
  0xb6   : > { %v647_v58 = vadd.f32 %v646_v56, %v634_v57 }
  0xb8   : > { %v650_v22 = vadd.f32 %v2731_v17, %v647_v58 }
  0xbb   : > { %v635_v61 = vpop.f32.mrf.mxu2 }
  0xbc   : > { %v648_v62 = vpop.f32.mrf.mxu3 }
  0xcb   : > { %v949_v63 = vpop.f32.mrf.mxu0 }
  0xcc   : > { %v962_v0 = vpop.f32.mrf.mxu1 }
  0xcd   : > { %v963_v15 = vadd.f32 %v962_v0, %v949_v63 }
  0xd3   : > { %v975_v1 = vpop.f32.mrf.mxu2  ;;  %v951_v3 = vpop.f32.mrf.mxu0 }
  0xd4   : > { %v988_v2 = vpop.f32.mrf.mxu3  ;;  %v964_v4 = vpop.f32.mrf.mxu1  ;;  %v976_v18 = vadd.f32 %v975_v1, %v963_v15 }
  0xd6   : > { %v989_v23 = vadd.f32 %v988_v2, %v976_v18 }
  0xd8   : > { %v992_v28 = vadd.f32 %v989_v23, %v650_v22 }
  0xdb   : > { %v977_v5 = vpop.f32.mrf.mxu2 }
  0xdc   : > { %v990_v6 = vpop.f32.mrf.mxu3 }
  0xeb   : > { %v1275_v7 = vpop.f32.mrf.mxu0 }
  0xec   : > { %v1288_v8 = vpop.f32.mrf.mxu1 }
  0xed   : > { %v1289_v16 = vadd.f32 %v1288_v8, %v1275_v7 }
  0xf3   : > { %v1301_v9 = vpop.f32.mrf.mxu2  ;;  %v1277_v11 = vpop.f32.mrf.mxu0 }
  0xf4   : > { %v1314_v10 = vpop.f32.mrf.mxu3  ;;  %v1290_v12 = vpop.f32.mrf.mxu1  ;;  %v1302_v21 = vadd.f32 %v1301_v9, %v1289_v16 }
  0xf6   : > { %v1315_v25 = vadd.f32 %v1314_v10, %v1302_v21 }
  0xf8   : > { %v1318_v32 = vadd.f32 %v1315_v25, %v992_v28 }
  0xfb   : > { %v1303_v13 = vpop.f32.mrf.mxu2 }
  0xfc   : > { %v1316_v14 = vpop.f32.mrf.mxu3 }
 0x10b   : > { %v1617_v19 = vpop.f32.mrf.mxu0 }
 0x10c   : > { %v1630_v20 = vpop.f32.mrf.mxu1 }
 0x10d   : > { %v1631_v24 = vadd.f32 %v1630_v20, %v1617_v19 }
 0x113   : > { %v1643_v26 = vpop.f32.mrf.mxu2  ;;  %v1619_v30 = vpop.f32.mrf.mxu0 }
 0x114   : > { %v1656_v27 = vpop.f32.mrf.mxu3  ;;  %v1644_v29 = vadd.f32 %v1643_v26, %v1631_v24  ;;  %v1632_v31 = vpop.f32.mrf.mxu1 }
 0x116   : > { %v1657_v33 = vadd.f32 %v1656_v27, %v1644_v29 }
 0x118   : > { %v1660_v34 = vadd.f32 %v1657_v33, %v1318_v32 }
 0x11a   : > { %v1662_v36 = vsel %vm1661_vm2, %v1660_v34, 0.0  ;;  %v1669_v37 = vmul.f32 %v1660_v34, %v1660_v34  ;;  %v1680_v38 = vpack.c.bf16 %v1660_v34, %v1660_v34 }
 0x11b   : > { %v1663_v39 = vrot.slane %v1662_v36, 4  ;;  %v1645_v40 = vpop.f32.mrf.mxu2 }
 0x11c   : > { %v1658_v41 = vpop.f32.mrf.mxu3  ;;  %v1670_v42 = vsel %vm1661_vm2, %v1669_v37, 0.0  ;;  %v1685_v43 = vsel %vm1683_vm3, %v1680_v38, %v1684_v35 }
 0x11d   : > { %v1664_v44 = vadd.f32 %v1663_v39, %v1662_v36  ;;  %v1671_v45 = vrot.slane %v1670_v42, 4  ;;  %1686 = vst [vmem:[%s312_s18] sm:$0x3] %v1685_v43 }
 0x11f   : > { %v1665_v46 = vrot.slane %v1664_v44, 2  ;;  %v1672_v47 = vadd.f32 %v1671_v45, %v1670_v42 }
 0x121   : > { %v1666_v48 = vadd.f32 %v1665_v46, %v1664_v44  ;;  %v1673_v49 = vrot.slane %v1672_v47, 2 }
 0x123   : > { %v1667_v50 = vrot.slane %v1666_v48, 1  ;;  %v1674_v51 = vadd.f32 %v1673_v49, %v1672_v47 }
 0x125   : > { %v1675_v52 = vrot.slane %v1674_v51, 1  ;;  %v1668_v53 = vadd.f32 %v1667_v50, %v1666_v48 }
 0x127   : > { %v1676_v54 = vadd.f32 %v1675_v52, %v1674_v51 }
 0x129   : > { %v1678_v55 = vsel %vm1677_vm4, %v1668_v53, %v1676_v54 }
 0x12a   : > { %1679 = vst [vmem:[%s320_s25] sm:$0x3] %v1678_v55 }
 0x12b PF: > { %s16_s22 = sadd.s32 1, %s2770_s22   ;;  %s3318_s18 = smov %s2762_s20 }
 0x12c   : > { %p13_p9 = scmp.ge.s32.totalorder %s16_s22, 8   ;;  %s3319_s19 = smov %s2766_s21 }
 0x12d   : > { %s3320_s20 = smov %s3323_s23  ;;  %s3321_s21 = smov %s3327_s24 }
 0x12e   :  { %15 = sbr.rel (!%p13_p9) target bundleno = 3 (0x3), region = 84 }

// kernel: _lambda_.13
= control target key start
LH: loop header
LB: loop body
LE: loop exit
PB: predicated region body
PF: predicated region fallthrough
CT: control target
= control target key end

     0   :  { %s3010_s24 = smov 0   ;;  %s3012_s25 = smov 0   ;;  %s3498_s0 = inlined_call_operand.vmem [shape: bf16[16,128,128], index: 0, kind: input, shape index: {}]   ;;  %s3499_s1 = inlined_call_operand.vmem [shape: f32[1,128], index: 1, kind: input, shape index: {}]   ;;  %s3500_s2 = inlined_call_operand.vmem [shape: bf16[2,7,7,128], index: 2, kind: input, shape index: {}, may-alias: {2,3,4,5}]   ;;  %s3501_s3 = inlined_call_operand.vmem [shape: bf16[2,7,7,128], index: 3, kind: input, shape index: {}, may-alias: {2,3,4,5}]   ;;  %s3502_s4 = inlined_call_operand.vmem [shape: bf16[2,7,7,128], index: 4, kind: input, shape index: {}, may-alias: {2,3,4,5}]   ;;  %s3503_s5 = inlined_call_operand.vmem [shape: bf16[2,7,7,128], index: 5, kind: input, shape index: {}, may-alias: {2,3,4,5}]   ;;  %s3504_s6 = inlined_call_operand.vmem [shape: bf16[2,4,4,128], index: 6, kind: output, shape index: {0}]   ;;  %s3505_s7 = inlined_call_operand.vmem [shape: f32[2,4,2,128], index: 7, kind: output, shape index: {1}]  }
   0x1   :  { %s3014_s26 = smov 0   ;;  %s3016_s27 = smov 0  }
   0x2   :  { %s3018_s28 = smov 0  }
   0x3 LB: > { %s27_s29 = sadd.s32 1, %s2960_s26  ;;  %s30_s30 = sadd.s32 1, %s2964_s27  ;;  %s2968_s28 = sphi %s3018_s28, %s18_s28   ;;  %s2964_s27 = sphi %s3016_s27, %s3511_s27   ;;  %s2960_s26 = sphi %s3014_s26, %s3510_s26   ;;  %s2956_s25 = sphi %s3012_s25, %s3509_s25   ;;  %s2952_s24 = sphi %s3010_s24, %s3508_s24  }
   0x4   : > { %p28_p0 = scmp.ge.s32.totalorder %s27_s29, 4  ;;  %p1997_p1 = scmp.ge.s32.totalorder %s2968_s28, 1 }
   0x5   : > { %p318_p2 = scmp.lt.s32.totalorder %s2968_s28, 9 }
   0x6   : > { %s3513_s29 = smov (%p28_p0, %s27_s29), 0  ;;  %s3515_s30 = smov (!%p28_p0, %s30_s30), %s2964_s27 }
   0x7   : > { %p319_p3 = pnand %p1997_p1, %p318_p2  ;;  %p32_p4 = scmp.ge.s32.totalorder %s3515_s30, 2 }
   0x8   : > { %p391_p5 = scmp.lt.s32.totalorder (!%p319_p3), %s2956_s25, 1  ;;  %p393_p6 = scmp.lt.s32.totalorder (!%p319_p3), %s2952_s24, 6 }
   0x9   : > { %s3517_s30 = smov (%p32_p4, %s3515_s30), 0  ;;  %322 = sbr.rel (%p319_p3) target bundleno = 297 (0x129), region = 44 }
   0xa   : > { %s399_s22 = sadd.s32 (!%p319_p3), 1, %s2952_s24  ;;  %s409_s12 = sadd.s32 (!%p319_p3), 2, %s2952_s24 }
   0xb   : > { %p3138_p7 = scmp.lt.s32.totalorder (!%p319_p3), %s399_s22, 6  ;;  %p3248_p8 = scmp.lt.s32.totalorder (!%p319_p3), %s409_s12, 6 }
   0xc   : > { %p431_p10 = scmp.lt.s32.totalorder (!%p319_p3), %s2952_s24, 3 }
   0xe   : > { %v2767_v0 = vld [vmem:[%s3498_s0 + $0x38] sm:$0xff]  ;;  %v2766_v4 = vld [vmem:[%s3498_s0 + $0x30] sm:$0xff]  ;;  %s3519_s25 = smov (!%p391_p5, %s2956_s25), 1  ;;  %v2765_v8 = vld [vmem:[%s3498_s0 + $0x28] sm:$0xff]  ;;  %s3521_s22 = smov (!%p3138_p7, %s399_s22), 6  ;;  %vm1785_vm0 = vcmask 1043456  }
   0xf   : > { %v2775_v1 = vld [vmem:[%s3498_s0 + $0x78] sm:$0xff]  ;;  %515 = vmatpush.bf16.msra.mxu0 %v2767_v0  ;;  %v2774_v5 = vld [vmem:[%s3498_s0 + $0x70] sm:$0xff]  ;;  %s394_s8 = scalar_select %p393_p6, %s2952_s24, 6  ;;  %v2773_v9 = vld [vmem:[%s3498_s0 + $0x68] sm:$0xff]  ;;  %vm1801_vm1 = vcmask 1040384  }
  0x10   : > { %v2783_v2 = vld [vmem:[%s3498_s0 + $0xb8] sm:$0xff]  ;;  %605 = vmatpush.bf16.msra.mxu1 %v2775_v1  ;;  %v2782_v6 = vld [vmem:[%s3498_s0 + $0xb0] sm:$0xff]  ;;  %s3071_s9 = smul.u32 7, %s3519_s25  ;;  %v2781_v10 = vld [vmem:[%s3498_s0 + $0xa8] sm:$0xff]  ;;  %s3523_s12 = smov (!%p3248_p8, %s409_s12), 6 }
  0x11   : > { %v2791_v3 = vld [vmem:[%s3498_s0 + $0xf8] sm:$0xff]  ;;  %686 = vmatpush.bf16.msra.mxu2 %v2783_v2  ;;  %v2790_v7 = vld [vmem:[%s3498_s0 + $0xf0] sm:$0xff]  ;;  %v2789_v11 = vld [vmem:[%s3498_s0 + $0xe8] sm:$0xff] }
  0x12   : > { %769 = vmatpush.bf16.msra.mxu3 %v2791_v3  ;;  %s396_s18 = sadd.s32 %s3071_s9, %s394_s8  ;;  %v2764_v12 = vld [vmem:[%s3498_s0 + $0x20] sm:$0xff]  ;;  %v2763_v16 = vld [vmem:[%s3498_s0 + $0x18] sm:$0xff]  ;;  %v2762_v21 = vld [vmem:[%s3498_s0 + $0x10] sm:$0xff]  ;;  %s405_s23 = sadd.s32 %s3071_s9, %s3521_s22 }
  0x13   : > { %516 = vmatpush.bf16.msra.mxu0 %v2766_v4  ;;  %v2772_v13 = vld [vmem:[%s3498_s0 + $0x60] sm:$0xff]  ;;  %s1998_s8 = sshll.u32 %s396_s18, 2  ;;  %v2771_v17 = vld [vmem:[%s3498_s0 + $0x58] sm:$0xff]  ;;  %v2770_v22 = vld [vmem:[%s3498_s0 + $0x50] sm:$0xff]  ;;  %s1999_s14 = sshll.u32 %s405_s23, 2 }
  0x14   : > { %606 = vmatpush.bf16.msra.mxu1 %v2774_v5  ;;  %v2780_v14 = vld [vmem:[%s3498_s0 + $0xa0] sm:$0xff]  ;;  %s398_s20 = scalar_lea.vmem %s3500_s2, %s1998_s8  ;;  %v2779_v18 = vld [vmem:[%s3498_s0 + $0x98] sm:$0xff]  ;;  %v2778_v24 = vld [vmem:[%s3498_s0 + $0x90] sm:$0xff]  ;;  %s415_s18 = sadd.s32 %s3071_s9, %s3523_s12 }
  0x15   : > { %687 = vmatpush.bf16.msra.mxu2 %v2782_v6  ;;  %v2788_v15 = vld [vmem:[%s3498_s0 + $0xe0] sm:$0xff]  ;;  %v2787_v19 = vld [vmem:[%s3498_s0 + $0xd8] sm:$0xff]  ;;  %v2786_v25 = vld [vmem:[%s3498_s0 + $0xd0] sm:$0xff]  ;;  %s2000_s13 = sshll.u32 %s415_s18, 2  ;;  %s419_s12 = sadd.s32 3, %s2952_s24 }
  0x16   : > { %770 = vmatpush.bf16.msra.mxu3 %v2790_v7  ;;  %v450_v20 = vld [vmem:[%s398_s20] sm:$0xf]  ;;  %v2761_v27 = vld [vmem:[%s3498_s0 + $0x8] sm:$0xff]  ;;  %v2799_v40 = vld [vmem:[%s3498_s0 + $0x138] sm:$0xff]  ;;  %s407_s20 = scalar_lea.vmem %s3501_s3, %s1999_s14  ;;  %s417_s17 = scalar_lea.vmem %s3502_s4, %s2000_s13 }
  0x17   : > { %517 = vmatpush.bf16.msra.mxu0 %v2765_v8  ;;  %v547_v23 = vunpack.c.l.b16 %v450_v20  ;;  %v2769_v28 = vld [vmem:[%s3498_s0 + $0x48] sm:$0xff]  ;;  %v2760_v33 = vld [vmem:[%s3498_s0] sm:$0xff]  ;;  %v2807_v41 = vld [vmem:[%s3498_s0 + $0x178] sm:$0xff]  ;;  %p422_p9 = scmp.lt.s32.totalorder %s419_s12, 6  ;;  %s3527_s24 = smov (!%p431_p10, %s2952_s24), 3 }
  0x18   : > { %607 = vmatpush.bf16.msra.mxu1 %v2773_v9  ;;  %v2777_v29 = vld [vmem:[%s3498_s0 + $0x88] sm:$0xff]  ;;  %v2768_v34 = vld [vmem:[%s3498_s0 + $0x40] sm:$0xff]  ;;  %v2815_v42 = vld [vmem:[%s3498_s0 + $0x1b8] sm:$0xff]  ;;  %s2002_s23 = sshll.u32 %s3519_s25, 2 }
  0x19   : > { %688 = vmatpush.bf16.msra.mxu2 %v2781_v10  ;;  %v548_v26 = vpack.c.b16 %v547_v23, %v547_v23  ;;  %v2785_v30 = vld [vmem:[%s3498_s0 + $0xc8] sm:$0xff]  ;;  %v2776_v35 = vld [vmem:[%s3498_s0 + $0x80] sm:$0xff]  ;;  %v2823_v43 = vld [vmem:[%s3498_s0 + $0x1f8] sm:$0xff]  ;;  %s3525_s12 = smov (!%p422_p9, %s419_s12), 6  ;;  %s3474_s8 = sadd.s32 %s2002_s23, %s3527_s24 }
  0x1a   : > { %771 = vmatpush.bf16.msra.mxu3 %v2789_v11  ;;  %v2784_v36 = vld [vmem:[%s3498_s0 + $0xc0] sm:$0xff]  ;;  %v2798_v47 = vld [vmem:[%s3498_s0 + $0x130] sm:$0xff]  ;;  %v2797_v51 = vld [vmem:[%s3498_s0 + $0x128] sm:$0xff]  ;;  %s425_s11 = sadd.s32 %s3071_s9, %s3525_s12 }
  0x1b   : > { %518 = vmatpush.bf16.msra.mxu0 %v2764_v12  ;;  %v550_v31 = vshrl.u32 %v548_v26, 16  ;;  %v552_v32 = vshll.u32 %v548_v26, 16  ;;  %v636_v44 = vrot.slane %v548_v26, 1  ;;  %v2806_v48 = vld [vmem:[%s3498_s0 + $0x170] sm:$0xff]  ;;  %v2805_v52 = vld [vmem:[%s3498_s0 + $0x168] sm:$0xff]  ;;  %v2796_v55 = vld [vmem:[%s3498_s0 + $0x120] sm:$0xff] }
  0x1c   : > { %608 = vmatpush.bf16.msra.mxu1 %v2772_v13  ;;  %v2814_v49 = vld [vmem:[%s3498_s0 + $0x1b0] sm:$0xff]  ;;  %v2813_v53 = vld [vmem:[%s3498_s0 + $0x1a8] sm:$0xff]  ;;  %v2804_v56 = vld [vmem:[%s3498_s0 + $0x160] sm:$0xff]  ;;  %s2001_s9 = sshll.u32 %s425_s11, 2  ;;  %s2003_s11 = sshll.u32 %s3474_s8, 1 }
  0x1d   : > { %689 = vmatpush.bf16.msra.mxu2 %v2780_v14  ;;  %v717_v37 = vrot.slane %v550_v31, 1  ;;  %v718_v38 = vrot.slane %v552_v32, 2  ;;  %v554_v39 = vrot.slane %v552_v32, 1  ;;  %v2822_v50 = vld [vmem:[%s3498_s0 + $0x1f0] sm:$0xff]  ;;  %v2821_v54 = vld [vmem:[%s3498_s0 + $0x1e8] sm:$0xff]  ;;  %v2812_v57 = vld [vmem:[%s3498_s0 + $0x1a0] sm:$0xff]  ;;  %s427_s14 = scalar_lea.vmem %s3503_s5, %s2001_s9  ;;  %s444_s16 = scalar_lea.vmem %s3505_s7, %s2003_s11 }
  0x1e   : > { %772 = vmatpush.bf16.msra.mxu3 %v2788_v15  ;;  %v2820_v58 = vld [vmem:[%s3498_s0 + $0x1e0] sm:$0xff]  ;;  %v2795_v60 = vld [vmem:[%s3498_s0 + $0x118] sm:$0xff]  ;;  %v2794_v1 = vld [vmem:[%s3498_s0 + $0x110] sm:$0xff] }
  0x1f   : > { %519 = vmatpush.bf16.msra.mxu0 %v2763_v16  ;;  %v719_v45 = vor.u32 %v718_v38, %v717_v37  ;;  %v555_v46 = vor.u32 %v554_v39, %v550_v31  ;;  %v3208_v59 = vld [vmem:[%s407_s20] sm:$0xf]  ;;  %v2803_v61 = vld [vmem:[%s3498_s0 + $0x158] sm:$0xff]  ;;  %v2802_v2 = vld [vmem:[%s3498_s0 + $0x150] sm:$0xff] }
  0x20   : > { %609 = vmatpush.bf16.msra.mxu1 %v2771_v17  ;;  %v2811_v62 = vld [vmem:[%s3498_s0 + $0x198] sm:$0xff]  ;;  %v881_v0 = vunpack.c.l.b16 %v3208_v59  ;;  %v2810_v3 = vld [vmem:[%s3498_s0 + $0x190] sm:$0xff]  ;;  %v2793_v6 = vld [vmem:[%s3498_s0 + $0x108] sm:$0xff] }
  0x21   : > { %690 = vmatpush.bf16.msra.mxu2 %v2779_v18  ;;  %v2819_v63 = vld [vmem:[%s3498_s0 + $0x1d8] sm:$0xff]  ;;  %v2818_v4 = vld [vmem:[%s3498_s0 + $0x1d0] sm:$0xff]  ;;  %v2801_v7 = vld [vmem:[%s3498_s0 + $0x148] sm:$0xff] }
  0x22   : > { %773 = vmatpush.bf16.msra.mxu3 %v2787_v19  ;;  %v882_v5 = vpack.c.b16 %v881_v0, %v881_v0  ;;  %v2809_v8 = vld [vmem:[%s3498_s0 + $0x188] sm:$0xff]  ;;  %v2792_v12 = vld [vmem:[%s3498_s0 + $0x100] sm:$0xff]  ;;  %v2831_v19 = vld [vmem:[%s3498_s0 + $0x238] sm:$0xff] }
  0x23   : > { %520 = vmatpush.bf16.msra.mxu0 %v2762_v21  ;;  %v2817_v9 = vld [vmem:[%s3498_s0 + $0x1c8] sm:$0xff]  ;;  %v2800_v13 = vld [vmem:[%s3498_s0 + $0x140] sm:$0xff]  ;;  %v2847_v21 = vld [vmem:[%s3498_s0 + $0x2b8] sm:$0xff] }
  0x24   : > { %610 = vmatpush.bf16.msra.mxu1 %v2770_v22  ;;  %v884_v10 = vshrl.u32 %v882_v5, 16  ;;  %v886_v11 = vshll.u32 %v882_v5, 16  ;;  %v2808_v14 = vld [vmem:[%s3498_s0 + $0x180] sm:$0xff]  ;;  %v2855_v22 = vld [vmem:[%s3498_s0 + $0x2f8] sm:$0xff]  ;;  %v970_v23 = vrot.slane %v882_v5, 1  ;;  %v2830_v26 = vld [vmem:[%s3498_s0 + $0x230] sm:$0xff] }
  0x25   : > { %691 = vmatpush.bf16.msra.mxu2 %v2778_v24  ;;  %v2816_v15 = vld [vmem:[%s3498_s0 + $0x1c0] sm:$0xff]  ;;  %v2837_v31 = vld [vmem:[%s3498_s0 + $0x268] sm:$0xff]  ;;  %v2827_v39 = vld [vmem:[%s3498_s0 + $0x218] sm:$0xff] }
  0x26   : > { %774 = vmatpush.bf16.msra.mxu3 %v2786_v25  ;;  %v1051_v16 = vrot.slane %v884_v10, 1  ;;  %v1052_v17 = vrot.slane %v886_v11, 2  ;;  %v888_v18 = vrot.slane %v886_v11, 1  ;;  %v2845_v32 = vld [vmem:[%s3498_s0 + $0x2a8] sm:$0xff]  ;;  %v2852_v37 = vld [vmem:[%s3498_s0 + $0x2e0] sm:$0xff]  ;;  %v2879_v0 = vld [vmem:[%s3498_s0 + $0x3b8] sm:$0xff] }
  0x27   : > { %521 = vmatpush.bf16.msra.mxu0 %v2761_v27  ;;  %v2838_v27 = vld [vmem:[%s3498_s0 + $0x270] sm:$0xff]  ;;  %v1117_v38 = vld [vmem:[%s417_s17] sm:$0xf]  ;;  %v2877_v11 = vld [vmem:[%s3498_s0 + $0x3a8] sm:$0xff] }
  0x28   : > { %611 = vmatpush.bf16.msra.mxu1 %v2769_v28  ;;  %v1053_v24 = vor.u32 %v1052_v17, %v1051_v16  ;;  %v889_v25 = vor.u32 %v888_v18, %v884_v10  ;;  %v2846_v28 = vld [vmem:[%s3498_s0 + $0x2b0] sm:$0xff]  ;;  %v2869_v10 = vld [vmem:[%s3498_s0 + $0x368] sm:$0xff]  ;;  %v2876_v16 = vld [vmem:[%s3498_s0 + $0x3a0] sm:$0xff] }
  0x29   : > { %692 = vmatpush.bf16.msra.mxu2 %v2777_v29  ;;  %v2854_v29 = vld [vmem:[%s3498_s0 + $0x2f0] sm:$0xff]  ;;  %v2884_v17 = vld [vmem:[%s3498_s0 + $0x3e0] sm:$0xff] }
  0x2a   : > { %775 = vmatpush.bf16.msra.mxu3 %v2785_v30  ;;  %v2829_v30 = vld [vmem:[%s3498_s0 + $0x228] sm:$0xff]  ;;  %v2862_v5 = vld [vmem:[%s3498_s0 + $0x330] sm:$0xff] }
  0x2b   : > { %522 = vmatpush.bf16.msra.mxu0 %v2760_v33  ;;  %v2853_v33 = vld [vmem:[%s3498_s0 + $0x2e8] sm:$0xff] }
  0x2c   : > { %612 = vmatpush.bf16.msra.mxu1 %v2768_v34  ;;  %v2828_v34 = vld [vmem:[%s3498_s0 + $0x220] sm:$0xff] }
  0x2d   : > { %693 = vmatpush.bf16.msra.mxu2 %v2776_v35  ;;  %v2836_v35 = vld [vmem:[%s3498_s0 + $0x260] sm:$0xff] }
  0x2e   : > { %776 = vmatpush.bf16.msra.mxu3 %v2784_v36  ;;  %523 = vmatmul.bf16.vlgmr.msra.gmra.mxu0 %v450_v20  ;;  %v2839_v20 = vld [vmem:[%s3498_s0 + $0x278] sm:$0xff]  ;;  %v2844_v36 = vld [vmem:[%s3498_s0 + $0x2a0] sm:$0xff] }
  0x2f   : > { %849 = vmatpush.bf16.msrb.mxu0 %v2799_v40  ;;  %613 = vmatmul.bf16.vlgmr.msra.gmra.mxu1 %v555_v46  ;;  %v2835_v40 = vld [vmem:[%s3498_s0 + $0x258] sm:$0xff]  ;;  %v2842_v46 = vld [vmem:[%s3498_s0 + $0x290] sm:$0xff] }
  0x30   : > { %939 = vmatpush.bf16.msrb.mxu1 %v2807_v41  ;;  %694 = vmatmul.bf16.vlgmr.msra.gmra.mxu2 %v636_v44  ;;  %v2843_v41 = vld [vmem:[%s3498_s0 + $0x298] sm:$0xff]  ;;  %v2826_v44 = vld [vmem:[%s3498_s0 + $0x210] sm:$0xff] }
  0x31   : > { %1020 = vmatpush.bf16.msrb.mxu2 %v2815_v42  ;;  %777 = vmatmul.bf16.vlgmr.msra.gmra.mxu3 %v719_v45  ;;  %v2851_v42 = vld [vmem:[%s3498_s0 + $0x2d8] sm:$0xff]  ;;  %v2834_v45 = vld [vmem:[%s3498_s0 + $0x250] sm:$0xff] }
  0x32   : > { %1103 = vmatpush.bf16.msrb.mxu3 %v2823_v43  ;;  %v1215_v43 = vunpack.c.l.b16 %v1117_v38 }
  0x33   : > { %850 = vmatpush.bf16.msrb.mxu0 %v2798_v47  ;;  %v2850_v47 = vld [vmem:[%s3498_s0 + $0x2d0] sm:$0xff] }
  0x34   : > { %940 = vmatpush.bf16.msrb.mxu1 %v2806_v48  ;;  %v1216_v48 = vpack.c.b16 %v1215_v43, %v1215_v43 }
  0x35   : > { %1021 = vmatpush.bf16.msrb.mxu2 %v2814_v49  ;;  %v2825_v49 = vld [vmem:[%s3498_s0 + $0x208] sm:$0xff] }
  0x36   : > { %1104 = vmatpush.bf16.msrb.mxu3 %v2822_v50  ;;  %v2833_v50 = vld [vmem:[%s3498_s0 + $0x248] sm:$0xff] }
  0x37   : > { %851 = vmatpush.bf16.msrb.mxu0 %v2797_v51  ;;  %v2841_v51 = vld [vmem:[%s3498_s0 + $0x288] sm:$0xff] }
  0x38   : > { %941 = vmatpush.bf16.msrb.mxu1 %v2805_v52  ;;  %v2849_v52 = vld [vmem:[%s3498_s0 + $0x2c8] sm:$0xff] }
  0x39   : > { %1022 = vmatpush.bf16.msrb.mxu2 %v2813_v53  ;;  %v1220_v53 = vshll.u32 %v1216_v48, 16 }
  0x3a   : > { %1105 = vmatpush.bf16.msrb.mxu3 %v2821_v54  ;;  %v1218_v54 = vshrl.u32 %v1216_v48, 16 }
  0x3b   : > { %852 = vmatpush.bf16.msrb.mxu0 %v2796_v55  ;;  %v2824_v55 = vld [vmem:[%s3498_s0 + $0x200] sm:$0xff] }
  0x3c   : > { %942 = vmatpush.bf16.msrb.mxu1 %v2804_v56  ;;  %v2832_v56 = vld [vmem:[%s3498_s0 + $0x240] sm:$0xff] }
  0x3d   : > { %1023 = vmatpush.bf16.msrb.mxu2 %v2812_v57  ;;  %v2840_v57 = vld [vmem:[%s3498_s0 + $0x280] sm:$0xff] }
  0x3e   : > { %1106 = vmatpush.bf16.msrb.mxu3 %v2820_v58  ;;  %v2848_v58 = vld [vmem:[%s3498_s0 + $0x2c0] sm:$0xff] }
  0x3f   : > { %853 = vmatpush.bf16.msrb.mxu0 %v2795_v60  ;;  %v1385_v60 = vrot.slane %v1218_v54, 1 }
  0x40   : > { %943 = vmatpush.bf16.msrb.mxu1 %v2803_v61  ;;  %v1386_v61 = vrot.slane %v1220_v53, 2 }
  0x41   : > { %1024 = vmatpush.bf16.msrb.mxu2 %v2811_v62  ;;  %v2863_v62 = vld [vmem:[%s3498_s0 + $0x338] sm:$0xff] }
  0x42   : > { %1107 = vmatpush.bf16.msrb.mxu3 %v2819_v63  ;;  %v2871_v63 = vld [vmem:[%s3498_s0 + $0x378] sm:$0xff] }
  0x43   : > { %854 = vmatpush.bf16.msrb.mxu0 %v2794_v1  ;;  %v2887_v1 = vld [vmem:[%s3498_s0 + $0x3f8] sm:$0xff] }
  0x44   : > { %944 = vmatpush.bf16.msrb.mxu1 %v2802_v2  ;;  %v1304_v2 = vrot.slane %v1216_v48, 1 }
  0x45   : > { %1025 = vmatpush.bf16.msrb.mxu2 %v2810_v3 }
  0x46   : > { %1108 = vmatpush.bf16.msrb.mxu3 %v2818_v4  ;;  %v1387_v4 = vor.u32 %v1386_v61, %v1385_v60 }
  0x47   : > { %855 = vmatpush.bf16.msrb.mxu0 %v2793_v6  ;;  %v2870_v6 = vld [vmem:[%s3498_s0 + $0x370] sm:$0xff] }
  0x48   : > { %945 = vmatpush.bf16.msrb.mxu1 %v2801_v7  ;;  %v2878_v7 = vld [vmem:[%s3498_s0 + $0x3b0] sm:$0xff] }
  0x49   : > { %1026 = vmatpush.bf16.msrb.mxu2 %v2809_v8  ;;  %v2886_v8 = vld [vmem:[%s3498_s0 + $0x3f0] sm:$0xff] }
  0x4a   : > { %1109 = vmatpush.bf16.msrb.mxu3 %v2817_v9  ;;  %v2861_v9 = vld [vmem:[%s3498_s0 + $0x328] sm:$0xff] }
  0x4b   : > { %856 = vmatpush.bf16.msrb.mxu0 %v2792_v12  ;;  %v2885_v12 = vld [vmem:[%s3498_s0 + $0x3e8] sm:$0xff] }
  0x4c   : > { %946 = vmatpush.bf16.msrb.mxu1 %v2800_v13  ;;  %v2860_v13 = vld [vmem:[%s3498_s0 + $0x320] sm:$0xff] }
  0x4d   : > { %1027 = vmatpush.bf16.msrb.mxu2 %v2808_v14  ;;  %v2868_v14 = vld [vmem:[%s3498_s0 + $0x360] sm:$0xff] }
  0x4e   : > { %1110 = vmatpush.bf16.msrb.mxu3 %v2816_v15  ;;  %857 = vmatmul.bf16.vlgmr.msrb.gmra.mxu0 %v3208_v59  ;;  %v1222_v59 = vrot.slane %v1220_v53, 1  ;;  %v1451_v15 = vld [vmem:[%s427_s14] sm:$0xf]  ;;  %s436_s14 = scalar_lea.vmem %s3504_s6, %s2003_s11 }
  0x4f   : > { %1183 = vmatpush.bf16.msra.mxu0 %v2831_v19  ;;  %947 = vmatmul.bf16.vlgmr.msrb.gmra.mxu1 %v889_v25  ;;  %v1549_v18 = vunpack.c.l.b16 %v1451_v15  ;;  %v2859_v19 = vld [vmem:[%s3498_s0 + $0x318] sm:$0xff]  ;;  %v2866_v25 = vld [vmem:[%s3498_s0 + $0x350] sm:$0xff] }
  0x50   : > { %1273 = vmatpush.bf16.msra.mxu1 %v2839_v20  ;;  %1028 = vmatmul.bf16.vlgmr.msrb.gmra.mxu2 %v970_v23  ;;  %v1223_v3 = vor.u32 %v1222_v59, %v1218_v54  ;;  %v2867_v20 = vld [vmem:[%s3498_s0 + $0x358] sm:$0xff] }
  0x51   : > { %1354 = vmatpush.bf16.msra.mxu2 %v2847_v21  ;;  %1111 = vmatmul.bf16.vlgmr.msrb.gmra.mxu3 %v1053_v24  ;;  %v2875_v21 = vld [vmem:[%s3498_s0 + $0x398] sm:$0xff]  ;;  %v1550_v23 = vpack.c.b16 %v1549_v18, %v1549_v18  ;;  %v2858_v24 = vld [vmem:[%s3498_s0 + $0x310] sm:$0xff] }
  0x52   : > { %1437 = vmatpush.bf16.msra.mxu3 %v2855_v22  ;;  %v2883_v22 = vld [vmem:[%s3498_s0 + $0x3d8] sm:$0xff] }
  0x53   : > { %1184 = vmatpush.bf16.msra.mxu0 %v2830_v26  ;;  %v2874_v26 = vld [vmem:[%s3498_s0 + $0x390] sm:$0xff] }
  0x54   : > { %1274 = vmatpush.bf16.msra.mxu1 %v2838_v27  ;;  %v2882_v27 = vld [vmem:[%s3498_s0 + $0x3d0] sm:$0xff] }
  0x55   : > { %1355 = vmatpush.bf16.msra.mxu2 %v2846_v28  ;;  %v1554_v28 = vshll.u32 %v1550_v23, 16 }
  0x56   : > { %1438 = vmatpush.bf16.msra.mxu3 %v2854_v29  ;;  %v2857_v29 = vld [vmem:[%s3498_s0 + $0x308] sm:$0xff] }
  0x57   : > { %1185 = vmatpush.bf16.msra.mxu0 %v2829_v30  ;;  %v2865_v30 = vld [vmem:[%s3498_s0 + $0x348] sm:$0xff] }
  0x58   : > { %1275 = vmatpush.bf16.msra.mxu1 %v2837_v31  ;;  %v1552_v31 = vshrl.u32 %v1550_v23, 16 }
  0x59   : > { %1356 = vmatpush.bf16.msra.mxu2 %v2845_v32  ;;  %v2873_v32 = vld [vmem:[%s3498_s0 + $0x388] sm:$0xff] }
  0x5a   : > { %1439 = vmatpush.bf16.msra.mxu3 %v2853_v33  ;;  %v2881_v33 = vld [vmem:[%s3498_s0 + $0x3c8] sm:$0xff] }
  0x5b   : > { %1186 = vmatpush.bf16.msra.mxu0 %v2828_v34  ;;  %v1556_v34 = vrot.slane %v1554_v28, 1 }
  0x5c   : > { %1276 = vmatpush.bf16.msra.mxu1 %v2836_v35  ;;  %v2856_v35 = vld [vmem:[%s3498_s0 + $0x300] sm:$0xff] }
  0x5d   : > { %1357 = vmatpush.bf16.msra.mxu2 %v2844_v36  ;;  %v2864_v36 = vld [vmem:[%s3498_s0 + $0x340] sm:$0xff] }
  0x5e   : > { %1440 = vmatpush.bf16.msra.mxu3 %v2852_v37  ;;  %v1719_v37 = vrot.slane %v1552_v31, 1 }
  0x5f   : > { %1187 = vmatpush.bf16.msra.mxu0 %v2827_v39  ;;  %v2872_v39 = vld [vmem:[%s3498_s0 + $0x380] sm:$0xff] }
  0x60   : > { %1277 = vmatpush.bf16.msra.mxu1 %v2835_v40  ;;  %v2880_v40 = vld [vmem:[%s3498_s0 + $0x3c0] sm:$0xff] }
  0x61   : > { %1358 = vmatpush.bf16.msra.mxu2 %v2843_v41  ;;  %v1557_v41 = vor.u32 %v1556_v34, %v1552_v31 }
  0x62   : > { %1441 = vmatpush.bf16.msra.mxu3 %v2851_v42  ;;  %v1638_v42 = vrot.slane %v1550_v23, 1 }
  0x63   : > { %1188 = vmatpush.bf16.msra.mxu0 %v2826_v44  ;;  %v2929_v44 = vld [vmem:[%s3499_s1] ss:$0 sm:$0xff] }
  0x64   : > { %1278 = vmatpush.bf16.msra.mxu1 %v2834_v45 }
  0x65   : > { %1359 = vmatpush.bf16.msra.mxu2 %v2842_v46 }
  0x66   : > { %1442 = vmatpush.bf16.msra.mxu3 %v2850_v47 }
  0x67   : > { %1189 = vmatpush.bf16.msra.mxu0 %v2825_v49 }
  0x68   : > { %1279 = vmatpush.bf16.msra.mxu1 %v2833_v50 }
  0x69   : > { %1360 = vmatpush.bf16.msra.mxu2 %v2841_v51 }
  0x6a   : > { %1443 = vmatpush.bf16.msra.mxu3 %v2849_v52 }
  0x6b   : > { %1190 = vmatpush.bf16.msra.mxu0 %v2824_v55 }
  0x6c   : > { %1280 = vmatpush.bf16.msra.mxu1 %v2832_v56 }
  0x6d   : > { %1361 = vmatpush.bf16.msra.mxu2 %v2840_v57 }
  0x6e   : > { %1444 = vmatpush.bf16.msra.mxu3 %v2848_v58  ;;  %1191 = vmatmul.bf16.vlgmr.msra.gmra.mxu0 %v1117_v38  ;;  %v1720_v38 = vrot.slane %v1554_v28, 2 }
  0x6f   : > { %1517 = vmatpush.bf16.msrb.mxu0 %v2863_v62  ;;  %1281 = vmatmul.bf16.vlgmr.msra.gmra.mxu1 %v1223_v3 }
  0x70   : > { %1607 = vmatpush.bf16.msrb.mxu1 %v2871_v63  ;;  %1362 = vmatmul.bf16.vlgmr.msra.gmra.mxu2 %v1304_v2  ;;  %v1721_v43 = vor.u32 %v1720_v38, %v1719_v37 }
  0x71   : > { %1688 = vmatpush.bf16.msrb.mxu2 %v2879_v0  ;;  %1445 = vmatmul.bf16.vlgmr.msra.gmra.mxu3 %v1387_v4 }
  0x72   : > { %1771 = vmatpush.bf16.msrb.mxu3 %v2887_v1 }
  0x73   : > { %1518 = vmatpush.bf16.msrb.mxu0 %v2862_v5 }
  0x74   : > { %1608 = vmatpush.bf16.msrb.mxu1 %v2870_v6 }
  0x75   : > { %1689 = vmatpush.bf16.msrb.mxu2 %v2878_v7 }
  0x76   : > { %1772 = vmatpush.bf16.msrb.mxu3 %v2886_v8 }
  0x77   : > { %1519 = vmatpush.bf16.msrb.mxu0 %v2861_v9 }
  0x78   : > { %1609 = vmatpush.bf16.msrb.mxu1 %v2869_v10 }
  0x79   : > { %1690 = vmatpush.bf16.msrb.mxu2 %v2877_v11 }
  0x7a   : > { %1773 = vmatpush.bf16.msrb.mxu3 %v2885_v12 }
  0x7b   : > { %1520 = vmatpush.bf16.msrb.mxu0 %v2860_v13 }
  0x7c   : > { %1610 = vmatpush.bf16.msrb.mxu1 %v2868_v14 }
  0x7d   : > { %1691 = vmatpush.bf16.msrb.mxu2 %v2876_v16 }
  0x7e   : > { %1774 = vmatpush.bf16.msrb.mxu3 %v2884_v17 }
  0x7f   : > { %1521 = vmatpush.bf16.msrb.mxu0 %v2859_v19 }
  0x80   : > { %1611 = vmatpush.bf16.msrb.mxu1 %v2867_v20 }
  0x81   : > { %1692 = vmatpush.bf16.msrb.mxu2 %v2875_v21 }
  0x82   : > { %1775 = vmatpush.bf16.msrb.mxu3 %v2883_v22 }
  0x83   : > { %1522 = vmatpush.bf16.msrb.mxu0 %v2858_v24 }
  0x84   : > { %1612 = vmatpush.bf16.msrb.mxu1 %v2866_v25 }
  0x85   : > { %1693 = vmatpush.bf16.msrb.mxu2 %v2874_v26 }
  0x86   : > { %1776 = vmatpush.bf16.msrb.mxu3 %v2882_v27 }
  0x87   : > { %1523 = vmatpush.bf16.msrb.mxu0 %v2857_v29 }
  0x88   : > { %1613 = vmatpush.bf16.msrb.mxu1 %v2865_v30 }
  0x89   : > { %1694 = vmatpush.bf16.msrb.mxu2 %v2873_v32 }
  0x8a   : > { %1777 = vmatpush.bf16.msrb.mxu3 %v2881_v33 }
  0x8b   : > { %1524 = vmatpush.bf16.msrb.mxu0 %v2856_v35 }
  0x8c   : > { %1614 = vmatpush.bf16.msrb.mxu1 %v2864_v36 }
  0x8d   : > { %1695 = vmatpush.bf16.msrb.mxu2 %v2872_v39 }
  0x8e   : > { %1778 = vmatpush.bf16.msrb.mxu3 %v2880_v40  ;;  %1525 = vmatmul.bf16.vlgmr.msrb.gmra.mxu0 %v1451_v15 }
  0x8f   : > { %1615 = vmatmul.bf16.vlgmr.msrb.gmra.mxu1 %v1557_v41 }
  0x90   : > { %1696 = vmatmul.bf16.vlgmr.msrb.gmra.mxu2 %v1638_v42 }
  0x91   : > { %1779 = vmatmul.bf16.vlgmr.msrb.gmra.mxu3 %v1721_v43 }
  0xab   : > { %v524_v45 = vpop.f32.mrf.mxu0 }
  0xac   : > { %v528_v46 = vadd.f32 %v2929_v44, %v524_v45  ;;  %v614_v47 = vpop.f32.mrf.mxu1 }
  0xae   : > { %v618_v48 = vadd.f32 %v614_v47, %v528_v46 }
  0xb3   : > { %v695_v49 = vpop.f32.mrf.mxu2  ;;  %v526_v52 = vpop.f32.mrf.mxu0 }
  0xb4   : > { %v699_v50 = vadd.f32 %v695_v49, %v618_v48  ;;  %v778_v51 = vpop.f32.mrf.mxu3  ;;  %v616_v54 = vpop.f32.mrf.mxu1 }
  0xb6   : > { %v782_v53 = vadd.f32 %v778_v51, %v699_v50 }
  0xbb   : > { %v697_v55 = vpop.f32.mrf.mxu2 }
  0xbc   : > { %v780_v56 = vpop.f32.mrf.mxu3 }
  0xcb   : > { %v858_v57 = vpop.f32.mrf.mxu0 }
  0xcc   : > { %v948_v58 = vpop.f32.mrf.mxu1  ;;  %v862_v3 = vadd.f32 %v858_v57, %v782_v53 }
  0xce   : > { %v952_v7 = vadd.f32 %v948_v58, %v862_v3 }
  0xd3   : > { %v1029_v59 = vpop.f32.mrf.mxu2  ;;  %v860_v61 = vpop.f32.mrf.mxu0 }
  0xd4   : > { %v1112_v60 = vpop.f32.mrf.mxu3  ;;  %v950_v62 = vpop.f32.mrf.mxu1  ;;  %v1033_v9 = vadd.f32 %v1029_v59, %v952_v7 }
  0xd6   : > { %v1116_v12 = vadd.f32 %v1112_v60, %v1033_v9 }
  0xdb   : > { %v1031_v63 = vpop.f32.mrf.mxu2 }
  0xdc   : > { %v1114_v0 = vpop.f32.mrf.mxu3 }
  0xeb   : > { %v1192_v1 = vpop.f32.mrf.mxu0 }
  0xec   : > { %v1282_v2 = vpop.f32.mrf.mxu1  ;;  %v1196_v13 = vadd.f32 %v1192_v1, %v1116_v12 }
  0xee   : > { %v1286_v14 = vadd.f32 %v1282_v2, %v1196_v13 }
  0xf3   : > { %v1363_v4 = vpop.f32.mrf.mxu2  ;;  %v1194_v6 = vpop.f32.mrf.mxu0 }
  0xf4   : > { %v1446_v5 = vpop.f32.mrf.mxu3  ;;  %v1284_v8 = vpop.f32.mrf.mxu1  ;;  %v1367_v15 = vadd.f32 %v1363_v4, %v1286_v14 }
  0xf6   : > { %v1450_v16 = vadd.f32 %v1446_v5, %v1367_v15 }
  0xfb   : > { %v1365_v10 = vpop.f32.mrf.mxu2 }
  0xfc   : > { %v1448_v11 = vpop.f32.mrf.mxu3 }
 0x10b   : > { %v1526_v17 = vpop.f32.mrf.mxu0 }
 0x10c   : > { %v1616_v18 = vpop.f32.mrf.mxu1  ;;  %v1530_v19 = vadd.f32 %v1526_v17, %v1450_v16 }
 0x10e   : > { %v1620_v20 = vadd.f32 %v1616_v18, %v1530_v19 }
 0x113   : > { %v1697_v21 = vpop.f32.mrf.mxu2  ;;  %v1528_v24 = vpop.f32.mrf.mxu0 }
 0x114   : > { %v1780_v22 = vpop.f32.mrf.mxu3  ;;  %v1701_v23 = vadd.f32 %v1697_v21, %v1620_v20  ;;  %v1618_v25 = vpop.f32.mrf.mxu1 }
 0x116   : > { %v1784_v26 = vadd.f32 %v1780_v22, %v1701_v23 }
 0x118   : > { %v1786_v27 = vsel %vm1785_vm0, %v1784_v26, 0.0  ;;  %v1793_v28 = vmul.f32 %v1784_v26, %v1784_v26  ;;  %v1804_v29 = vpack.c.bf16 %v1784_v26, %v1784_v26 }
 0x119   : > { %v1787_v30 = vrot.slane %v1786_v27, 4 }
 0x11a   : > { %v1794_v31 = vsel %vm1785_vm0, %v1793_v28, 0.0  ;;  %1805 = vst [vmem:[%s436_s14] sm:$0x3] %v1804_v29 }
 0x11b   : > { %v1788_v32 = vadd.f32 %v1787_v30, %v1786_v27  ;;  %v1795_v33 = vrot.slane %v1794_v31, 4  ;;  %v1699_v34 = vpop.f32.mrf.mxu2 }
 0x11c   : > { %v1782_v35 = vpop.f32.mrf.mxu3 }
 0x11d   : > { %v1789_v36 = vrot.slane %v1788_v32, 2  ;;  %v1796_v37 = vadd.f32 %v1795_v33, %v1794_v31 }
 0x11f   : > { %v1790_v38 = vadd.f32 %v1789_v36, %v1788_v32  ;;  %v1797_v39 = vrot.slane %v1796_v37, 2 }
 0x121   : > { %v1791_v40 = vrot.slane %v1790_v38, 1  ;;  %v1798_v41 = vadd.f32 %v1797_v39, %v1796_v37 }
 0x123   : > { %v1799_v42 = vrot.slane %v1798_v41, 1  ;;  %v1792_v43 = vadd.f32 %v1791_v40, %v1790_v38 }
 0x125   : > { %v1800_v44 = vadd.f32 %v1799_v42, %v1798_v41 }
 0x127   : > { %v1802_v45 = vsel %vm1801_vm1, %v1792_v43, %v1800_v44 }
 0x128   : > { %1803 = vst [vmem:[%s444_s16] sm:$0x3] %v1802_v45 }
 0x129 PF: > { %s18_s28 = sadd.s32 1, %s2968_s28   ;;  %s3508_s24 = smov %s2960_s26 }
 0x12a   : > { %p15_p11 = scmp.ge.s32.totalorder %s18_s28, 10   ;;  %s3509_s25 = smov %s2964_s27 }
 0x12b   : > { %s3510_s26 = smov %s3513_s29  ;;  %s3511_s27 = smov %s3517_s30 }
 0x12c   :  { %17 = sbr.rel (!%p15_p11) target bundleno = 3 (0x3), region = 110 }

// kernel: _lambda_.15
= control target key start
LH: loop header
LB: loop body
LE: loop exit
PB: predicated region body
PF: predicated region fallthrough
CT: control target
= control target key end

     0   :  { %13 = vsyncpa [#allocation3], 0  ;;  %s3655_s0 = inlined_call_operand.vmem [shape: bf16[16,128,128], index: 0, kind: input, shape index: {}]   ;;  %s3656_s1 = inlined_call_operand.vmem [shape: f32[1,128], index: 1, kind: input, shape index: {}]   ;;  %s3657_s2 = inlined_call_operand.vmem [shape: bf16[2,8,8,128], index: 2, kind: input, shape index: {}, may-alias: {2,3,4,5}]   ;;  %s3658_s3 = inlined_call_operand.vmem [shape: bf16[2,8,8,128], index: 3, kind: input, shape index: {}, may-alias: {2,3,4,5}]   ;;  %s3659_s4 = inlined_call_operand.vmem [shape: bf16[2,8,8,128], index: 4, kind: input, shape index: {}, may-alias: {2,3,4,5}]   ;;  %s3660_s5 = inlined_call_operand.vmem [shape: bf16[2,8,8,128], index: 5, kind: input, shape index: {}, may-alias: {2,3,4,5}]   ;;  %s3661_s6 = inlined_call_operand.vmem [shape: f32[2,5,5,128], index: 6, kind: output, shape index: {0}]   ;;  %s3662_s7 = inlined_call_operand.hbm [shape: f32[2,5,2,128], index: 7, kind: output, shape index: {1}]  }
   0x1   :  { %15 = vsyncpa [#allocation3 + $0x1], 0  ;;  %s3103_s24 = smov 0   ;;  %s3105_s25 = smov 0  }
   0x2   :  { %s3107_s26 = smov 0   ;;  %s3109_s27 = smov 0  }
   0x3   :  { %s3111_s28 = smov 0   ;;  %s3113_s29 = smov 0  }
   0x4   :  { %s3115_s30 = smov 0   ;;  %s3117_s8 = smov 0  }
   0x5 LB: > { %3667 = sst [smem:[#allocation5_spill]] %s3053_s29  ;;  %s1994_s9 = sadd.s32 4294967295, %s3061_s8   ;;  %s3061_s8 = sphi %s3117_s8, %s21_s8   ;;  %s3057_s30 = sphi %s3115_s30, %s3678_s30   ;;  %s3053_s29 = sphi %s3113_s29, %s3677_s29   ;;  %s3049_s28 = sphi %s3111_s28, %s3676_s28   ;;  %s3045_s27 = sphi %s3109_s27, %s3675_s27   ;;  %s3041_s26 = sphi %s3107_s26, %s3681_s26   ;;  %s3037_s25 = sphi %s3105_s25, %s3680_s25   ;;  %s3033_s24 = sphi %s3103_s24, %s3679_s24  }
   0x6   : > { %3668 = sst [smem:[#allocation6_spill]] %s3057_s30  ;;  %s1995_s10 = sadd.s32 4294967294, %s3061_s8  }
   0x7   : > { %s30_s11 = sadd.s32 1, %s3053_s29  ;;  %s33_s12 = sadd.s32 1, %s3057_s30 }
   0x8   : > { %p31_p0 = scmp.ge.s32.totalorder %s30_s11, 5  ;;  %p240_p1 = scmp.ne.s32.totalorder %s3041_s26, %s3037_s25 }
   0x9   : > { %p241_p2 = scmp.eq.s32.totalorder %s1994_s9, 9  ;;  %p246_p5 = scmp.ne.s32.totalorder %s3037_s25, %s3033_s24 }
   0xa   : > { %s3683_s11 = smov (%p31_p0, %s30_s11), 0  ;;  %s3685_s12 = smov (!%p31_p0, %s33_s12), %s3057_s30 }
   0xb   : > { %3669 = sst [smem:[#allocation7_spill]] %s3683_s11  ;;  %s226_s13 = ssub.s32 %s3053_s29, %s3683_s11 }
   0xc   : > { %p3154_p3 = por %p241_p2, %p240_p1  ;;  %p35_p4 = scmp.ge.s32.totalorder %s3685_s12, 2 }
   0xd   : > { %p247_p6 = scmp.eq.s32.totalorder %s1995_s10, 9  ;;  %p1998_p7 = scmp.ge.s32.totalorder %s3061_s8, 1 }
   0xe   : > { %s3687_s12 = smov (%p35_p4, %s3685_s12), 0  ;;  %p321_p9 = scmp.lt.s32.totalorder %s3061_s8, 11 }
   0xf   : > { %3671 = sst [smem:[#allocation8_spill]] %s3687_s12  ;;  %p3163_p8 = por %p247_p6, %p246_p5 }
  0x10   : > { %s225_s16 = ssub.s32 %s3057_s30, %s3687_s12  ;;  %s230_s17 = sadd.s32 1, %s3041_s26 }
  0x11   : > { %s227_s18 = sor.u32 %s226_s13, %s225_s16  ;;  %p322_p10 = pnand %p1998_p7, %p321_p9 }
  0x12   : > { %p228_p11 = scmp.eq.s32.totalorder %s227_s18, 0  ;;  %p391_p12 = scmp.lt.s32.totalorder (!%p322_p10), %s3049_s28, 1 }
  0x13   : > { %325 = sbr.rel (%p322_p10) target bundleno = 309 (0x135), region = 44  ;;  %p393_p13 = scmp.lt.s32.totalorder (!%p322_p10), %s3045_s27, 7 }
  0x14   : > { %s3172_s19 = scalar_select %p228_p11, %s3041_s26, %s230_s17  }
  0x15   : > { %s399_s13 = sadd.s32 (!%p322_p10), 1, %s3045_s27  ;;  %s419_s20 = sadd.s32 (!%p322_p10), 3, %s3045_s27 }
  0x16   : > { %p3272_p0 = scmp.lt.s32.totalorder (!%p322_p10), %s399_s13, 7  ;;  %p422_p2 = scmp.lt.s32.totalorder (!%p322_p10), %s419_s20, 7 }
  0x17   : > { %p431_p4 = scmp.lt.s32.totalorder (!%p322_p10), %s3045_s27, 4 }
  0x18   : > { %v2772_v0 = vld [vmem:[%s3655_s0 + $0x38] sm:$0xff]  ;;  %v2771_v4 = vld [vmem:[%s3655_s0 + $0x30] sm:$0xff]  ;;  %s3195_s22 = scalar_select %p391_p12, %s3049_s28, 1  ;;  %v2770_v8 = vld [vmem:[%s3655_s0 + $0x28] sm:$0xff]  ;;  %vm1777_vm0 = vcmask 1044480   ;;  %vm1793_vm1 = vcmask 1040384  }
  0x19   : > { %v2780_v1 = vld [vmem:[%s3655_s0 + $0x78] sm:$0xff]  ;;  %507 = vmatpush.bf16.msra.mxu0 %v2772_v0  ;;  %v2779_v5 = vld [vmem:[%s3655_s0 + $0x70] sm:$0xff]  ;;  %s394_s16 = scalar_select %p393_p13, %s3045_s27, 7  ;;  %v2778_v9 = vld [vmem:[%s3655_s0 + $0x68] sm:$0xff] }
  0x1a   : > { %v2788_v2 = vld [vmem:[%s3655_s0 + $0xb8] sm:$0xff]  ;;  %597 = vmatpush.bf16.msra.mxu1 %v2780_v1  ;;  %v2787_v6 = vld [vmem:[%s3655_s0 + $0xb0] sm:$0xff]  ;;  %s3205_s17 = sshll.u32 %s3195_s22, 3  ;;  %v2786_v10 = vld [vmem:[%s3655_s0 + $0xa8] sm:$0xff]  ;;  %s3689_s13 = smov (!%p3272_p0, %s399_s13), 7 }
  0x1b   : > { %v2796_v3 = vld [vmem:[%s3655_s0 + $0xf8] sm:$0xff]  ;;  %678 = vmatpush.bf16.msra.mxu2 %v2788_v2  ;;  %v2795_v7 = vld [vmem:[%s3655_s0 + $0xf0] sm:$0xff]  ;;  %v2794_v11 = vld [vmem:[%s3655_s0 + $0xe8] sm:$0xff]  ;;  %s396_s11 = sadd.s32 %s3205_s17, %s394_s16  ;;  %s405_s9 = sadd.s32 %s3205_s17, %s3689_s13 }
  0x1c   : > { %761 = vmatpush.bf16.msra.mxu3 %v2796_v3  ;;  %v2769_v12 = vld [vmem:[%s3655_s0 + $0x20] sm:$0xff]  ;;  %s2001_s16 = sshll.u32 %s396_s11, 2  ;;  %v2768_v16 = vld [vmem:[%s3655_s0 + $0x18] sm:$0xff]  ;;  %v2767_v21 = vld [vmem:[%s3655_s0 + $0x10] sm:$0xff]  ;;  %s3693_s20 = smov (!%p422_p2, %s419_s20), 7 }
  0x1d   : > { %508 = vmatpush.bf16.msra.mxu0 %v2771_v4  ;;  %v2777_v13 = vld [vmem:[%s3655_s0 + $0x60] sm:$0xff]  ;;  %v2776_v17 = vld [vmem:[%s3655_s0 + $0x58] sm:$0xff]  ;;  %s398_s21 = scalar_lea.vmem %s3657_s2, %s2001_s16  ;;  %v2775_v22 = vld [vmem:[%s3655_s0 + $0x50] sm:$0xff]  ;;  %s2003_s16 = sshll.u32 %s405_s9, 2 }
  0x1e   : > { %598 = vmatpush.bf16.msra.mxu1 %v2779_v5  ;;  %v2785_v14 = vld [vmem:[%s3655_s0 + $0xa0] sm:$0xff]  ;;  %v2784_v18 = vld [vmem:[%s3655_s0 + $0x98] sm:$0xff]  ;;  %v2783_v24 = vld [vmem:[%s3655_s0 + $0x90] sm:$0xff]  ;;  %s407_s11 = scalar_lea.vmem %s3658_s3, %s2003_s16  ;;  %s425_s16 = sadd.s32 %s3205_s17, %s3693_s20 }
  0x1f   : > { %679 = vmatpush.bf16.msra.mxu2 %v2787_v6  ;;  %v2793_v15 = vld [vmem:[%s3655_s0 + $0xe0] sm:$0xff]  ;;  %v2792_v19 = vld [vmem:[%s3655_s0 + $0xd8] sm:$0xff]  ;;  %v2791_v25 = vld [vmem:[%s3655_s0 + $0xd0] sm:$0xff]  ;;  %s432_s13 = scalar_select %p431_p4, %s3045_s27, 4 }
  0x20   : > { %762 = vmatpush.bf16.msra.mxu3 %v2795_v7  ;;  %v442_v20 = vld [vmem:[%s398_s21] sm:$0xf]  ;;  %v2766_v27 = vld [vmem:[%s3655_s0 + $0x8] sm:$0xff]  ;;  %v2804_v40 = vld [vmem:[%s3655_s0 + $0x138] sm:$0xff] }
  0x21   : > { %509 = vmatpush.bf16.msra.mxu0 %v2770_v8  ;;  %v539_v23 = vunpack.c.l.b16 %v442_v20  ;;  %v2774_v28 = vld [vmem:[%s3655_s0 + $0x48] sm:$0xff]  ;;  %v2765_v33 = vld [vmem:[%s3655_s0] sm:$0xff]  ;;  %v2812_v41 = vld [vmem:[%s3655_s0 + $0x178] sm:$0xff] }
  0x22   : > { %599 = vmatpush.bf16.msra.mxu1 %v2778_v9  ;;  %v2782_v29 = vld [vmem:[%s3655_s0 + $0x88] sm:$0xff]  ;;  %v2773_v34 = vld [vmem:[%s3655_s0 + $0x40] sm:$0xff]  ;;  %v2820_v42 = vld [vmem:[%s3655_s0 + $0x1b8] sm:$0xff] }
  0x23   : > { %680 = vmatpush.bf16.msra.mxu2 %v2786_v10  ;;  %v540_v26 = vpack.c.b16 %v539_v23, %v539_v23  ;;  %v2790_v30 = vld [vmem:[%s3655_s0 + $0xc8] sm:$0xff]  ;;  %v2781_v35 = vld [vmem:[%s3655_s0 + $0x80] sm:$0xff]  ;;  %v2828_v43 = vld [vmem:[%s3655_s0 + $0x1f8] sm:$0xff] }
  0x24   : > { %763 = vmatpush.bf16.msra.mxu3 %v2794_v11  ;;  %v2789_v36 = vld [vmem:[%s3655_s0 + $0xc0] sm:$0xff]  ;;  %v2803_v47 = vld [vmem:[%s3655_s0 + $0x130] sm:$0xff]  ;;  %v2802_v51 = vld [vmem:[%s3655_s0 + $0x128] sm:$0xff] }
  0x25   : > { %510 = vmatpush.bf16.msra.mxu0 %v2769_v12  ;;  %v542_v31 = vshrl.u32 %v540_v26, 16  ;;  %v544_v32 = vshll.u32 %v540_v26, 16  ;;  %v628_v44 = vrot.slane %v540_v26, 1  ;;  %v2811_v48 = vld [vmem:[%s3655_s0 + $0x170] sm:$0xff]  ;;  %v2810_v52 = vld [vmem:[%s3655_s0 + $0x168] sm:$0xff]  ;;  %v2801_v55 = vld [vmem:[%s3655_s0 + $0x120] sm:$0xff] }
  0x26   : > { %600 = vmatpush.bf16.msra.mxu1 %v2777_v13  ;;  %v2819_v49 = vld [vmem:[%s3655_s0 + $0x1b0] sm:$0xff]  ;;  %v2818_v53 = vld [vmem:[%s3655_s0 + $0x1a8] sm:$0xff]  ;;  %v2809_v56 = vld [vmem:[%s3655_s0 + $0x160] sm:$0xff] }
  0x27   : > { %681 = vmatpush.bf16.msra.mxu2 %v2785_v14  ;;  %v709_v37 = vrot.slane %v542_v31, 1  ;;  %v710_v38 = vrot.slane %v544_v32, 2  ;;  %v546_v39 = vrot.slane %v544_v32, 1  ;;  %v2827_v50 = vld [vmem:[%s3655_s0 + $0x1f0] sm:$0xff]  ;;  %v2826_v54 = vld [vmem:[%s3655_s0 + $0x1e8] sm:$0xff]  ;;  %v2817_v57 = vld [vmem:[%s3655_s0 + $0x1a0] sm:$0xff] }
  0x28   : > { %764 = vmatpush.bf16.msra.mxu3 %v2793_v15  ;;  %v2825_v58 = vld [vmem:[%s3655_s0 + $0x1e0] sm:$0xff]  ;;  %v2800_v60 = vld [vmem:[%s3655_s0 + $0x118] sm:$0xff]  ;;  %v2799_v1 = vld [vmem:[%s3655_s0 + $0x110] sm:$0xff] }
  0x29   : > { %511 = vmatpush.bf16.msra.mxu0 %v2768_v16  ;;  %v711_v45 = vor.u32 %v710_v38, %v709_v37  ;;  %v547_v46 = vor.u32 %v546_v39, %v542_v31  ;;  %v3342_v59 = vld [vmem:[%s407_s11] sm:$0xf]  ;;  %v2808_v61 = vld [vmem:[%s3655_s0 + $0x158] sm:$0xff]  ;;  %v2807_v2 = vld [vmem:[%s3655_s0 + $0x150] sm:$0xff]  ;;  %s409_s11 = sadd.s32 2, %s3045_s27 }
  0x2a   : > { %601 = vmatpush.bf16.msra.mxu1 %v2776_v17  ;;  %v2816_v62 = vld [vmem:[%s3655_s0 + $0x198] sm:$0xff]  ;;  %v873_v0 = vunpack.c.l.b16 %v3342_v59  ;;  %v2815_v3 = vld [vmem:[%s3655_s0 + $0x190] sm:$0xff]  ;;  %v2798_v6 = vld [vmem:[%s3655_s0 + $0x108] sm:$0xff]  ;;  %p3382_p1 = scmp.lt.s32.totalorder %s409_s11, 7 }
  0x2b   : > { %682 = vmatpush.bf16.msra.mxu2 %v2784_v18  ;;  %v2824_v63 = vld [vmem:[%s3655_s0 + $0x1d8] sm:$0xff]  ;;  %v2823_v4 = vld [vmem:[%s3655_s0 + $0x1d0] sm:$0xff]  ;;  %v2806_v7 = vld [vmem:[%s3655_s0 + $0x148] sm:$0xff] }
  0x2c   : > { %765 = vmatpush.bf16.msra.mxu3 %v2792_v19  ;;  %v874_v5 = vpack.c.b16 %v873_v0, %v873_v0  ;;  %v2814_v8 = vld [vmem:[%s3655_s0 + $0x188] sm:$0xff]  ;;  %v2797_v12 = vld [vmem:[%s3655_s0 + $0x100] sm:$0xff]  ;;  %v2836_v19 = vld [vmem:[%s3655_s0 + $0x238] sm:$0xff]  ;;  %s3691_s11 = smov (!%p3382_p1, %s409_s11), 7 }
  0x2d   : > { %512 = vmatpush.bf16.msra.mxu0 %v2767_v21  ;;  %v2822_v9 = vld [vmem:[%s3655_s0 + $0x1c8] sm:$0xff]  ;;  %v2805_v13 = vld [vmem:[%s3655_s0 + $0x140] sm:$0xff]  ;;  %v2852_v21 = vld [vmem:[%s3655_s0 + $0x2b8] sm:$0xff]  ;;  %s415_s9 = sadd.s32 %s3205_s17, %s3691_s11  ;;  %s2007_s17 = sshll.u32 %s425_s16, 2 }
  0x2e   : > { %602 = vmatpush.bf16.msra.mxu1 %v2775_v22  ;;  %v876_v10 = vshrl.u32 %v874_v5, 16  ;;  %v878_v11 = vshll.u32 %v874_v5, 16  ;;  %v2813_v14 = vld [vmem:[%s3655_s0 + $0x180] sm:$0xff]  ;;  %v2860_v22 = vld [vmem:[%s3655_s0 + $0x2f8] sm:$0xff]  ;;  %v962_v23 = vrot.slane %v874_v5, 1  ;;  %v2835_v26 = vld [vmem:[%s3655_s0 + $0x230] sm:$0xff]  ;;  %s427_s30 = scalar_lea.vmem %s3660_s5, %s2007_s17 }
  0x2f   : > { %683 = vmatpush.bf16.msra.mxu2 %v2783_v24  ;;  %v2821_v15 = vld [vmem:[%s3655_s0 + $0x1c0] sm:$0xff]  ;;  %v2842_v31 = vld [vmem:[%s3655_s0 + $0x268] sm:$0xff]  ;;  %s2005_s12 = sshll.u32 %s415_s9, 2  ;;  %v2832_v39 = vld [vmem:[%s3655_s0 + $0x218] sm:$0xff] }
  0x30   : > { %766 = vmatpush.bf16.msra.mxu3 %v2791_v25  ;;  %v1043_v16 = vrot.slane %v876_v10, 1  ;;  %v1044_v17 = vrot.slane %v878_v11, 2  ;;  %v880_v18 = vrot.slane %v878_v11, 1  ;;  %v2850_v32 = vld [vmem:[%s3655_s0 + $0x2a8] sm:$0xff]  ;;  %s417_s29 = scalar_lea.vmem %s3659_s4, %s2005_s12  ;;  %v2857_v37 = vld [vmem:[%s3655_s0 + $0x2e0] sm:$0xff]  ;;  %v2884_v0 = vld [vmem:[%s3655_s0 + $0x3b8] sm:$0xff] }
  0x31   : > { %513 = vmatpush.bf16.msra.mxu0 %v2766_v27  ;;  %v2843_v27 = vld [vmem:[%s3655_s0 + $0x270] sm:$0xff]  ;;  %v1109_v38 = vld [vmem:[%s417_s29] sm:$0xf]  ;;  %v2882_v11 = vld [vmem:[%s3655_s0 + $0x3a8] sm:$0xff]  ;;  %s2893_s29 = smul.u32 5, %s3195_s22  ;;  %s388_s12 = sand.u32 1, %s3037_s25  }
  0x32   : > { %603 = vmatpush.bf16.msra.mxu1 %v2774_v28  ;;  %v1045_v24 = vor.u32 %v1044_v17, %v1043_v16  ;;  %v881_v25 = vor.u32 %v880_v18, %v876_v10  ;;  %v2851_v28 = vld [vmem:[%s3655_s0 + $0x2b0] sm:$0xff]  ;;  %v2874_v10 = vld [vmem:[%s3655_s0 + $0x368] sm:$0xff]  ;;  %v2881_v16 = vld [vmem:[%s3655_s0 + $0x3a0] sm:$0xff]  ;;  %s2894_s22 = smul.u32 5, %s3049_s28 }
  0x33   : > { %684 = vmatpush.bf16.msra.mxu2 %v2782_v29  ;;  %v2859_v29 = vld [vmem:[%s3655_s0 + $0x2f0] sm:$0xff]  ;;  %v2889_v17 = vld [vmem:[%s3655_s0 + $0x3e0] sm:$0xff]  ;;  %s434_s11 = sadd.s32 %s2893_s29, %s432_s13 }
  0x34   : > { %767 = vmatpush.bf16.msra.mxu3 %v2790_v30  ;;  %v2834_v30 = vld [vmem:[%s3655_s0 + $0x228] sm:$0xff]  ;;  %v2867_v5 = vld [vmem:[%s3655_s0 + $0x330] sm:$0xff]  ;;  %s2008_s23 = sshll.u32 %s434_s11, 3  ;;  %s1819_s10 = sadd.s32 %s3045_s27, %s2894_s22 }
  0x35   : > { %514 = vmatpush.bf16.msra.mxu0 %v2765_v33  ;;  %v2858_v33 = vld [vmem:[%s3655_s0 + $0x2e8] sm:$0xff]  ;;  %s436_s16 = scalar_lea.vmem %s3661_s6, %s2008_s23  ;;  %s2762_s18 = sshll.u32 %s1819_s10, 1 }
  0x36   : > { %604 = vmatpush.bf16.msra.mxu1 %v2773_v34  ;;  %v2833_v34 = vld [vmem:[%s3655_s0 + $0x220] sm:$0xff]  ;;  %s1821_s28 = scalar_lea.hbm %s3662_s7, %s2762_s18  ;;  %s1806_s11 = scalar_lea.sflag [#allocation3], %s388_s12 }
  0x37   : > { %685 = vmatpush.bf16.msra.mxu2 %v2781_v35  ;;  %v2841_v35 = vld [vmem:[%s3655_s0 + $0x260] sm:$0xff]  ;;  %s1825_s29 = sshll.u32 %s1821_s28, 4  ;;  %s2987_s22 = scalar_lea.hbm %s3662_s7, 20  ;;  %s1826_s29 = int_to_ptr.hbm [resolvable:$true] %s1825_s29 }
  0x38   : > { %768 = vmatpush.bf16.msra.mxu3 %v2789_v36  ;;  %515 = vmatmul.bf16.vlgmr.msra.gmra.mxu0 %v442_v20  ;;  %v2844_v20 = vld [vmem:[%s3655_s0 + $0x278] sm:$0xff]  ;;  %v2849_v36 = vld [vmem:[%s3655_s0 + $0x2a0] sm:$0xff]  ;;  %s2981_s23 = sshra.s32 %s1826_s29, 4  ;;  %s2982_s23 = int_to_ptr.hbm [resolvable:$true] %s2981_s23 }
  0x39   : > { %841 = vmatpush.bf16.msrb.mxu0 %v2804_v40  ;;  %605 = vmatmul.bf16.vlgmr.msra.gmra.mxu1 %v547_v46  ;;  %v2840_v40 = vld [vmem:[%s3655_s0 + $0x258] sm:$0xff]  ;;  %v2847_v46 = vld [vmem:[%s3655_s0 + $0x290] sm:$0xff]  ;;  %s2983_s21 = scalar_lea.hbm %s2982_s23, 2  ;;  %p2988_p9 = scmp.lt.s32.totalorder %s2982_s23, %s3662_s7 }
  0x3a   : > { %931 = vmatpush.bf16.msrb.mxu1 %v2812_v41  ;;  %686 = vmatmul.bf16.vlgmr.msra.gmra.mxu2 %v628_v44  ;;  %v2848_v41 = vld [vmem:[%s3655_s0 + $0x298] sm:$0xff]  ;;  %v2831_v44 = vld [vmem:[%s3655_s0 + $0x210] sm:$0xff]  ;;  %p2984_p5 = scmp.ne.s32.totalorder %s2982_s23, %s2983_s21  ;;  %p2989_p10 = scmp.lt.s32.totalorder %s2987_s22, %s2983_s21 }
  0x3b   : > { %1012 = vmatpush.bf16.msrb.mxu2 %v2820_v42  ;;  %769 = vmatmul.bf16.vlgmr.msra.gmra.mxu3 %v711_v45  ;;  %v2856_v42 = vld [vmem:[%s3655_s0 + $0x2d8] sm:$0xff]  ;;  %v2839_v45 = vld [vmem:[%s3655_s0 + $0x250] sm:$0xff] }
  0x3c   : > { %1095 = vmatpush.bf16.msrb.mxu3 %v2828_v43  ;;  %v1207_v43 = vunpack.c.l.b16 %v1109_v38  ;;  %p2985_p6 = pnand %p2984_p5, %p3154_p3  ;;  %p2990_p11 = por %p2989_p10, %p2988_p9 }
  0x3d   : > { %842 = vmatpush.bf16.msrb.mxu0 %v2803_v47  ;;  %v2855_v47 = vld [vmem:[%s3655_s0 + $0x2d0] sm:$0xff] }
  0x3e   : > { %932 = vmatpush.bf16.msrb.mxu1 %v2811_v48  ;;  %v1208_v48 = vpack.c.b16 %v1207_v43, %v1207_v43  ;;  %p2986_p7 = pneg %p2985_p6 }
  0x3f   : > { %1013 = vmatpush.bf16.msrb.mxu2 %v2819_v49  ;;  %v2830_v49 = vld [vmem:[%s3655_s0 + $0x208] sm:$0xff] }
  0x40   : > { %1096 = vmatpush.bf16.msrb.mxu3 %v2827_v50  ;;  %v2838_v50 = vld [vmem:[%s3655_s0 + $0x248] sm:$0xff]  ;;  %p2991_p12 = pnand %p2990_p11, %p2986_p7 }
  0x41   : > { %843 = vmatpush.bf16.msrb.mxu0 %v2802_v51  ;;  %v2846_v51 = vld [vmem:[%s3655_s0 + $0x288] sm:$0xff] }
  0x42   : > { %933 = vmatpush.bf16.msrb.mxu1 %v2810_v52  ;;  %v2854_v52 = vld [vmem:[%s3655_s0 + $0x2c8] sm:$0xff] }
  0x43   : > { %1014 = vmatpush.bf16.msrb.mxu2 %v2818_v53  ;;  %v1212_v53 = vshll.u32 %v1208_v48, 16 }
  0x44   : > { %1097 = vmatpush.bf16.msrb.mxu3 %v2826_v54  ;;  %v1210_v54 = vshrl.u32 %v1208_v48, 16 }
  0x45   : > { %844 = vmatpush.bf16.msrb.mxu0 %v2801_v55  ;;  %v2829_v55 = vld [vmem:[%s3655_s0 + $0x200] sm:$0xff] }
  0x46   : > { %934 = vmatpush.bf16.msrb.mxu1 %v2809_v56  ;;  %v2837_v56 = vld [vmem:[%s3655_s0 + $0x240] sm:$0xff] }
  0x47   : > { %1015 = vmatpush.bf16.msrb.mxu2 %v2817_v57  ;;  %v2845_v57 = vld [vmem:[%s3655_s0 + $0x280] sm:$0xff] }
  0x48   : > { %1098 = vmatpush.bf16.msrb.mxu3 %v2825_v58  ;;  %v2853_v58 = vld [vmem:[%s3655_s0 + $0x2c0] sm:$0xff] }
  0x49   : > { %845 = vmatpush.bf16.msrb.mxu0 %v2800_v60  ;;  %v1377_v60 = vrot.slane %v1210_v54, 1 }
  0x4a   : > { %935 = vmatpush.bf16.msrb.mxu1 %v2808_v61  ;;  %v1378_v61 = vrot.slane %v1212_v53, 2 }
  0x4b   : > { %1016 = vmatpush.bf16.msrb.mxu2 %v2816_v62  ;;  %v2868_v62 = vld [vmem:[%s3655_s0 + $0x338] sm:$0xff] }
  0x4c   : > { %1099 = vmatpush.bf16.msrb.mxu3 %v2824_v63  ;;  %v2876_v63 = vld [vmem:[%s3655_s0 + $0x378] sm:$0xff] }
  0x4d   : > { %846 = vmatpush.bf16.msrb.mxu0 %v2799_v1  ;;  %v2892_v1 = vld [vmem:[%s3655_s0 + $0x3f8] sm:$0xff] }
  0x4e   : > { %936 = vmatpush.bf16.msrb.mxu1 %v2807_v2  ;;  %v1296_v2 = vrot.slane %v1208_v48, 1 }
  0x4f   : > { %1017 = vmatpush.bf16.msrb.mxu2 %v2815_v3 }
  0x50   : > { %1100 = vmatpush.bf16.msrb.mxu3 %v2823_v4  ;;  %v1379_v4 = vor.u32 %v1378_v61, %v1377_v60 }
  0x51   : > { %847 = vmatpush.bf16.msrb.mxu0 %v2798_v6  ;;  %v2875_v6 = vld [vmem:[%s3655_s0 + $0x370] sm:$0xff] }
  0x52   : > { %937 = vmatpush.bf16.msrb.mxu1 %v2806_v7  ;;  %v2883_v7 = vld [vmem:[%s3655_s0 + $0x3b0] sm:$0xff] }
  0x53   : > { %1018 = vmatpush.bf16.msrb.mxu2 %v2814_v8  ;;  %v2891_v8 = vld [vmem:[%s3655_s0 + $0x3f0] sm:$0xff] }
  0x54   : > { %1101 = vmatpush.bf16.msrb.mxu3 %v2822_v9  ;;  %v2866_v9 = vld [vmem:[%s3655_s0 + $0x328] sm:$0xff] }
  0x55   : > { %848 = vmatpush.bf16.msrb.mxu0 %v2797_v12  ;;  %v2890_v12 = vld [vmem:[%s3655_s0 + $0x3e8] sm:$0xff] }
  0x56   : > { %938 = vmatpush.bf16.msrb.mxu1 %v2805_v13  ;;  %v2865_v13 = vld [vmem:[%s3655_s0 + $0x320] sm:$0xff] }
  0x57   : > { %1019 = vmatpush.bf16.msrb.mxu2 %v2813_v14  ;;  %v2873_v14 = vld [vmem:[%s3655_s0 + $0x360] sm:$0xff] }
  0x58   : > { %1102 = vmatpush.bf16.msrb.mxu3 %v2821_v15  ;;  %849 = vmatmul.bf16.vlgmr.msrb.gmra.mxu0 %v3342_v59  ;;  %v1214_v59 = vrot.slane %v1212_v53, 1  ;;  %v1443_v15 = vld [vmem:[%s427_s30] sm:$0xf]  ;;  %s1999_s30 = sshll.u32 %s388_s12, 1 }
  0x59   : > { %1175 = vmatpush.bf16.msra.mxu0 %v2836_v19  ;;  %939 = vmatmul.bf16.vlgmr.msrb.gmra.mxu1 %v881_v25  ;;  %v1541_v18 = vunpack.c.l.b16 %v1443_v15  ;;  %v2864_v19 = vld [vmem:[%s3655_s0 + $0x318] sm:$0xff]  ;;  %v2871_v25 = vld [vmem:[%s3655_s0 + $0x350] sm:$0xff]  ;;  %s390_s13 = scalar_lea.vmem [#allocation2], %s1999_s30 }
  0x5a   : > { %1265 = vmatpush.bf16.msra.mxu1 %v2844_v20  ;;  %1020 = vmatmul.bf16.vlgmr.msrb.gmra.mxu2 %v962_v23  ;;  %v1215_v3 = vor.u32 %v1214_v59, %v1210_v54  ;;  %v2872_v20 = vld [vmem:[%s3655_s0 + $0x358] sm:$0xff]  ;;  %s1823_s27 = sshll.u32 %s390_s13, 4  ;;  %s1824_s27 = int_to_ptr.vmem [resolvable:$true] %s1823_s27 }
  0x5b   : > { %1346 = vmatpush.bf16.msra.mxu2 %v2852_v21  ;;  %1103 = vmatmul.bf16.vlgmr.msrb.gmra.mxu3 %v1045_v24  ;;  %v2880_v21 = vld [vmem:[%s3655_s0 + $0x398] sm:$0xff]  ;;  %v1542_v23 = vpack.c.b16 %v1541_v18, %v1541_v18  ;;  %v2863_v24 = vld [vmem:[%s3655_s0 + $0x310] sm:$0xff] }
  0x5c   : > { %1429 = vmatpush.bf16.msra.mxu3 %v2860_v22  ;;  %v2888_v22 = vld [vmem:[%s3655_s0 + $0x3d8] sm:$0xff] }
  0x5d   : > { %1176 = vmatpush.bf16.msra.mxu0 %v2835_v26  ;;  %v2879_v26 = vld [vmem:[%s3655_s0 + $0x390] sm:$0xff] }
  0x5e   : > { %1266 = vmatpush.bf16.msra.mxu1 %v2843_v27  ;;  %v2887_v27 = vld [vmem:[%s3655_s0 + $0x3d0] sm:$0xff] }
  0x5f   : > { %1347 = vmatpush.bf16.msra.mxu2 %v2851_v28  ;;  %v1546_v28 = vshll.u32 %v1542_v23, 16 }
  0x60   : > { %1430 = vmatpush.bf16.msra.mxu3 %v2859_v29  ;;  %v2862_v29 = vld [vmem:[%s3655_s0 + $0x308] sm:$0xff] }
  0x61   : > { %1177 = vmatpush.bf16.msra.mxu0 %v2834_v30  ;;  %v2870_v30 = vld [vmem:[%s3655_s0 + $0x348] sm:$0xff] }
  0x62   : > { %1267 = vmatpush.bf16.msra.mxu1 %v2842_v31  ;;  %v1544_v31 = vshrl.u32 %v1542_v23, 16 }
  0x63   : > { %1348 = vmatpush.bf16.msra.mxu2 %v2850_v32  ;;  %v2878_v32 = vld [vmem:[%s3655_s0 + $0x388] sm:$0xff] }
  0x64   : > { %1431 = vmatpush.bf16.msra.mxu3 %v2858_v33  ;;  %v2886_v33 = vld [vmem:[%s3655_s0 + $0x3c8] sm:$0xff] }
  0x65   : > { %1178 = vmatpush.bf16.msra.mxu0 %v2833_v34  ;;  %v1548_v34 = vrot.slane %v1546_v28, 1 }
  0x66   : > { %1268 = vmatpush.bf16.msra.mxu1 %v2841_v35  ;;  %v2861_v35 = vld [vmem:[%s3655_s0 + $0x300] sm:$0xff] }
  0x67   : > { %1349 = vmatpush.bf16.msra.mxu2 %v2849_v36  ;;  %v2869_v36 = vld [vmem:[%s3655_s0 + $0x340] sm:$0xff] }
  0x68   : > { %1432 = vmatpush.bf16.msra.mxu3 %v2857_v37  ;;  %v1711_v37 = vrot.slane %v1544_v31, 1 }
  0x69   : > { %1179 = vmatpush.bf16.msra.mxu0 %v2832_v39  ;;  %v2877_v39 = vld [vmem:[%s3655_s0 + $0x380] sm:$0xff] }
  0x6a   : > { %1269 = vmatpush.bf16.msra.mxu1 %v2840_v40  ;;  %v2885_v40 = vld [vmem:[%s3655_s0 + $0x3c0] sm:$0xff] }
  0x6b   : > { %1350 = vmatpush.bf16.msra.mxu2 %v2848_v41  ;;  %v1549_v41 = vor.u32 %v1548_v34, %v1544_v31 }
  0x6c   : > { %1433 = vmatpush.bf16.msra.mxu3 %v2856_v42  ;;  %v1630_v42 = vrot.slane %v1542_v23, 1 }
  0x6d   : > { %1180 = vmatpush.bf16.msra.mxu0 %v2831_v44  ;;  %v2966_v44 = vld [vmem:[%s3656_s1] ss:$0 sm:$0xff] }
  0x6e   : > { %1270 = vmatpush.bf16.msra.mxu1 %v2839_v45 }
  0x6f   : > { %1351 = vmatpush.bf16.msra.mxu2 %v2847_v46 }
  0x70   : > { %1434 = vmatpush.bf16.msra.mxu3 %v2855_v47 }
  0x71   : > { %1181 = vmatpush.bf16.msra.mxu0 %v2830_v49 }
  0x72   : > { %1271 = vmatpush.bf16.msra.mxu1 %v2838_v50 }
  0x73   : > { %1352 = vmatpush.bf16.msra.mxu2 %v2846_v51 }
  0x74   : > { %1435 = vmatpush.bf16.msra.mxu3 %v2854_v52 }
  0x75   : > { %1182 = vmatpush.bf16.msra.mxu0 %v2829_v55 }
  0x76   : > { %1272 = vmatpush.bf16.msra.mxu1 %v2837_v56 }
  0x77   : > { %1353 = vmatpush.bf16.msra.mxu2 %v2845_v57 }
  0x78   : > { %1436 = vmatpush.bf16.msra.mxu3 %v2853_v58  ;;  %1183 = vmatmul.bf16.vlgmr.msra.gmra.mxu0 %v1109_v38  ;;  %v1712_v38 = vrot.slane %v1546_v28, 2 }
  0x79   : > { %1509 = vmatpush.bf16.msrb.mxu0 %v2868_v62  ;;  %1273 = vmatmul.bf16.vlgmr.msra.gmra.mxu1 %v1215_v3 }
  0x7a   : > { %1599 = vmatpush.bf16.msrb.mxu1 %v2876_v63  ;;  %1354 = vmatmul.bf16.vlgmr.msra.gmra.mxu2 %v1296_v2  ;;  %v1713_v43 = vor.u32 %v1712_v38, %v1711_v37 }
  0x7b   : > { %1680 = vmatpush.bf16.msrb.mxu2 %v2884_v0  ;;  %1437 = vmatmul.bf16.vlgmr.msra.gmra.mxu3 %v1379_v4 }
  0x7c   : > { %1763 = vmatpush.bf16.msrb.mxu3 %v2892_v1 }
  0x7d   : > { %1510 = vmatpush.bf16.msrb.mxu0 %v2867_v5 }
  0x7e   : > { %1600 = vmatpush.bf16.msrb.mxu1 %v2875_v6 }
  0x7f   : > { %1681 = vmatpush.bf16.msrb.mxu2 %v2883_v7 }
  0x80   : > { %1764 = vmatpush.bf16.msrb.mxu3 %v2891_v8 }
  0x81   : > { %1511 = vmatpush.bf16.msrb.mxu0 %v2866_v9 }
  0x82   : > { %1601 = vmatpush.bf16.msrb.mxu1 %v2874_v10 }
  0x83   : > { %1682 = vmatpush.bf16.msrb.mxu2 %v2882_v11 }
  0x84   : > { %1765 = vmatpush.bf16.msrb.mxu3 %v2890_v12 }
  0x85   : > { %1512 = vmatpush.bf16.msrb.mxu0 %v2865_v13 }
  0x86   : > { %1602 = vmatpush.bf16.msrb.mxu1 %v2873_v14 }
  0x87   : > { %1683 = vmatpush.bf16.msrb.mxu2 %v2881_v16 }
  0x88   : > { %1766 = vmatpush.bf16.msrb.mxu3 %v2889_v17 }
  0x89   : > { %1513 = vmatpush.bf16.msrb.mxu0 %v2864_v19 }
  0x8a   : > { %1603 = vmatpush.bf16.msrb.mxu1 %v2872_v20 }
  0x8b   : > { %1684 = vmatpush.bf16.msrb.mxu2 %v2880_v21 }
  0x8c   : > { %1767 = vmatpush.bf16.msrb.mxu3 %v2888_v22 }
  0x8d   : > { %1514 = vmatpush.bf16.msrb.mxu0 %v2863_v24 }
  0x8e   : > { %1604 = vmatpush.bf16.msrb.mxu1 %v2871_v25 }
  0x8f   : > { %1685 = vmatpush.bf16.msrb.mxu2 %v2879_v26 }
  0x90   : > { %1768 = vmatpush.bf16.msrb.mxu3 %v2887_v27 }
  0x91   : > { %1515 = vmatpush.bf16.msrb.mxu0 %v2862_v29 }
  0x92   : > { %1605 = vmatpush.bf16.msrb.mxu1 %v2870_v30 }
  0x93   : > { %1686 = vmatpush.bf16.msrb.mxu2 %v2878_v32 }
  0x94   : > { %1769 = vmatpush.bf16.msrb.mxu3 %v2886_v33 }
  0x95   : > { %1516 = vmatpush.bf16.msrb.mxu0 %v2861_v35 }
  0x96   : > { %1606 = vmatpush.bf16.msrb.mxu1 %v2869_v36 }
  0x97   : > { %1687 = vmatpush.bf16.msrb.mxu2 %v2877_v39 }
  0x98   : > { %1770 = vmatpush.bf16.msrb.mxu3 %v2885_v40  ;;  %1517 = vmatmul.bf16.vlgmr.msrb.gmra.mxu0 %v1443_v15 }
  0x99   : > { %1607 = vmatmul.bf16.vlgmr.msrb.gmra.mxu1 %v1549_v41 }
  0x9a   : > { %1688 = vmatmul.bf16.vlgmr.msrb.gmra.mxu2 %v1630_v42 }
  0x9b   : > { %1771 = vmatmul.bf16.vlgmr.msrb.gmra.mxu3 %v1713_v43 }
  0xb5   : > { %v516_v45 = vpop.f32.mrf.mxu0 }
  0xb6   : > { %v520_v46 = vadd.f32 %v2966_v44, %v516_v45  ;;  %v606_v47 = vpop.f32.mrf.mxu1 }
  0xb8   : > { %v610_v48 = vadd.f32 %v606_v47, %v520_v46 }
  0xbd   : > { %v687_v49 = vpop.f32.mrf.mxu2  ;;  %v518_v52 = vpop.f32.mrf.mxu0 }
  0xbe   : > { %v691_v50 = vadd.f32 %v687_v49, %v610_v48  ;;  %v770_v51 = vpop.f32.mrf.mxu3  ;;  %v608_v54 = vpop.f32.mrf.mxu1 }
  0xc0   : > { %v774_v53 = vadd.f32 %v770_v51, %v691_v50 }
  0xc5   : > { %v689_v55 = vpop.f32.mrf.mxu2 }
  0xc6   : > { %v772_v56 = vpop.f32.mrf.mxu3 }
  0xd5   : > { %v850_v57 = vpop.f32.mrf.mxu0 }
  0xd6   : > { %v940_v58 = vpop.f32.mrf.mxu1  ;;  %v854_v3 = vadd.f32 %v850_v57, %v774_v53 }
  0xd8   : > { %v944_v7 = vadd.f32 %v940_v58, %v854_v3 }
  0xdd   : > { %v1021_v59 = vpop.f32.mrf.mxu2  ;;  %v852_v61 = vpop.f32.mrf.mxu0 }
  0xde   : > { %v1104_v60 = vpop.f32.mrf.mxu3  ;;  %v942_v62 = vpop.f32.mrf.mxu1  ;;  %v1025_v9 = vadd.f32 %v1021_v59, %v944_v7 }
  0xe0   : > { %v1108_v12 = vadd.f32 %v1104_v60, %v1025_v9 }
  0xe5   : > { %v1023_v63 = vpop.f32.mrf.mxu2 }
  0xe6   : > { %v1106_v0 = vpop.f32.mrf.mxu3 }
  0xf5   : > { %v1184_v1 = vpop.f32.mrf.mxu0 }
  0xf6   : > { %v1274_v2 = vpop.f32.mrf.mxu1  ;;  %v1188_v13 = vadd.f32 %v1184_v1, %v1108_v12 }
  0xf8   : > { %v1278_v14 = vadd.f32 %v1274_v2, %v1188_v13 }
  0xfd   : > { %v1355_v4 = vpop.f32.mrf.mxu2  ;;  %v1186_v6 = vpop.f32.mrf.mxu0 }
  0xfe   : > { %v1438_v5 = vpop.f32.mrf.mxu3  ;;  %v1276_v8 = vpop.f32.mrf.mxu1  ;;  %v1359_v15 = vadd.f32 %v1355_v4, %v1278_v14 }
 0x100   : > { %v1442_v16 = vadd.f32 %v1438_v5, %v1359_v15 }
 0x105   : > { %v1357_v10 = vpop.f32.mrf.mxu2 }
 0x106   : > { %v1440_v11 = vpop.f32.mrf.mxu3 }
 0x115   : > { %v1518_v17 = vpop.f32.mrf.mxu0 }
 0x116   : > { %v1608_v18 = vpop.f32.mrf.mxu1  ;;  %v1522_v19 = vadd.f32 %v1518_v17, %v1442_v16 }
 0x118   : > { %v1612_v20 = vadd.f32 %v1608_v18, %v1522_v19 }
 0x11d   : > { %v1689_v21 = vpop.f32.mrf.mxu2  ;;  %v1520_v24 = vpop.f32.mrf.mxu0 }
 0x11e   : > { %v1772_v22 = vpop.f32.mrf.mxu3  ;;  %v1693_v23 = vadd.f32 %v1689_v21, %v1612_v20  ;;  %v1610_v25 = vpop.f32.mrf.mxu1 }
 0x120   : > { %v1776_v26 = vadd.f32 %v1772_v22, %v1693_v23 }
 0x122   : > { %v1778_v27 = vsel %vm1777_vm0, %v1776_v26, 0.0  ;;  %v1785_v28 = vmul.f32 %v1776_v26, %v1776_v26  ;;  %1796 = vst [vmem:[%s436_s16] sm:$0x1f] %v1776_v26 }
 0x123   : > { %v1779_v29 = vrot.slane %v1778_v27, 4 }
 0x124   : > { %v1786_v30 = vsel %vm1777_vm0, %v1785_v28, 0.0 }
 0x125   : > { %v1780_v31 = vadd.f32 %v1779_v29, %v1778_v27  ;;  %v1787_v32 = vrot.slane %v1786_v30, 4  ;;  %v1691_v33 = vpop.f32.mrf.mxu2 }
 0x126   : > { %v1774_v34 = vpop.f32.mrf.mxu3 }
 0x127   : > { %v1781_v35 = vrot.slane %v1780_v31, 2  ;;  %v1788_v36 = vadd.f32 %v1787_v32, %v1786_v30 }
 0x129   : > { %v1782_v37 = vadd.f32 %v1781_v35, %v1780_v31  ;;  %v1789_v38 = vrot.slane %v1788_v36, 2 }
 0x12b   : > { %v1783_v39 = vrot.slane %v1782_v37, 1  ;;  %v1790_v40 = vadd.f32 %v1789_v38, %v1788_v36 }
 0x12d   : > { %v1791_v41 = vrot.slane %v1790_v40, 1  ;;  %v1784_v42 = vadd.f32 %v1783_v39, %v1782_v37 }
 0x12f   : > { %v1792_v43 = vadd.f32 %v1791_v41, %v1790_v40 }
 0x131   : > { %v1794_v44 = vsel %vm1793_vm1, %v1784_v42, %v1792_v43 }
 0x132   : > { %1795 = vst [vmem:[%s390_s13] sm:$0x3] %v1794_v44 }
 0x133   : > { %2994 = shalt.err (!%p2991_p12)
}
 0x134   : > { %2895 = dma.vmem_to_hbm [thread:$0]  (%p3154_p3), %s1824_s27, 32, %s1826_s29, %s1806_s11  }
 0x135 PF: > { %p2901_p13 = scmp.ge.s32.totalorder %s3061_s8, 2  ;;  %s1848_s12 = sand.u32 1, %s3033_s24  }
 0x136   : > { %s1849_s18 = scalar_lea.sflag [#allocation3], %s1848_s12 }
 0x137   : > { %p2898_p0 = pnand %p2901_p13, %p3163_p8 }
 0x139   : > { %p2899_p1 = pneg %p2898_p0 }
 0x13b   : > { %3028 = dma.done.wait (%p2899_p1), %s1849_s18, 32  }
 0x13c   : > { %3030 = vsyncadd (%p2899_p1), %s1849_s18, 4294967264  ;;  %s21_s8 = sadd.s32 1, %s3061_s8   ;;  %s3675_s27 = sld [smem:[#allocation5_spill]] }
 0x13d   : > { %p18_p2 = scmp.ge.s32.totalorder %s21_s8, 12   ;;  %s3676_s28 = sld [smem:[#allocation6_spill]] }
 0x13e   : > { %s3677_s29 = sld [smem:[#allocation7_spill]]  ;;  %s3679_s24 = smov %s3037_s25 }
 0x13f   : > { %s3678_s30 = sld [smem:[#allocation8_spill]]  ;;  %s3680_s25 = smov %s3041_s26 }
 0x140   : > { %s3681_s26 = smov %s3172_s19  ;;  %20 = sbr.rel (!%p18_p2) target bundleno = 5 (0x5), region = 115 }
 0x145   :  { %1855 = vsyncpa [#allocation3], 1 }
 0x146   :  { %1857 = vsyncpa [#allocation3 + $0x1], 1 }

</bundles_post_ra>
